<compile_context>
chip_gen: v7x
topology: tpu7x:2x2x1
jax: 0.10.0
libtpu: 0.0.40
codegen_flags: <defaults>
</compile_context>

<pallas_src>
import functools

import jax
import jax.numpy as jnp
from jax.experimental import pallas as pl
from jax.experimental.pallas import tpu as pltpu


def transformer_unit_kernel(
    x_ref,        # (1, S, E)  f32
    wq_ref,       # (E, H*E)   bf16  fused per-head Wq^T
    wk_ref,       # (E, H*E)   bf16
    wv_ref,       # (E, H*E)   bf16
    wz_ref,       # (H*E, E)   bf16  Wz^T
    w1_ref,       # (E, E*F)   bf16  MLP W1^T
    w2_ref,       # (E*F, E)   bf16  MLP W2^T
    vecs_ref,     # (8, E)     f32   rows: bz, g1, b1, bm2, g2, b2, pad, pad
    bm1_ref,      # (1, E*F)   f32
    z_out_ref,    # (1, S, E)  f32
    attn_out_ref,  # (1, S, S) f32
    q_s,          # scratch VMEM (S, H*E) bf16
    k_s,          # scratch VMEM (S, H*E) bf16
    v_s,          # scratch VMEM (S, H*E) bf16
    zcat_s,       # scratch VMEM (S, H*E) bf16
    *, num_heads, embed_size,
):
    x_f32 = x_ref[0]                                   # (S, E) f32
    x = x_f32.astype(jnp.bfloat16)
    S = x_f32.shape[0]
    E = embed_size
    inv_sqrt_e = float(E) ** -0.5
    inv_heads = 1.0 / num_heads

    # Fused QKV projections: one wide (S,E)@(E,H*E) matmul per projection.
    q_s[...] = jnp.dot(x, wq_ref[...], preferred_element_type=jnp.float32
                       ).astype(jnp.bfloat16)
    k_s[...] = jnp.dot(x, wk_ref[...], preferred_element_type=jnp.float32
                       ).astype(jnp.bfloat16)
    v_s[...] = jnp.dot(x, wv_ref[...], preferred_element_type=jnp.float32
                       ).astype(jnp.bfloat16)

    # Accumulate the head-averaged attention map directly in the output block.
    attn_out_ref[0] = jnp.zeros((S, S), jnp.float32)

    for h in range(num_heads):                         # small static H
        lo = h * E
        q_h = q_s[:, lo:lo + E]                        # (S, E) bf16
        k_h = k_s[:, lo:lo + E]
        v_h = v_s[:, lo:lo + E]

        # scores = q @ k^T, contracting last dims directly (no k transpose),
        # with the 1/sqrt(E) scale applied once.
        s = jax.lax.dot_general(
            q_h, k_h, dimension_numbers=(((1,), (1,)), ((), ())),
            preferred_element_type=jnp.float32) * inv_sqrt_e

        # stable softmax over dim=2 (last), EUP approx reciprocal for the norm
        s = s - jnp.max(s, axis=-1, keepdims=True)
        p = jnp.exp(s)
        p = p * pl.reciprocal(jnp.sum(p, axis=-1, keepdims=True), approx=True)

        attn_out_ref[0] += p * inv_heads

        zh = jnp.dot(p.astype(jnp.bfloat16), v_h,
                     preferred_element_type=jnp.float32)
        zcat_s[:, lo:lo + E] = zh.astype(jnp.bfloat16)

    # Output projection: one (S, H*E) @ (H*E, E) matmul + bias.
    bz = vecs_ref[0:1, :]
    g1 = vecs_ref[1:2, :]
    b1 = vecs_ref[2:3, :]
    bm2 = vecs_ref[3:4, :]
    g2 = vecs_ref[4:5, :]
    b2 = vecs_ref[5:6, :]

    z = jnp.dot(zcat_s[...], wz_ref[...],
                preferred_element_type=jnp.float32) + bz

    def layernorm(t, g, b):
        mu = jnp.mean(t, axis=-1, keepdims=True)
        var = jnp.mean(jnp.square(t - mu), axis=-1, keepdims=True)
        return (t - mu) * jax.lax.rsqrt(var + 1e-5) * g + b

    # residual + layernorm_1 ; dropout = identity (eval mode)
    z = layernorm(z + x_f32, g1, b1)

    # MLP: Linear -> ReLU -> Linear (bf16 matmuls, f32 accumulate + bias)
    h1 = jnp.dot(z.astype(jnp.bfloat16), w1_ref[...],
                 preferred_element_type=jnp.float32) + bm1_ref[0:1, :]
    h1 = jnp.maximum(h1, 0.0)
    zff = jnp.dot(h1.astype(jnp.bfloat16), w2_ref[...],
                  preferred_element_type=jnp.float32) + bm2

    # residual + layernorm_2 ; dropout = identity (eval mode)
    z2 = layernorm(zff + z, g2, b2)
    z_out_ref[0] = z2.astype(z_out_ref.dtype)


def transformer_unit(x, params, *, num_heads, mlp_factor):
    B, S, E = x.shape
    H, F = num_heads, mlp_factor

    kernel = functools.partial(
        transformer_unit_kernel, num_heads=H, embed_size=E)

    def resident(shape):
        # whole array resident, independent of the batch grid index
        return pl.BlockSpec(shape, lambda b: tuple(0 for _ in shape))

    in_specs = [
        pl.BlockSpec((1, S, E), lambda b: (b, 0, 0)),    # x
        resident((E, H * E)),                            # WqT (all heads)
        resident((E, H * E)),                            # WkT
        resident((E, H * E)),                            # WvT
        resident((H * E, E)),                            # WzT
        resident((E, E * F)),                            # W1T
        resident((E * F, E)),                            # W2T
        resident((8, E)),                                # packed bias/LN vectors
        resident((1, E * F)),                            # bm1
    ]
    out_specs = [
        pl.BlockSpec((1, S, E), lambda b: (b, 0, 0)),
        pl.BlockSpec((1, S, S), lambda b: (b, 0, 0)),
    ]
    out_shape = [
        jax.ShapeDtypeStruct((B, S, E), jnp.float32),
        jax.ShapeDtypeStruct((B, S, S), jnp.float32),
    ]

    return pl.pallas_call(
        kernel,
        out_shape=out_shape,
        grid_spec=pltpu.PrefetchScalarGridSpec(
            num_scalar_prefetch=0,
            grid=(B,),
            in_specs=in_specs,
            out_specs=out_specs,
            scratch_shapes=[
                pltpu.VMEM((S, H * E), jnp.bfloat16),    # q
                pltpu.VMEM((S, H * E), jnp.bfloat16),    # k
                pltpu.VMEM((S, H * E), jnp.bfloat16),    # v
                pltpu.VMEM((S, H * E), jnp.bfloat16),    # zcat
            ],
        ),
        compiler_params=pltpu.CompilerParams(
            dimension_semantics=("parallel",),
            vmem_limit_bytes=64 * 1024 * 1024,
        ),
    )(
        x,
        params["wqT"], params["wkT"], params["wvT"], params["wzT"],
        params["w1T"], params["w2T"],
        params["vecs"], params["bm1"],
    )


def reference_forward(x, params, *, num_heads):
    # pure-JAX f32 replica of the PyTorch forward (eval mode) for verification
    B, S, E = x.shape
    wq = params["wqT"].astype(jnp.float32)
    wk = params["wkT"].astype(jnp.float32)
    wv = params["wvT"].astype(jnp.float32)
    wz = params["wzT"].astype(jnp.float32)
    w1 = params["w1T"].astype(jnp.float32)
    w2 = params["w2T"].astype(jnp.float32)
    vecs = params["vecs"]
    bz, g1, b1, bm2, g2, b2 = (vecs[i] for i in range(6))
    bm1 = params["bm1"][0]

    scale = E ** 0.25
    attn = jnp.zeros((B, S, S), jnp.float32)
    outs = []
    for h in range(num_heads):
        lo = h * E
        q = x @ wq[:, lo:lo + E]
        k = x @ wk[:, lo:lo + E]
        v = x @ wv[:, lo:lo + E]
        w = jax.nn.softmax((q / scale) @ jnp.swapaxes(k / scale, 1, 2), axis=2)
        attn = attn + w
        outs.append(w @ v)
    attn = attn / num_heads
    cat = jnp.concatenate(outs, axis=-1)
    z = cat @ wz + bz

    def ln(t, g, b):
        mu = jnp.mean(t, -1, keepdims=True)
        var = jnp.mean((t - mu) ** 2, -1, keepdims=True)
        return (t - mu) / jnp.sqrt(var + 1e-5) * g + b

    z = ln(z + x, g1, b1)
    zff = jnp.maximum(z @ w1 + bm1, 0.0) @ w2 + bm2
    z = ln(zff + z, g2, b2)
    return z, attn


if __name__ == "__main__":
    # 128-aligned S and E -> lane-dense outputs and lane-tile-aligned head slices
    B, S, E = 2, 128, 128
    H, F = 2, 2

    key = jax.random.PRNGKey(0)
    ks = jax.random.split(key, 10)

    def init(k, shape, fan_in):
        bound = 1.0 / (fan_in ** 0.5)
        return jax.random.uniform(k, shape, jnp.float32, -bound, bound)

    wqT = init(ks[0], (E, H * E), E)          # fused per-head Wq^T: (in, H*out)
    wkT = init(ks[1], (E, H * E), E)
    wvT = init(ks[2], (E, H * E), E)
    wzT = init(ks[3], (H * E, E), H * E)      # Wz^T
    bz = init(ks[4], (E,), H * E)
    w1T = init(ks[5], (E, E * F), E)
    bm1 = init(ks[6], (1, E * F), E)
    w2T = init(ks[7], (E * F, E), E * F)
    bm2 = init(ks[8], (E,), E * F)
    g1 = jnp.ones((E,), jnp.float32)
    b1 = jnp.zeros((E,), jnp.float32)
    g2 = jnp.ones((E,), jnp.float32)
    b2 = jnp.zeros((E,), jnp.float32)

    # pack the six small (E,) vectors into one (8, E) slab (rows 6,7 padding)
    vecs = jnp.zeros((8, E), jnp.float32)
    vecs = (vecs.at[0].set(bz).at[1].set(g1).at[2].set(b1)
                .at[3].set(bm2).at[4].set(g2).at[5].set(b2))

    params = {
        "wqT": wqT.astype(jnp.bfloat16),
        "wkT": wkT.astype(jnp.bfloat16),
        "wvT": wvT.astype(jnp.bfloat16),
        "wzT": wzT.astype(jnp.bfloat16),
        "w1T": w1T.astype(jnp.bfloat16),
        "w2T": w2T.astype(jnp.bfloat16),
        "vecs": vecs,
        "bm1": bm1,
    }

    x = jax.random.normal(ks[9], (B, S, E), jnp.float32)

    z, attn = transformer_unit(x, params, num_heads=H, mlp_factor=F)
    jax.block_until_ready(z)
    jax.block_until_ready(attn)

    z_ref, attn_ref = reference_forward(x, params, num_heads=H)
    # bf16 matmul operands + approx reciprocal -> looser tolerance vs f32 reference
    assert jnp.allclose(z, z_ref, atol=5e-2, rtol=5e-2), "z mismatch"
    assert jnp.allclose(attn, attn_ref, atol=2e-2, rtol=2e-2), "attn mismatch"

    print("KERNEL_OK")
</pallas_src>

<mosaic_0001>
module attributes {stable_mosaic.version = 11 : i64} {
  func.func @transformer_unit_kernel(%arg0: i32, %arg1: memref<1x128x128xf32, #tpu.memory_space<vmem>>, %arg2: memref<128x256xbf16, #tpu.memory_space<vmem>>, %arg3: memref<128x256xbf16, #tpu.memory_space<vmem>>, %arg4: memref<128x256xbf16, #tpu.memory_space<vmem>>, %arg5: memref<256x128xbf16, #tpu.memory_space<vmem>>, %arg6: memref<128x256xbf16, #tpu.memory_space<vmem>>, %arg7: memref<256x128xbf16, #tpu.memory_space<vmem>>, %arg8: memref<8x128xf32, #tpu.memory_space<vmem>>, %arg9: memref<1x256xf32, #tpu.memory_space<vmem>>, %arg10: memref<1x128x128xf32, #tpu.memory_space<vmem>>, %arg11: memref<1x128x128xf32, #tpu.memory_space<vmem>>, %arg12: memref<128x256xbf16, #tpu.memory_space<vmem>>, %arg13: memref<128x256xbf16, #tpu.memory_space<vmem>>, %arg14: memref<128x256xbf16, #tpu.memory_space<vmem>>, %arg15: memref<128x256xbf16, #tpu.memory_space<vmem>>) attributes {dimension_semantics = [#tpu.dimension_semantics<parallel>], iteration_bounds = array<i64: 2>, scalar_prefetch = 0 : i64, scratch_operands = 4 : i64, tpu.core_type = #tpu.core_type<tc>, window_params = [{transform_indices = @transform_0, window_bounds = array<i64: 1, 128, 128>}, {pipeline_mode = #tpu.pipeline_mode<synchronous>, transform_indices = @transform_1, window_bounds = array<i64: 128, 256>}, {pipeline_mode = #tpu.pipeline_mode<synchronous>, transform_indices = @transform_2, window_bounds = array<i64: 128, 256>}, {pipeline_mode = #tpu.pipeline_mode<synchronous>, transform_indices = @transform_3, window_bounds = array<i64: 128, 256>}, {pipeline_mode = #tpu.pipeline_mode<synchronous>, transform_indices = @transform_4, window_bounds = array<i64: 256, 128>}, {pipeline_mode = #tpu.pipeline_mode<synchronous>, transform_indices = @transform_5, window_bounds = array<i64: 128, 256>}, {pipeline_mode = #tpu.pipeline_mode<synchronous>, transform_indices = @transform_6, window_bounds = array<i64: 256, 128>}, {pipeline_mode = #tpu.pipeline_mode<synchronous>, transform_indices = @transform_7, window_bounds = array<i64: 8, 128>}, {pipeline_mode = #tpu.pipeline_mode<synchronous>, transform_indices = @transform_8, window_bounds = array<i64: 1, 256>}, {transform_indices = @transform_9, window_bounds = array<i64: 1, 128, 128>}, {transform_indices = @transform_10, window_bounds = array<i64: 1, 128, 128>}]} {
    %c0 = arith.constant 0 : index
    %c0_0 = arith.constant 0 : index
    %c0_1 = arith.constant 0 : index
    %0 = vector.load %arg1[%c0, %c0_0, %c0_1] : memref<1x128x128xf32, #tpu.memory_space<vmem>>, vector<1x128x128xf32>
    %1 = vector.shape_cast %0 : vector<1x128x128xf32> to vector<128x128xf32>
    %2 = arith.truncf %1 : vector<128x128xf32> to vector<128x128xbf16>
    %c0_2 = arith.constant 0 : index
    %c0_3 = arith.constant 0 : index
    %3 = vector.load %arg2[%c0_2, %c0_3] : memref<128x256xbf16, #tpu.memory_space<vmem>>, vector<128x256xbf16>
    %cst = arith.constant dense<0.000000e+00> : vector<128x256xf32>
    %4 = tpu.matmul %2, %3, %cst {dimension_numbers = #tpu.dot_dimension_numbers<[1], [0], [0], [1], [0, 0, 1, 1], [], []>} : vector<128x128xbf16>, vector<128x256xbf16>, vector<128x256xf32> -> vector<128x256xf32>
    %5 = arith.truncf %4 : vector<128x256xf32> to vector<128x256xbf16>
    %c0_4 = arith.constant 0 : index
    %c0_5 = arith.constant 0 : index
    %6 = vector.load %arg12[%c0_4, %c0_5] : memref<128x256xbf16, #tpu.memory_space<vmem>>, vector<128x256xbf16>
    tpu.vector_store %arg12[%c0_4, %c0_5], %5 {strides = array<i32>} : memref<128x256xbf16, #tpu.memory_space<vmem>>, vector<128x256xbf16>,
    %c0_6 = arith.constant 0 : index
    %c0_7 = arith.constant 0 : index
    %7 = vector.load %arg3[%c0_6, %c0_7] : memref<128x256xbf16, #tpu.memory_space<vmem>>, vector<128x256xbf16>
    %cst_8 = arith.constant dense<0.000000e+00> : vector<128x256xf32>
    %8 = tpu.matmul %2, %7, %cst_8 {dimension_numbers = #tpu.dot_dimension_numbers<[1], [0], [0], [1], [0, 0, 1, 1], [], []>} : vector<128x128xbf16>, vector<128x256xbf16>, vector<128x256xf32> -> vector<128x256xf32>
    %9 = arith.truncf %8 : vector<128x256xf32> to vector<128x256xbf16>
    %c0_9 = arith.constant 0 : index
    %c0_10 = arith.constant 0 : index
    %10 = vector.load %arg13[%c0_9, %c0_10] : memref<128x256xbf16, #tpu.memory_space<vmem>>, vector<128x256xbf16>
    tpu.vector_store %arg13[%c0_9, %c0_10], %9 {strides = array<i32>} : memref<128x256xbf16, #tpu.memory_space<vmem>>, vector<128x256xbf16>,
    %c0_11 = arith.constant 0 : index
    %c0_12 = arith.constant 0 : index
    %11 = vector.load %arg4[%c0_11, %c0_12] : memref<128x256xbf16, #tpu.memory_space<vmem>>, vector<128x256xbf16>
    %cst_13 = arith.constant dense<0.000000e+00> : vector<128x256xf32>
    %12 = tpu.matmul %2, %11, %cst_13 {dimension_numbers = #tpu.dot_dimension_numbers<[1], [0], [0], [1], [0, 0, 1, 1], [], []>} : vector<128x128xbf16>, vector<128x256xbf16>, vector<128x256xf32> -> vector<128x256xf32>
    %13 = arith.truncf %12 : vector<128x256xf32> to vector<128x256xbf16>
    %c0_14 = arith.constant 0 : index
    %c0_15 = arith.constant 0 : index
    %14 = vector.load %arg14[%c0_14, %c0_15] : memref<128x256xbf16, #tpu.memory_space<vmem>>, vector<128x256xbf16>
    tpu.vector_store %arg14[%c0_14, %c0_15], %13 {strides = array<i32>} : memref<128x256xbf16, #tpu.memory_space<vmem>>, vector<128x256xbf16>,
    %cst_16 = arith.constant 0.000000e+00 : f32
    %15 = vector.broadcast %cst_16 : f32 to vector<128x128xf32>
    %c0_17 = arith.constant 0 : index
    %c0_18 = arith.constant 0 : index
    %c0_19 = arith.constant 0 : index
    %16 = vector.load %arg11[%c0_17, %c0_18, %c0_19] : memref<1x128x128xf32, #tpu.memory_space<vmem>>, vector<1x128x128xf32>
    %17 = vector.shape_cast %16 : vector<1x128x128xf32> to vector<128x128xf32>
    %18 = vector.shape_cast %15 : vector<128x128xf32> to vector<1x128x128xf32>
    tpu.vector_store %arg11[%c0_17, %c0_18, %c0_19], %18 {strides = array<i32>} : memref<1x128x128xf32, #tpu.memory_space<vmem>>, vector<1x128x128xf32>,
    %c0_20 = arith.constant 0 : index
    %c0_21 = arith.constant 0 : index
    %19 = vector.load %arg12[%c0_20, %c0_21] : memref<128x256xbf16, #tpu.memory_space<vmem>>, vector<128x128xbf16>
    %c0_22 = arith.constant 0 : index
    %c0_23 = arith.constant 0 : index
    %20 = vector.load %arg13[%c0_22, %c0_23] : memref<128x256xbf16, #tpu.memory_space<vmem>>, vector<128x128xbf16>
    %c0_24 = arith.constant 0 : index
    %c0_25 = arith.constant 0 : index
    %21 = vector.load %arg14[%c0_24, %c0_25] : memref<128x256xbf16, #tpu.memory_space<vmem>>, vector<128x128xbf16>
    %cst_26 = arith.constant dense<0.000000e+00> : vector<128x128xf32>
    %22 = tpu.matmul %19, %20, %cst_26 {dimension_numbers = #tpu.dot_dimension_numbers<[1], [1], [0], [0], [0, 0, 1, 0], [], []>} : vector<128x128xbf16>, vector<128x128xbf16>, vector<128x128xf32> -> vector<128x128xf32>
    %cst_27 = arith.constant 0.0883883461 : f32
    %23 = vector.broadcast %cst_27 : f32 to vector<128x128xf32>
    %24 = arith.mulf %22, %23 : vector<128x128xf32>
    %cst_28 = arith.constant dense<0xFF800000> : vector<128xf32>
    %25 = vector.multi_reduction <maximumf>, %24, %cst_28 [1] : vector<128x128xf32> to vector<128xf32>
    %26 = vector.shape_cast %25 : vector<128xf32> to vector<128x1xf32>
    %27 = vector.broadcast %26 : vector<128x1xf32> to vector<128x128xf32>
    %28 = arith.subf %24, %27 : vector<128x128xf32>
    %29 = math.exp %28 : vector<128x128xf32>
    %cst_29 = arith.constant dense<0.000000e+00> : vector<128xf32>
    %30 = vector.multi_reduction <add>, %29, %cst_29 [1] : vector<128x128xf32> to vector<128xf32>
    %31 = vector.shape_cast %30 : vector<128xf32> to vector<128x1xf32>
    %32 = tpu.reciprocal %31 {approx = true} : vector<128x1xf32> -> vector<128x1xf32>
    %33 = vector.broadcast %32 : vector<128x1xf32> to vector<128x128xf32>
    %34 = arith.mulf %29, %33 : vector<128x128xf32>
    %c0_30 = arith.constant 0 : index
    %c0_31 = arith.constant 0 : index
    %c0_32 = arith.constant 0 : index
    %35 = vector.load %arg11[%c0_30, %c0_31, %c0_32] : memref<1x128x128xf32, #tpu.memory_space<vmem>>, vector<1x128x128xf32>
    %36 = vector.shape_cast %35 : vector<1x128x128xf32> to vector<128x128xf32>
    %cst_33 = arith.constant 5.000000e-01 : f32
    %37 = vector.broadcast %cst_33 : f32 to vector<128x128xf32>
    %38 = arith.mulf %34, %37 : vector<128x128xf32>
    %39 = arith.addf %36, %38 : vector<128x128xf32>
    %c0_34 = arith.constant 0 : index
    %c0_35 = arith.constant 0 : index
    %c0_36 = arith.constant 0 : index
    %40 = vector.load %arg11[%c0_34, %c0_35, %c0_36] : memref<1x128x128xf32, #tpu.memory_space<vmem>>, vector<1x128x128xf32>
    %41 = vector.shape_cast %40 : vector<1x128x128xf32> to vector<128x128xf32>
    %42 = vector.shape_cast %39 : vector<128x128xf32> to vector<1x128x128xf32>
    tpu.vector_store %arg11[%c0_34, %c0_35, %c0_36], %42 {strides = array<i32>} : memref<1x128x128xf32, #tpu.memory_space<vmem>>, vector<1x128x128xf32>,
    %43 = arith.truncf %34 : vector<128x128xf32> to vector<128x128xbf16>
    %cst_37 = arith.constant dense<0.000000e+00> : vector<128x128xf32>
    %44 = tpu.matmul %43, %21, %cst_37 {dimension_numbers = #tpu.dot_dimension_numbers<[1], [0], [0], [1], [0, 0, 1, 1], [], []>} : vector<128x128xbf16>, vector<128x128xbf16>, vector<128x128xf32> -> vector<128x128xf32>
    %45 = arith.truncf %44 : vector<128x128xf32> to vector<128x128xbf16>
    %c0_38 = arith.constant 0 : index
    %c0_39 = arith.constant 0 : index
    %46 = vector.load %arg15[%c0_38, %c0_39] : memref<128x256xbf16, #tpu.memory_space<vmem>>, vector<128x128xbf16>
    tpu.vector_store %arg15[%c0_38, %c0_39], %45 {strides = array<i32>} : memref<128x256xbf16, #tpu.memory_space<vmem>>, vector<128x128xbf16>,
    %c0_40 = arith.constant 0 : index
    %c128 = arith.constant 128 : index
    %47 = vector.load %arg12[%c0_40, %c128] : memref<128x256xbf16, #tpu.memory_space<vmem>>, vector<128x128xbf16>
    %c0_41 = arith.constant 0 : index
    %c128_42 = arith.constant 128 : index
    %48 = vector.load %arg13[%c0_41, %c128_42] : memref<128x256xbf16, #tpu.memory_space<vmem>>, vector<128x128xbf16>
    %c0_43 = arith.constant 0 : index
    %c128_44 = arith.constant 128 : index
    %49 = vector.load %arg14[%c0_43, %c128_44] : memref<128x256xbf16, #tpu.memory_space<vmem>>, vector<128x128xbf16>
    %cst_45 = arith.constant dense<0.000000e+00> : vector<128x128xf32>
    %50 = tpu.matmul %47, %48, %cst_45 {dimension_numbers = #tpu.dot_dimension_numbers<[1], [1], [0], [0], [0, 0, 1, 0], [], []>} : vector<128x128xbf16>, vector<128x128xbf16>, vector<128x128xf32> -> vector<128x128xf32>
    %cst_46 = arith.constant 0.0883883461 : f32
    %51 = vector.broadcast %cst_46 : f32 to vector<128x128xf32>
    %52 = arith.mulf %50, %51 : vector<128x128xf32>
    %cst_47 = arith.constant dense<0xFF800000> : vector<128xf32>
    %53 = vector.multi_reduction <maximumf>, %52, %cst_47 [1] : vector<128x128xf32> to vector<128xf32>
    %54 = vector.shape_cast %53 : vector<128xf32> to vector<128x1xf32>
    %55 = vector.broadcast %54 : vector<128x1xf32> to vector<128x128xf32>
    %56 = arith.subf %52, %55 : vector<128x128xf32>
    %57 = math.exp %56 : vector<128x128xf32>
    %cst_48 = arith.constant dense<0.000000e+00> : vector<128xf32>
    %58 = vector.multi_reduction <add>, %57, %cst_48 [1] : vector<128x128xf32> to vector<128xf32>
    %59 = vector.shape_cast %58 : vector<128xf32> to vector<128x1xf32>
    %60 = tpu.reciprocal %59 {approx = true} : vector<128x1xf32> -> vector<128x1xf32>
    %61 = vector.broadcast %60 : vector<128x1xf32> to vector<128x128xf32>
    %62 = arith.mulf %57, %61 : vector<128x128xf32>
    %c0_49 = arith.constant 0 : index
    %c0_50 = arith.constant 0 : index
    %c0_51 = arith.constant 0 : index
    %63 = vector.load %arg11[%c0_49, %c0_50, %c0_51] : memref<1x128x128xf32, #tpu.memory_space<vmem>>, vector<1x128x128xf32>
    %64 = vector.shape_cast %63 : vector<1x128x128xf32> to vector<128x128xf32>
    %cst_52 = arith.constant 5.000000e-01 : f32
    %65 = vector.broadcast %cst_52 : f32 to vector<128x128xf32>
    %66 = arith.mulf %62, %65 : vector<128x128xf32>
    %67 = arith.addf %64, %66 : vector<128x128xf32>
    %c0_53 = arith.constant 0 : index
    %c0_54 = arith.constant 0 : index
    %c0_55 = arith.constant 0 : index
    %68 = vector.load %arg11[%c0_53, %c0_54, %c0_55] : memref<1x128x128xf32, #tpu.memory_space<vmem>>, vector<1x128x128xf32>
    %69 = vector.shape_cast %68 : vector<1x128x128xf32> to vector<128x128xf32>
    %70 = vector.shape_cast %67 : vector<128x128xf32> to vector<1x128x128xf32>
    tpu.vector_store %arg11[%c0_53, %c0_54, %c0_55], %70 {strides = array<i32>} : memref<1x128x128xf32, #tpu.memory_space<vmem>>, vector<1x128x128xf32>,
    %71 = arith.truncf %62 : vector<128x128xf32> to vector<128x128xbf16>
    %cst_56 = arith.constant dense<0.000000e+00> : vector<128x128xf32>
    %72 = tpu.matmul %71, %49, %cst_56 {dimension_numbers = #tpu.dot_dimension_numbers<[1], [0], [0], [1], [0, 0, 1, 1], [], []>} : vector<128x128xbf16>, vector<128x128xbf16>, vector<128x128xf32> -> vector<128x128xf32>
    %73 = arith.truncf %72 : vector<128x128xf32> to vector<128x128xbf16>
    %c0_57 = arith.constant 0 : index
    %c128_58 = arith.constant 128 : index
    %74 = vector.load %arg15[%c0_57, %c128_58] : memref<128x256xbf16, #tpu.memory_space<vmem>>, vector<128x128xbf16>
    tpu.vector_store %arg15[%c0_57, %c128_58], %73 {strides = array<i32>} : memref<128x256xbf16, #tpu.memory_space<vmem>>, vector<128x128xbf16>,
    %c0_59 = arith.constant 0 : index
    %c0_60 = arith.constant 0 : index
    %75 = vector.load %arg8[%c0_59, %c0_60] : memref<8x128xf32, #tpu.memory_space<vmem>>, vector<1x128xf32>
    %c1 = arith.constant 1 : index
    %c0_61 = arith.constant 0 : index
    %76 = vector.load %arg8[%c1, %c0_61] : memref<8x128xf32, #tpu.memory_space<vmem>>, vector<1x128xf32>
    %c2 = arith.constant 2 : index
    %c0_62 = arith.constant 0 : index
    %77 = vector.load %arg8[%c2, %c0_62] : memref<8x128xf32, #tpu.memory_space<vmem>>, vector<1x128xf32>
    %c3 = arith.constant 3 : index
    %c0_63 = arith.constant 0 : index
    %78 = vector.load %arg8[%c3, %c0_63] : memref<8x128xf32, #tpu.memory_space<vmem>>, vector<1x128xf32>
    %c4 = arith.constant 4 : index
    %c0_64 = arith.constant 0 : index
    %79 = vector.load %arg8[%c4, %c0_64] : memref<8x128xf32, #tpu.memory_space<vmem>>, vector<1x128xf32>
    %c5 = arith.constant 5 : index
    %c0_65 = arith.constant 0 : index
    %80 = vector.load %arg8[%c5, %c0_65] : memref<8x128xf32, #tpu.memory_space<vmem>>, vector<1x128xf32>
    %c0_66 = arith.constant 0 : index
    %c0_67 = arith.constant 0 : index
    %81 = vector.load %arg15[%c0_66, %c0_67] : memref<128x256xbf16, #tpu.memory_space<vmem>>, vector<128x256xbf16>
    %c0_68 = arith.constant 0 : index
    %c0_69 = arith.constant 0 : index
    %82 = vector.load %arg5[%c0_68, %c0_69] : memref<256x128xbf16, #tpu.memory_space<vmem>>, vector<256x128xbf16>
    %cst_70 = arith.constant dense<0.000000e+00> : vector<128x128xf32>
    %83 = tpu.matmul %81, %82, %cst_70 {dimension_numbers = #tpu.dot_dimension_numbers<[1], [0], [0], [1], [0, 0, 1, 1], [], []>} : vector<128x256xbf16>, vector<256x128xbf16>, vector<128x128xf32> -> vector<128x128xf32>
    %84 = vector.broadcast %75 : vector<1x128xf32> to vector<128x128xf32>
    %85 = arith.addf %83, %84 : vector<128x128xf32>
    %86 = arith.addf %85, %1 : vector<128x128xf32>
    %cst_71 = arith.constant dense<0.000000e+00> : vector<128xf32>
    %87 = vector.multi_reduction <add>, %86, %cst_71 [1] : vector<128x128xf32> to vector<128xf32>
    %88 = vector.shape_cast %87 : vector<128xf32> to vector<128x1xf32>
    %cst_72 = arith.constant 1.280000e+02 : f32
    %89 = vector.broadcast %cst_72 : f32 to vector<128x1xf32>
    %90 = arith.divf %88, %89 : vector<128x1xf32>
    %91 = vector.broadcast %90 : vector<128x1xf32> to vector<128x128xf32>
    %92 = arith.subf %86, %91 : vector<128x128xf32>
    %93 = arith.mulf %92, %92 : vector<128x128xf32>
    %cst_73 = arith.constant dense<0.000000e+00> : vector<128xf32>
    %94 = vector.multi_reduction <add>, %93, %cst_73 [1] : vector<128x128xf32> to vector<128xf32>
    %95 = vector.shape_cast %94 : vector<128xf32> to vector<128x1xf32>
    %cst_74 = arith.constant 1.280000e+02 : f32
    %96 = vector.broadcast %cst_74 : f32 to vector<128x1xf32>
    %97 = arith.divf %95, %96 : vector<128x1xf32>
    %98 = vector.broadcast %90 : vector<128x1xf32> to vector<128x128xf32>
    %99 = arith.subf %86, %98 : vector<128x128xf32>
    %cst_75 = arith.constant 9.99999974E-6 : f32
    %100 = vector.broadcast %cst_75 : f32 to vector<128x1xf32>
    %101 = arith.addf %97, %100 : vector<128x1xf32>
    %102 = math.rsqrt %101 : vector<128x1xf32>
    %103 = vector.broadcast %102 : vector<128x1xf32> to vector<128x128xf32>
    %104 = arith.mulf %99, %103 : vector<128x128xf32>
    %105 = vector.broadcast %76 : vector<1x128xf32> to vector<128x128xf32>
    %106 = arith.mulf %104, %105 : vector<128x128xf32>
    %107 = vector.broadcast %77 : vector<1x128xf32> to vector<128x128xf32>
    %108 = arith.addf %106, %107 : vector<128x128xf32>
    %109 = arith.truncf %108 : vector<128x128xf32> to vector<128x128xbf16>
    %c0_76 = arith.constant 0 : index
    %c0_77 = arith.constant 0 : index
    %110 = vector.load %arg6[%c0_76, %c0_77] : memref<128x256xbf16, #tpu.memory_space<vmem>>, vector<128x256xbf16>
    %cst_78 = arith.constant dense<0.000000e+00> : vector<128x256xf32>
    %111 = tpu.matmul %109, %110, %cst_78 {dimension_numbers = #tpu.dot_dimension_numbers<[1], [0], [0], [1], [0, 0, 1, 1], [], []>} : vector<128x128xbf16>, vector<128x256xbf16>, vector<128x256xf32> -> vector<128x256xf32>
    %c0_79 = arith.constant 0 : index
    %c0_80 = arith.constant 0 : index
    %112 = vector.load %arg9[%c0_79, %c0_80] : memref<1x256xf32, #tpu.memory_space<vmem>>, vector<1x256xf32>
    %113 = vector.broadcast %112 : vector<1x256xf32> to vector<128x256xf32>
    %114 = arith.addf %111, %113 : vector<128x256xf32>
    %cst_81 = arith.constant 0.000000e+00 : f32
    %115 = vector.broadcast %cst_81 : f32 to vector<128x256xf32>
    %116 = arith.maximumf %114, %115 : vector<128x256xf32>
    %117 = arith.truncf %116 : vector<128x256xf32> to vector<128x256xbf16>
    %c0_82 = arith.constant 0 : index
    %c0_83 = arith.constant 0 : index
    %118 = vector.load %arg7[%c0_82, %c0_83] : memref<256x128xbf16, #tpu.memory_space<vmem>>, vector<256x128xbf16>
    %cst_84 = arith.constant dense<0.000000e+00> : vector<128x128xf32>
    %119 = tpu.matmul %117, %118, %cst_84 {dimension_numbers = #tpu.dot_dimension_numbers<[1], [0], [0], [1], [0, 0, 1, 1], [], []>} : vector<128x256xbf16>, vector<256x128xbf16>, vector<128x128xf32> -> vector<128x128xf32>
    %120 = vector.broadcast %78 : vector<1x128xf32> to vector<128x128xf32>
    %121 = arith.addf %119, %120 : vector<128x128xf32>
    %122 = arith.addf %121, %108 : vector<128x128xf32>
    %cst_85 = arith.constant dense<0.000000e+00> : vector<128xf32>
    %123 = vector.multi_reduction <add>, %122, %cst_85 [1] : vector<128x128xf32> to vector<128xf32>
    %124 = vector.shape_cast %123 : vector<128xf32> to vector<128x1xf32>
    %cst_86 = arith.constant 1.280000e+02 : f32
    %125 = vector.broadcast %cst_86 : f32 to vector<128x1xf32>
    %126 = arith.divf %124, %125 : vector<128x1xf32>
    %127 = vector.broadcast %126 : vector<128x1xf32> to vector<128x128xf32>
    %128 = arith.subf %122, %127 : vector<128x128xf32>
    %129 = arith.mulf %128, %128 : vector<128x128xf32>
    %cst_87 = arith.constant dense<0.000000e+00> : vector<128xf32>
    %130 = vector.multi_reduction <add>, %129, %cst_87 [1] : vector<128x128xf32> to vector<128xf32>
    %131 = vector.shape_cast %130 : vector<128xf32> to vector<128x1xf32>
    %cst_88 = arith.constant 1.280000e+02 : f32
    %132 = vector.broadcast %cst_88 : f32 to vector<128x1xf32>
    %133 = arith.divf %131, %132 : vector<128x1xf32>
    %134 = vector.broadcast %126 : vector<128x1xf32> to vector<128x128xf32>
    %135 = arith.subf %122, %134 : vector<128x128xf32>
    %cst_89 = arith.constant 9.99999974E-6 : f32
    %136 = vector.broadcast %cst_89 : f32 to vector<128x1xf32>
    %137 = arith.addf %133, %136 : vector<128x1xf32>
    %138 = math.rsqrt %137 : vector<128x1xf32>
    %139 = vector.broadcast %138 : vector<128x1xf32> to vector<128x128xf32>
    %140 = arith.mulf %135, %139 : vector<128x128xf32>
    %141 = vector.broadcast %79 : vector<1x128xf32> to vector<128x128xf32>
    %142 = arith.mulf %140, %141 : vector<128x128xf32>
    %143 = vector.broadcast %80 : vector<1x128xf32> to vector<128x128xf32>
    %144 = arith.addf %142, %143 : vector<128x128xf32>
    %c0_90 = arith.constant 0 : index
    %c0_91 = arith.constant 0 : index
    %c0_92 = arith.constant 0 : index
    %145 = vector.load %arg10[%c0_90, %c0_91, %c0_92] : memref<1x128x128xf32, #tpu.memory_space<vmem>>, vector<1x128x128xf32>
    %146 = vector.shape_cast %145 : vector<1x128x128xf32> to vector<128x128xf32>
    %147 = vector.shape_cast %144 : vector<128x128xf32> to vector<1x128x128xf32>
    tpu.vector_store %arg10[%c0_90, %c0_91, %c0_92], %147 {strides = array<i32>} : memref<1x128x128xf32, #tpu.memory_space<vmem>>, vector<1x128x128xf32>,
    return
  }
  func.func @transform_0(%arg0: i32) -> (i32, i32, i32) {
    %c0_i32 = arith.constant 0 : i32
    %c0_i32_0 = arith.constant 0 : i32
    %c0_i32_1 = arith.constant 0 : i32
    return %arg0, %c0_i32, %c0_i32_0 : i32, i32, i32
  }
  func.func @transform_1(%arg0: i32) -> (i32, i32) {
    %c0_i32 = arith.constant 0 : i32
    %c0_i32_0 = arith.constant 0 : i32
    %c0_i32_1 = arith.constant 0 : i32
    return %c0_i32, %c0_i32_0 : i32, i32
  }
  func.func @transform_2(%arg0: i32) -> (i32, i32) {
    %c0_i32 = arith.constant 0 : i32
    %c0_i32_0 = arith.constant 0 : i32
    %c0_i32_1 = arith.constant 0 : i32
    return %c0_i32, %c0_i32_0 : i32, i32
  }
  func.func @transform_3(%arg0: i32) -> (i32, i32) {
    %c0_i32 = arith.constant 0 : i32
    %c0_i32_0 = arith.constant 0 : i32
    %c0_i32_1 = arith.constant 0 : i32
    return %c0_i32, %c0_i32_0 : i32, i32
  }
  func.func @transform_4(%arg0: i32) -> (i32, i32) {
    %c0_i32 = arith.constant 0 : i32
    %c0_i32_0 = arith.constant 0 : i32
    %c0_i32_1 = arith.constant 0 : i32
    return %c0_i32, %c0_i32_0 : i32, i32
  }
  func.func @transform_5(%arg0: i32) -> (i32, i32) {
    %c0_i32 = arith.constant 0 : i32
    %c0_i32_0 = arith.constant 0 : i32
    %c0_i32_1 = arith.constant 0 : i32
    return %c0_i32, %c0_i32_0 : i32, i32
  }
  func.func @transform_6(%arg0: i32) -> (i32, i32) {
    %c0_i32 = arith.constant 0 : i32
    %c0_i32_0 = arith.constant 0 : i32
    %c0_i32_1 = arith.constant 0 : i32
    return %c0_i32, %c0_i32_0 : i32, i32
  }
  func.func @transform_7(%arg0: i32) -> (i32, i32) {
    %c0_i32 = arith.constant 0 : i32
    %c0_i32_0 = arith.constant 0 : i32
    %c0_i32_1 = arith.constant 0 : i32
    return %c0_i32, %c0_i32_0 : i32, i32
  }
  func.func @transform_8(%arg0: i32) -> (i32, i32) {
    %c0_i32 = arith.constant 0 : i32
    %c0_i32_0 = arith.constant 0 : i32
    %c0_i32_1 = arith.constant 0 : i32
    return %c0_i32, %c0_i32_0 : i32, i32
  }
  func.func @transform_9(%arg0: i32) -> (i32, i32, i32) {
    %c0_i32 = arith.constant 0 : i32
    %c0_i32_0 = arith.constant 0 : i32
    %c0_i32_1 = arith.constant 0 : i32
    return %arg0, %c0_i32, %c0_i32_0 : i32, i32, i32
  }
  func.func @transform_10(%arg0: i32) -> (i32, i32, i32) {
    %c0_i32 = arith.constant 0 : i32
    %c0_i32_0 = arith.constant 0 : i32
    %c0_i32_1 = arith.constant 0 : i32
    return %arg0, %c0_i32, %c0_i32_0 : i32, i32, i32
  }
}

</mosaic_0001>

<bundles_post_ra>
// kernel: tpu_custom_call.1
= control target key start
LH: loop header
LB: loop body
LE: loop exit
PB: predicated region body
PF: predicated region fallthrough
CT: control target
= control target key end

     0   :  { %s6584_s0 = inlined_call_operand.hbm [shape: f32[2,128,128], index: 0, kind: input, shape index: {}]   ;;  %s6585_s1 = inlined_call_operand.hbm [shape: bf16[128,256], index: 1, kind: input, shape index: {}]   ;;  %s6586_s2 = inlined_call_operand.hbm [shape: bf16[128,256], index: 2, kind: input, shape index: {}]   ;;  %s6587_s3 = inlined_call_operand.hbm [shape: bf16[128,256], index: 3, kind: input, shape index: {}]   ;;  %s6588_s4 = inlined_call_operand.hbm [shape: bf16[256,128], index: 4, kind: input, shape index: {}]   ;;  %s6589_s5 = inlined_call_operand.hbm [shape: bf16[128,256], index: 5, kind: input, shape index: {}]   ;;  %s6590_s6 = inlined_call_operand.hbm [shape: bf16[256,128], index: 6, kind: input, shape index: {}]   ;;  %s6591_s7 = inlined_call_operand.hbm [shape: f32[8,128], index: 7, kind: input, shape index: {}]   ;;  %s6592_s8 = inlined_call_operand.hbm [shape: f32[1,256], index: 8, kind: input, shape index: {}]   ;;  %s6593_s9 = inlined_call_operand.hbm [shape: f32[2,128,128], index: 9, kind: output, shape index: {0}]   ;;  %s6594_s10 = inlined_call_operand.hbm [shape: f32[2,128,128], index: 10, kind: output, shape index: {1}]  }
   0x1   :  { %6603 = sst [smem:[#allocation31_spill]] %s6585_s1 }
   0x2   :  { %6604 = sst [smem:[#allocation32_spill]] %s6593_s9 }
   0x3   :  { %6605 = sst [smem:[#allocation33_spill]] %s6594_s10 }
   0x4   :  { %16 = vsyncpa [#allocation7], 0 }
   0x5   :  { %18 = vsyncpa [#allocation7 + $0x1], 0 }
   0x6   :  { %19 = vsyncpa [#allocation10], 0 }
   0x7   :  { %20 = vsyncpa [#allocation13], 0 }
   0x8   :  { %21 = vsyncpa [#allocation16], 0 }
   0x9   :  { %22 = vsyncpa [#allocation19], 0 }
   0xa   :  { %23 = vsyncpa [#allocation8], 0 }
   0xb   :  { %25 = vsyncpa [#allocation8 + $0x1], 0 }
   0xc   :  { %26 = vsyncpa [#allocation23], 0 }
   0xd   :  { %28 = vsyncpa [#allocation23 + $0x1], 0  ;;  %s5045_s13 = smov 0   ;;  %s5047_s14 = smov 0  }
   0xe   :  { %s5049_s15 = smov 0   ;;  %s5051_s16 = smov 0  }
   0xf LB: > { %s4972_s17 = smov [#allocation9]   ;;  %s5066_s19 = sadd.s32 4294967295, %s4970_s16   ;;  %s4970_s16 = sphi %s5051_s16, %s6636_s16   ;;  %s4966_s15 = sphi %s5049_s15, %s6635_s15   ;;  %s4962_s14 = sphi %s5047_s14, %s6634_s14   ;;  %s4958_s13 = sphi %s5045_s13, %s6633_s13  }
  0x10   : > { %s297_s18 = sshll.u32 %s4972_s17, 4  ;;  %p3652_p0 = scmp.ge.s32.totalorder %s4970_s16, 1  ;;  %s5071_s18 = int_to_ptr.vmem [resolvable:$true] %s297_s18 }
  0x11   : > { %p6597_p1 = scmp.eq.s32.totalorder %s5066_s19, 0  ;;  %p285_p2 = scmp.lt.s32.totalorder %s4970_s16, 3 }
  0x12   : > { %s4973_s21 = smov [#allocation12]   ;;  %s4974_s24 = smov [#allocation15]  }
  0x13   : > { %p5073_p3 = pnand %p3652_p0, %p285_p2  ;;  %s323_s22 = sshll.u32 %s4973_s21, 4  ;;  %s5086_s22 = int_to_ptr.vmem [resolvable:$true] %s323_s22 }
  0x14   : > { %s349_s25 = sshll.u32 %s4974_s24, 4  ;;  %s6608_s1 = sld [smem:[#allocation31_spill]]  ;;  %s5088_s25 = int_to_ptr.vmem [resolvable:$true] %s349_s25 }
  0x15   : > { %s6606_s20 = scalar_select %p5073_p3, 1, 0 }
  0x16   : > { %p4164_p5 = pneg %p5073_p3 }
  0x18   : > { %p5082_p6 = pnand %p4164_p5, %p6597_p1 }
  0x1a   : > { %s4602_s28 = scalar_lea.hbm %s6608_s1, 2048  ;;  %p5098_p8 = pneg %p5082_p6 }
  0x1b   : > { %p4603_p7 = scmp.ne.s32.totalorder %s6608_s1, %s4602_s28  ;;  %p4609_p11 = scmp.lt.u32.totalorder %s4602_s28, %s6608_s1 }
  0x1d   : > { %p4605_p9 = pnand %p5098_p8, %p4603_p7 }
  0x1f   : > { %p4606_p10 = pneg %p4605_p9 }
  0x21   : > { %p4611_p12 = pnand %p4609_p11, %p4606_p10 }
  0x23   : > { %4614 = shalt.err (!%p4611_p12)
}
  0x24   : > { %s4615_s21 = scalar_lea.vmem %s5071_s18, 2048  ;;  %p4623_p5 = scmp.lt.s32.totalorder %s5071_s18, %s5071_s18 }
  0x25   : > { %p4616_p13 = scmp.ne.s32.totalorder %s5071_s18, %s4615_s21  ;;  %p4624_p4 = scmp.lt.s32.totalorder %s4615_s21, %s4615_s21 }
  0x27   : > { %p4618_p0 = pnand %p4616_p13, %p5098_p8  ;;  %p4625_p7 = por %p4624_p4, %p4623_p5 }
  0x29   : > { %p4619_p2 = pneg %p4618_p0 }
  0x2b   : > { %p4626_p9 = pnand %p4625_p7, %p4619_p2 }
  0x2d   : > { %4629 = shalt.err (!%p4626_p9)
}
  0x2e   : > { %s6599_s24 = smov 128   ;;  %s4976_s26 = smov 8  }
  0x2f   : > { %4167 = dma.hbm_to_vmem [thread:$0]  (!%p5082_p6), %s6608_s1, 2048, %s5071_s18, [#allocation10], %s6599_s24, %s6599_s24, %s4976_s26  }
  0x30   : > { %s4630_s12 = scalar_lea.hbm %s6587_s3, 2048 }
  0x31   : > { %p4631_p4 = scmp.ne.s32.totalorder %s6587_s3, %s4630_s12  ;;  %p4637_p12 = scmp.lt.u32.totalorder %s4630_s12, %s6587_s3 }
  0x33   : > { %p4633_p10 = pnand %p4631_p4, %p5098_p8 }
  0x35   : > { %p4634_p11 = pneg %p4633_p10 }
  0x37   : > { %p4639_p13 = pnand %p4637_p12, %p4634_p11 }
  0x39   : > { %4642 = shalt.err (!%p4639_p13)
}
  0x3a   : > { %s4643_s18 = scalar_lea.vmem %s5086_s22, 2048  ;;  %p4651_p7 = scmp.lt.s32.totalorder %s5086_s22, %s5086_s22 }
  0x3b   : > { %p4644_p0 = scmp.ne.s32.totalorder %s5086_s22, %s4643_s18  ;;  %p4652_p9 = scmp.lt.s32.totalorder %s4643_s18, %s4643_s18 }
  0x3d   : > { %p4646_p2 = pnand %p4644_p0, %p5098_p8  ;;  %p4653_p4 = por %p4652_p9, %p4651_p7 }
  0x3f   : > { %p4647_p5 = pneg %p4646_p2 }
  0x41   : > { %p4654_p10 = pnand %p4653_p4, %p4647_p5 }
  0x43   : > { %4657 = shalt.err (!%p4654_p10)
}
  0x44   : > { %4173 = dma.hbm_to_vmem [thread:$0]  (!%p5082_p6), %s6587_s3, 2048, %s5086_s22, [#allocation13], %s6599_s24, %s6599_s24, %s4976_s26  }
  0x45   : > { %s4658_s29 = scalar_lea.hbm %s6589_s5, 2048 }
  0x46   : > { %p4659_p11 = scmp.ne.s32.totalorder %s6589_s5, %s4658_s29  ;;  %p4665_p0 = scmp.lt.u32.totalorder %s4658_s29, %s6589_s5 }
  0x48   : > { %p4661_p12 = pnand %p4659_p11, %p5098_p8 }
  0x4a   : > { %p4662_p13 = pneg %p4661_p12 }
  0x4c   : > { %p4667_p2 = pnand %p4665_p0, %p4662_p13 }
  0x4e   : > { %4670 = shalt.err (!%p4667_p2)
}
  0x4f   : > { %s4671_s22 = scalar_lea.vmem %s5088_s25, 2048  ;;  %p4679_p4 = scmp.lt.s32.totalorder %s5088_s25, %s5088_s25 }
  0x50   : > { %p4672_p5 = scmp.ne.s32.totalorder %s5088_s25, %s4671_s22  ;;  %p4680_p10 = scmp.lt.s32.totalorder %s4671_s22, %s4671_s22 }
  0x52   : > { %p4674_p7 = pnand %p4672_p5, %p5098_p8  ;;  %p4681_p11 = por %p4680_p10, %p4679_p4 }
  0x54   : > { %p4675_p9 = pneg %p4674_p7 }
  0x56   : > { %p4682_p12 = pnand %p4681_p11, %p4675_p9 }
  0x58   : > { %4685 = shalt.err (!%p4682_p12)
}
  0x59   : > { %4179 = dma.hbm_to_vmem [thread:$0]  (!%p5082_p6), %s6589_s5, 2048, %s5088_s25, [#allocation16], %s6599_s24, %s6599_s24, %s4976_s26  }
  0x5a   : > { %s4977_s10 = smov [#allocation18]   ;;  %s4978_s28 = smov [#allocation11]  }
  0x5b   : > { %s376_s27 = sshll.u32 %s4977_s10, 4  ;;  %s310_s29 = sshll.u32 %s4978_s28, 4  ;;  %s377_s27 = int_to_ptr.vmem [resolvable:$true] %s376_s27  ;;  %s311_s29 = int_to_ptr.vmem [resolvable:$true] %s310_s29 }
  0x5c   : > { %s4686_s17 = scalar_lea.hbm %s6591_s7, 128 }
  0x5d   : > { %p4687_p13 = scmp.ne.s32.totalorder %s6591_s7, %s4686_s17  ;;  %p4693_p5 = scmp.lt.u32.totalorder %s4686_s17, %s6591_s7 }
  0x5f   : > { %p4689_p0 = pnand %p4687_p13, %p5098_p8 }
  0x61   : > { %p4690_p2 = pneg %p4689_p0 }
  0x63   : > { %p4695_p7 = pnand %p4693_p5, %p4690_p2 }
  0x65   : > { %4698 = shalt.err (!%p4695_p7)
}
  0x66   : > { %s4699_s25 = scalar_lea.vmem %s377_s27, 128  ;;  %p4707_p11 = scmp.lt.s32.totalorder %s377_s27, %s377_s27 }
  0x67   : > { %p4700_p9 = scmp.ne.s32.totalorder %s377_s27, %s4699_s25  ;;  %p4708_p12 = scmp.lt.s32.totalorder %s4699_s25, %s4699_s25 }
  0x69   : > { %p4702_p4 = pnand %p4700_p9, %p5098_p8  ;;  %p4709_p1 = por %p4708_p12, %p4707_p11 }
  0x6b   : > { %p4703_p10 = pneg %p4702_p4 }
  0x6d   : > { %p4710_p3 = pnand %p4709_p1, %p4703_p10 }
  0x6f   : > { %4713 = shalt.err (!%p4710_p3)
}
  0x70   : > { %4185 = dma.hbm_to_vmem [thread:$0]  (!%p5082_p6), %s6591_s7, 128, %s377_s27, [#allocation19]  }
  0x71   : > { %s4714_s30 = scalar_lea.hbm %s6586_s2, 2048 }
  0x72   : > { %p4715_p13 = scmp.ne.s32.totalorder %s6586_s2, %s4714_s30  ;;  %p4721_p3 = scmp.lt.u32.totalorder %s4714_s30, %s6586_s2 }
  0x74   : > { %p4717_p0 = pnand %p4715_p13, %p5098_p8 }
  0x76   : > { %p4718_p1 = pneg %p4717_p0 }
  0x78   : > { %p4723_p2 = pnand %p4721_p3, %p4718_p1 }
  0x7a   : > { %4726 = shalt.err (!%p4723_p2)
}
  0x7b   : > { %s4727_s18 = scalar_lea.vmem %s311_s29, 2048  ;;  %p4735_p4 = scmp.lt.s32.totalorder %s311_s29, %s311_s29 }
  0x7c   : > { %p4728_p5 = scmp.ne.s32.totalorder %s311_s29, %s4727_s18  ;;  %p4736_p10 = scmp.lt.s32.totalorder %s4727_s18, %s4727_s18 }
  0x7e   : > { %p4730_p7 = pnand %p4728_p5, %p5098_p8  ;;  %p4737_p11 = por %p4736_p10, %p4735_p4 }
  0x80   : > { %p4731_p9 = pneg %p4730_p7 }
  0x82   : > { %p4738_p12 = pnand %p4737_p11, %p4731_p9 }
  0x84   : > { %4741 = shalt.err (!%p4738_p12)
}
  0x85   : > { %4170 = dma.hbm_to_vmem [thread:$0]  (!%p5082_p6), %s6586_s2, 2048, %s311_s29, [#allocation10], %s6599_s24, %s6599_s24, %s4976_s26  }
  0x86   : > { %s4979_s9 = smov [#allocation14]   ;;  %s4742_s30 = scalar_lea.hbm %s6588_s4, 2048 }
  0x87   : > { %s336_s10 = sshll.u32 %s4979_s9, 4  ;;  %p4743_p13 = scmp.ne.s32.totalorder %s6588_s4, %s4742_s30  ;;  %s337_s10 = int_to_ptr.vmem [resolvable:$true] %s336_s10 }
  0x88   : > { %p4749_p3 = scmp.lt.u32.totalorder %s4742_s30, %s6588_s4 }
  0x89   : > { %p4745_p0 = pnand %p4743_p13, %p5098_p8 }
  0x8b   : > { %p4746_p1 = pneg %p4745_p0 }
  0x8d   : > { %p4751_p2 = pnand %p4749_p3, %p4746_p1 }
  0x8f   : > { %4754 = shalt.err (!%p4751_p2)
}
  0x90   : > { %s4755_s29 = scalar_lea.vmem %s337_s10, 2048  ;;  %p4763_p4 = scmp.lt.s32.totalorder %s337_s10, %s337_s10 }
  0x91   : > { %p4756_p5 = scmp.ne.s32.totalorder %s337_s10, %s4755_s29  ;;  %p4764_p10 = scmp.lt.s32.totalorder %s4755_s29, %s4755_s29 }
  0x93   : > { %p4758_p7 = pnand %p4756_p5, %p5098_p8  ;;  %p4765_p11 = por %p4764_p10, %p4763_p4 }
  0x95   : > { %p4759_p9 = pneg %p4758_p7 }
  0x97   : > { %p4766_p12 = pnand %p4765_p11, %p4759_p9 }
  0x99   : > { %4769 = shalt.err (!%p4766_p12)
}
  0x9a   : > { %s4980_s18 = smov 64   ;;  %s4981_s27 = smov 4  }
  0x9b   : > { %4176 = dma.hbm_to_vmem [thread:$0]  (!%p5082_p6), %s6588_s4, 2048, %s337_s10, [#allocation13], %s4980_s18, %s4980_s18, %s4981_s27  }
  0x9c   : > { %s4982_s1 = smov [#allocation17]   ;;  %s4983_s30 = smov [#allocation20]  }
  0x9d   : > { %s362_s28 = sshll.u32 %s4982_s1, 4  ;;  %s387_s12 = sshll.u32 %s4983_s30, 4  ;;  %s363_s28 = int_to_ptr.vmem [resolvable:$true] %s362_s28  ;;  %s5231_s12 = int_to_ptr.vmem [resolvable:$true] %s387_s12 }
  0x9e   : > { %s4770_s22 = scalar_lea.hbm %s6590_s6, 2048 }
  0x9f   : > { %p4771_p13 = scmp.ne.s32.totalorder %s6590_s6, %s4770_s22  ;;  %p4777_p3 = scmp.lt.u32.totalorder %s4770_s22, %s6590_s6 }
  0xa1   : > { %p4773_p0 = pnand %p4771_p13, %p5098_p8 }
  0xa3   : > { %p4774_p1 = pneg %p4773_p0 }
  0xa5   : > { %p4779_p2 = pnand %p4777_p3, %p4774_p1 }
  0xa7   : > { %4782 = shalt.err (!%p4779_p2)
}
  0xa8   : > { %s4783_s9 = scalar_lea.vmem %s363_s28, 2048  ;;  %p4791_p4 = scmp.lt.s32.totalorder %s363_s28, %s363_s28 }
  0xa9   : > { %p4784_p5 = scmp.ne.s32.totalorder %s363_s28, %s4783_s9  ;;  %p4792_p10 = scmp.lt.s32.totalorder %s4783_s9, %s4783_s9 }
  0xab   : > { %p4786_p7 = pnand %p4784_p5, %p5098_p8  ;;  %p4793_p11 = por %p4792_p10, %p4791_p4 }
  0xad   : > { %p4787_p9 = pneg %p4786_p7 }
  0xaf   : > { %p4794_p12 = pnand %p4793_p11, %p4787_p9 }
  0xb1   : > { %4797 = shalt.err (!%p4794_p12)
}
  0xb2   : > { %4182 = dma.hbm_to_vmem [thread:$0]  (!%p5082_p6), %s6590_s6, 2048, %s363_s28, [#allocation16], %s4980_s18, %s4980_s18, %s4981_s27  }
  0xb3   : > { %s4798_s21 = scalar_lea.hbm %s6592_s8, 32 }
  0xb4   : > { %p4799_p13 = scmp.ne.s32.totalorder %s6592_s8, %s4798_s21  ;;  %p4805_p3 = scmp.lt.u32.totalorder %s4798_s21, %s6592_s8 }
  0xb6   : > { %p4801_p0 = pnand %p4799_p13, %p5098_p8 }
  0xb8   : > { %p4802_p1 = pneg %p4801_p0 }
  0xba   : > { %p4807_p2 = pnand %p4805_p3, %p4802_p1 }
  0xbc   : > { %4810 = shalt.err (!%p4807_p2)
}
  0xbd   : > { %s4811_s18 = scalar_lea.vmem %s5231_s12, 32  ;;  %p4819_p4 = scmp.lt.s32.totalorder %s5231_s12, %s5231_s12 }
  0xbe   : > { %p4812_p5 = scmp.ne.s32.totalorder %s5231_s12, %s4811_s18  ;;  %p4820_p10 = scmp.lt.s32.totalorder %s4811_s18, %s4811_s18 }
  0xc0   : > { %p4814_p7 = pnand %p4812_p5, %p5098_p8  ;;  %p4821_p11 = por %p4820_p10, %p4819_p4 }
  0xc2   : > { %p4815_p9 = pneg %p4814_p7 }
  0xc4   : > { %p4822_p12 = pnand %p4821_p11, %p4815_p9 }
  0xc6   : > { %4825 = shalt.err (!%p4822_p12)
}
  0xc7   : > { %4188 = dma.hbm_to_vmem [thread:$0]  (!%p5082_p6), %s6592_s8, 32, %s5231_s12, [#allocation19]  }
  0xc8   : > { %s3651_s23 = sadd.s32 4294967294, %s4970_s16   ;;  %s5276_s11 = sadd.s32 1, %s4970_s16  }
  0xc9   : > { %s38_s9 = ssub.s32 %s4970_s16, %s5276_s11  ;;  %s41_s24 = sadd.s32 1, %s4966_s15 }
  0xca   : > { %p39_p8 = scmp.eq.s32.totalorder %s38_s9, 0  ;;  %p48_p13 = scmp.ne.s32.totalorder %s4966_s15, %s4962_s14 }
  0xcb   : > { %p49_p0 = scmp.eq.s32.totalorder %s4970_s16, 0  ;;  %p54_p1 = scmp.ne.s32.totalorder %s4962_s14, %s4958_s13 }
  0xcc   : > { %s5287_s1 = scalar_select %p39_p8, %s4966_s15, %s41_s24  }
  0xcd   : > { %p5289_p3 = por %p49_p0, %p48_p13  ;;  %p6611_p2 = scmp.eq.s32.totalorder %s5066_s19, 0 }
  0xce   : > { %p246_p5 = scmp.eq.s32.totalorder %s5066_s19, 1  ;;  %p252_p7 = scmp.eq.s32.totalorder %s3651_s23, 1 }
  0xcf   : > { %p5295_p6 = por %p6611_p2, %p54_p1  ;;  %p4208_p9 = scmp.lt.s32.totalorder %s4970_s16, 2 }
  0xd0   : > { %s398_s17 = sand.u32 1, %s4966_s15   ;;  %p5302_p4 = por %p246_p5, %p48_p13 }
  0xd1   : > { %p5306_p10 = por %p252_p7, %p54_p1  ;;  %s3662_s29 = sshll.u32 %s398_s17, 7 }
  0xd2   : > { %s6613_s21 = scalar_select %p5302_p4, 1, 0 }
  0xd3   : > { %s6614_s22 = scalar_select %p5306_p10, 1, 0 }
  0xd4   : > { %s3787_s25 = sshll.u32 %s4970_s16, 11  ;;  %s402_s28 = scalar_lea.vmem [#allocation6], %s3662_s29 }
  0xd5   : > { %s5314_s27 = scalar_lea.hbm %s6584_s0, %s3787_s25  ;;  %s409_s23 = sshll.u32 %s402_s28, 4  ;;  %s5316_s23 = int_to_ptr.vmem [resolvable:$true] %s409_s23 }
  0xd6   : > { %p5320_p11 = pnand %p4208_p9, %p5289_p3  ;;  %s5324_s24 = scalar_lea.sflag [#allocation7], %s398_s17 }
  0xd7   : > { %s4826_s10 = scalar_lea.hbm %s5314_s27, 2048  ;;  %s4831_s30 = scalar_lea.hbm %s6584_s0, 4096 }
  0xd8   : > { %p4827_p12 = scmp.ne.s32.totalorder %s5314_s27, %s4826_s10  ;;  %p4828_p8 = pneg %p5320_p11 }
  0xd9   : > { %p4832_p1 = scmp.lt.u32.totalorder %s5314_s27, %s6584_s0  ;;  %p4833_p3 = scmp.lt.u32.totalorder %s4831_s30, %s4826_s10 }
  0xda   : > { %p4829_p13 = pnand %p4828_p8, %p4827_p12  ;;  %p4835_p5 = scmp.lt.u32.totalorder %s4826_s10, %s5314_s27 }
  0xdb   : > { %p4834_p2 = por %p4833_p3, %p4832_p1 }
  0xdc   : > { %p4830_p0 = pneg %p4829_p13 }
  0xdd   : > { %p4836_p7 = por %p4835_p5, %p4834_p2 }
  0xdf   : > { %p4837_p9 = pnand %p4836_p7, %p4830_p0 }
  0xe1   : > { %4840 = shalt.err (!%p4837_p9)
}
  0xe2   : > { %s4841_s17 = scalar_lea.vmem %s5316_s23, 2048  ;;  %s4984_s29 = smov [#allocation6]  }
  0xe3   : > { %p4842_p12 = scmp.ne.s32.totalorder %s5316_s23, %s4841_s17  ;;  %s4846_s25 = sshll.u32 %s4984_s29, 4  ;;  %s4847_s25 = int_to_ptr.vmem [resolvable:$false] %s4846_s25 }
  0xe4   : > { %s4848_s18 = scalar_lea.vmem %s4847_s25, 4096  ;;  %p4849_p4 = scmp.lt.s32.totalorder %s5316_s23, %s4847_s25 }
  0xe5   : > { %p4844_p13 = pnand %p4842_p12, %p4828_p8  ;;  %p4850_p1 = scmp.lt.s32.totalorder %s4848_s18, %s4841_s17 }
  0xe7   : > { %p4845_p10 = pneg %p4844_p13  ;;  %p4851_p3 = por %p4850_p1, %p4849_p4 }
  0xe9   : > { %p4852_p2 = pnand %p4851_p3, %p4845_p10 }
  0xeb   : > { %4855 = shalt.err (!%p4852_p2)
}
  0xec   : > { %s6616_s10 = smov 128   ;;  %p6617_p8 = scmp.ne.s32.totalorder %s6606_s20, 0 }
  0xed   : > { %4192 = dma.hbm_to_vmem [thread:$0]  (!%p5320_p11), %s5314_s27, 2048, %s5316_s23, %s5324_s24, %s6616_s10, %s6616_s10, %s4976_s26  }
  0xee   : > { %421 = sbr.rel (%p6617_p8) target bundleno = 2752 (0xac0), region = 56  ;;  %s5358_s30 = sand.u32 (!%p6617_p8), 1, %s4962_s14  }
  0xef   : > { %s5361_s28 = sshll.u32 (!%p6617_p8), %s5358_s30, 7  ;;  %s424_s9 = scalar_lea.sflag (!%p6617_p8), [#allocation7], %s5358_s30 }
  0xf0   : > { %s5365_s17 = scalar_lea.vmem (!%p6617_p8), [#allocation6], %s5361_s28 }
  0xf5   : > { %4929 = dma.done.wait (%p5295_p6), %s424_s9, 2048  }
  0xf6   : > { %4931 = vsyncadd (%p5295_p6), %s424_s9, 4294965248  ;;  %p6618_p4 = scmp.eq.s32.totalorder %s5066_s19, 0 }
  0xf8   : > { %4933 = dma.done.wait (%p6618_p4), [#allocation10], 4096   ;;  %p6619_p10 = pmov %p6618_p4 }
  0xf9   : > { %p6620_p11 = pmov %p6618_p4 }
  0xfa   : > { %4935 = vsyncadd (%p6619_p10), [#allocation10], 4294963200 }
  0xfb   : > { %4937 = dma.done.wait (%p6620_p11), [#allocation13], 4096   ;;  %p6621_p0 = pmov %p6618_p4 }
  0xfd   : > { %4939 = vsyncadd (%p6621_p0), [#allocation13], 4294963200  ;;  %p6622_p5 = pmov %p6621_p0 }
  0xfe   : > { %p6623_p7 = pmov %p6621_p0 }
  0xff   : > { %4941 = dma.done.wait (%p6622_p5), [#allocation16], 4096  }
 0x100   : > { %4943 = vsyncadd (%p6623_p7), [#allocation16], 4294963200  ;;  %p6624_p6 = pmov %p6621_p0 }
 0x101   : > { %p6625_p9 = pmov %p6621_p0 }
 0x102   : > { %4945 = dma.done.wait (%p6624_p6), [#allocation19], 160  }
 0x103   : > { %4947 = vsyncadd (%p6625_p9), [#allocation19], 4294967136  ;;  %v4985_v0 = vmov 0   ;;  %v4266_v1 = vld [vmem:[#allocation9 + $0x4] ss:$8 sps:$4 sm:$0xff]   ;;  %v512_v29 = vld [vmem:[%s5365_s17 + $0x50] sm:$0xff] }
 0x104   : > { %694 = vmatprep.mubr.bf16.mxu1 %v4985_v0  ;;  %654 = vmatprep.mubr.bf16.mxu0 %v4985_v0  ;;  %v4268_v2 = vld [vmem:[#allocation9] ss:$8 sps:$4 sm:$0xff]   ;;  %v4269_v3 = vld [vmem:[#allocation9 + $0x14] ss:$8 sps:$4 sm:$0xff]   ;;  %v4271_v4 = vld [vmem:[#allocation9 + $0x10] ss:$8 sps:$4 sm:$0xff]  }
 0x105   : > { %4110 = vmatprep.subr.bf16.mxu1 %v4266_v1  ;;  %622 = vmatprep.subr.bf16.mxu0 %v4266_v1  ;;  %v4272_v5 = vld [vmem:[#allocation9 + $0x24] ss:$8 sps:$4 sm:$0xff]   ;;  %v4274_v6 = vld [vmem:[#allocation9 + $0x20] ss:$8 sps:$4 sm:$0xff]   ;;  %v4275_v7 = vld [vmem:[#allocation9 + $0x34] ss:$8 sps:$4 sm:$0xff]  }
 0x106   : > { %4118 = vmatpush1.bf16.msra.mxu1 %v4268_v2  ;;  %623 = vmatpush1.bf16.msra.mxu0 %v4268_v2  ;;  %v4277_v8 = vld [vmem:[#allocation9 + $0x30] ss:$8 sps:$4 sm:$0xff]   ;;  %v4278_v9 = vld [vmem:[#allocation9 + $0x44] ss:$8 sps:$4 sm:$0xff]   ;;  %v4280_v10 = vld [vmem:[#allocation9 + $0x40] ss:$8 sps:$4 sm:$0xff]  }
 0x107   : > { %4111 = vmatprep.subr.bf16.mxu1 %v4269_v3  ;;  %624 = vmatprep.subr.bf16.mxu0 %v4269_v3  ;;  %v4281_v11 = vld [vmem:[#allocation9 + $0x54] ss:$8 sps:$4 sm:$0xff]   ;;  %v4283_v12 = vld [vmem:[#allocation9 + $0x50] ss:$8 sps:$4 sm:$0xff]   ;;  %v4284_v13 = vld [vmem:[#allocation9 + $0x64] ss:$8 sps:$4 sm:$0xff]  }
 0x108   : > { %v4286_v14 = vld [vmem:[#allocation9 + $0x60] ss:$8 sps:$4 sm:$0xff]   ;;  %v4287_v15 = vld [vmem:[#allocation9 + $0x74] ss:$8 sps:$4 sm:$0xff]   ;;  %v4289_v16 = vld [vmem:[#allocation9 + $0x70] ss:$8 sps:$4 sm:$0xff]  }
 0x109   : > { %v510_v17 = vld [vmem:[%s5365_s17 + $0x40] sm:$0xff]  ;;  %v511_v18 = vld [vmem:[%s5365_s17 + $0x48] sm:$0xff]  ;;  %v4295_v25 = vld [vmem:[#allocation11 + $0x14] ss:$8 sps:$4 sm:$0xff]   ;;  %s5907_s20 = scalar_lea.vmem [#allocation22], %s5361_s28  ;;  %s6601_s26 = sshll.u32 %s5066_s19, 11 }
 0x10a   : > { %4119 = vmatpush1.bf16.msra.mxu1 %v4271_v4  ;;  %625 = vmatpush1.bf16.msra.mxu0 %v4271_v4  ;;  %v4292_v19 = vld [vmem:[#allocation11 + $0x4] ss:$8 sps:$4 sm:$0xff]   ;;  %v5393_v23 = vpack.c.bf16 %v511_v18, %v510_v17  ;;  %v4290_v24 = vld [vmem:[#allocation11] ss:$8 sps:$4 sm:$0xff]   ;;  %v4293_v28 = vld [vmem:[#allocation11 + $0x10] ss:$8 sps:$4 sm:$0xff]  }
 0x10b   : > { %4112 = vmatprep.subr.bf16.mxu1 %v4272_v5  ;;  %626 = vmatprep.subr.bf16.mxu0 %v4272_v5  ;;  %v502_v20 = vld [vmem:[%s5365_s17] sm:$0xff]  ;;  %v503_v22 = vld [vmem:[%s5365_s17 + $0x8] sm:$0xff]  ;;  %v513_v30 = vld [vmem:[%s5365_s17 + $0x58] sm:$0xff]  ;;  %s6626_s23 = sld [smem:[#allocation33_spill]]  ;;  %s3470_s29 = sshll.u32 %s5907_s20, 4  ;;  %s6429_s29 = int_to_ptr.vmem [resolvable:$true] %s3470_s29 }
 0x10c   : > { %v4316_v21 = vld [vmem:[#allocation12 + $0x4] ss:$8 sps:$4 sm:$0xff]   ;;  %v5395_v26 = vpack.c.bf16 %v503_v22, %v502_v20  ;;  %v4314_v27 = vld [vmem:[#allocation12] ss:$8 sps:$4 sm:$0xff]   ;;  %v4319_v31 = vld [vmem:[#allocation12 + $0x14] ss:$8 sps:$4 sm:$0xff]   ;;  %v5405_v37 = vpack.c.bf16 %v513_v30, %v512_v29 }
 0x10d   : > { %v4298_v32 = vld [vmem:[#allocation11 + $0x24] ss:$8 sps:$4 sm:$0xff]   ;;  %v504_v33 = vld [vmem:[%s5365_s17 + $0x10] sm:$0xff]  ;;  %v505_v34 = vld [vmem:[%s5365_s17 + $0x18] sm:$0xff]  ;;  %s3441_s25 = scalar_lea.sflag [#allocation23], %s5358_s30  ;;  %s4856_s18 = scalar_lea.vmem %s6429_s29, 2048 }
 0x10e   : > { %4120 = vmatpush1.bf16.msra.mxu1 %v4274_v6  ;;  %627 = vmatpush1.bf16.msra.mxu0 %v4274_v6  ;;  %v4317_v35 = vld [vmem:[#allocation12 + $0x10] ss:$8 sps:$4 sm:$0xff]   ;;  %v4296_v36 = vld [vmem:[#allocation11 + $0x20] ss:$8 sps:$4 sm:$0xff]   ;;  %v4301_v38 = vld [vmem:[#allocation11 + $0x34] ss:$8 sps:$4 sm:$0xff]   ;;  %v5407_v40 = vpack.c.bf16 %v505_v34, %v504_v33  ;;  %p4857_p12 = scmp.ne.s32.totalorder %s6429_s29, %s4856_s18 }
 0x10f   : > { %4113 = vmatprep.subr.bf16.mxu1 %v4275_v7  ;;  %628 = vmatprep.subr.bf16.mxu0 %v4275_v7  ;;  %v4322_v39 = vld [vmem:[#allocation12 + $0x24] ss:$8 sps:$4 sm:$0xff]   ;;  %v4320_v41 = vld [vmem:[#allocation12 + $0x20] ss:$8 sps:$4 sm:$0xff]   ;;  %v4299_v42 = vld [vmem:[#allocation11 + $0x30] ss:$8 sps:$4 sm:$0xff]  }
 0x110   : > { %v514_v43 = vld [vmem:[%s5365_s17 + $0x60] sm:$0xff]  ;;  %v515_v44 = vld [vmem:[%s5365_s17 + $0x68] sm:$0xff]  ;;  %v4325_v45 = vld [vmem:[#allocation12 + $0x34] ss:$8 sps:$4 sm:$0xff]   ;;  %p6627_p13 = scmp.ne.s32.totalorder %s6613_s21, 0  ;;  %s4986_s10 = smov [#allocation22]  }
 0x111   : > { %v4304_v46 = vld [vmem:[#allocation11 + $0x44] ss:$8 sps:$4 sm:$0xff]   ;;  %v4302_v49 = vld [vmem:[#allocation11 + $0x40] ss:$8 sps:$4 sm:$0xff]   ;;  %v5417_v50 = vpack.c.bf16 %v515_v44, %v514_v43  ;;  %v4307_v51 = vld [vmem:[#allocation11 + $0x54] ss:$8 sps:$4 sm:$0xff]   ;;  %s6426_s24 = scalar_lea.hbm %s6626_s23, %s6601_s26 }
 0x112   : > { %4121 = vmatpush1.bf16.msra.mxu1 %v4277_v8  ;;  %629 = vmatpush1.bf16.msra.mxu0 %v4277_v8  ;;  %v506_v47 = vld [vmem:[%s5365_s17 + $0x20] sm:$0xff]  ;;  %v507_v48 = vld [vmem:[%s5365_s17 + $0x28] sm:$0xff]  ;;  %v4323_v52 = vld [vmem:[#allocation12 + $0x30] ss:$8 sps:$4 sm:$0xff]   ;;  %p4858_p1 = pnand %p4857_p12, %p6627_p13  ;;  %s4860_s9 = sshll.u32 %s4986_s10, 4  ;;  %s4861_s9 = int_to_ptr.vmem [resolvable:$false] %s4860_s9 }
 0x113   : > { %4114 = vmatprep.subr.bf16.mxu1 %v4278_v9  ;;  %630 = vmatprep.subr.bf16.mxu0 %v4278_v9  ;;  %v520_v53 = vpack.c.bf16 %v507_v48, %v506_v47  ;;  %v4328_v54 = vld [vmem:[#allocation12 + $0x44] ss:$8 sps:$4 sm:$0xff]   ;;  %v4305_v55 = vld [vmem:[#allocation11 + $0x50] ss:$8 sps:$4 sm:$0xff]   ;;  %v4326_v61 = vld [vmem:[#allocation12 + $0x40] ss:$8 sps:$4 sm:$0xff]   ;;  %p4863_p2 = scmp.lt.s32.totalorder %s6429_s29, %s4861_s9 }
 0x114   : > { %v516_v56 = vld [vmem:[%s5365_s17 + $0x70] sm:$0xff]  ;;  %v517_v57 = vld [vmem:[%s5365_s17 + $0x78] sm:$0xff]  ;;  %v4310_v58 = vld [vmem:[#allocation11 + $0x64] ss:$8 sps:$4 sm:$0xff]   ;;  %p4859_p3 = pneg %p4858_p1 }
 0x115   : > { %v508_v59 = vld [vmem:[%s5365_s17 + $0x30] sm:$0xff]  ;;  %v509_v60 = vld [vmem:[%s5365_s17 + $0x38] sm:$0xff]  ;;  %v4308_v62 = vld [vmem:[#allocation11 + $0x60] ss:$8 sps:$4 sm:$0xff]   ;;  %v525_v63 = vpack.c.bf16 %v517_v57, %v516_v56 }
 0x116   : > { %4122 = vmatpush1.bf16.msra.mxu1 %v4280_v10  ;;  %631 = vmatpush1.bf16.msra.mxu0 %v4280_v10  ;;  %v4313_v1 = vld [vmem:[#allocation11 + $0x74] ss:$8 sps:$4 sm:$0xff]   ;;  %v521_v2 = vpack.c.bf16 %v509_v60, %v508_v59  ;;  %v4311_v3 = vld [vmem:[#allocation11 + $0x70] ss:$8 sps:$4 sm:$0xff]   ;;  %v4334_v6 = vld [vmem:[#allocation12 + $0x64] ss:$8 sps:$4 sm:$0xff]  }
 0x117   : > { %4115 = vmatprep.subr.bf16.mxu1 %v4281_v11  ;;  %632 = vmatprep.subr.bf16.mxu0 %v4281_v11  ;;  %v4331_v4 = vld [vmem:[#allocation12 + $0x54] ss:$8 sps:$4 sm:$0xff]   ;;  %v4329_v5 = vld [vmem:[#allocation12 + $0x50] ss:$8 sps:$4 sm:$0xff]   ;;  %v4332_v7 = vld [vmem:[#allocation12 + $0x60] ss:$8 sps:$4 sm:$0xff]  }
 0x118   : > { %v4337_v8 = vld [vmem:[#allocation12 + $0x74] ss:$8 sps:$4 sm:$0xff]   ;;  %v4335_v9 = vld [vmem:[#allocation12 + $0x70] ss:$8 sps:$4 sm:$0xff]  }
 0x11a   : > { %4123 = vmatpush1.bf16.msra.mxu1 %v4283_v12  ;;  %633 = vmatpush1.bf16.msra.mxu0 %v4283_v12 }
 0x11b   : > { %4116 = vmatprep.subr.bf16.mxu1 %v4284_v13  ;;  %634 = vmatprep.subr.bf16.mxu0 %v4284_v13 }
 0x11e   : > { %4124 = vmatpush1.bf16.msra.mxu1 %v4286_v14  ;;  %635 = vmatpush1.bf16.msra.mxu0 %v4286_v14 }
 0x11f   : > { %4117 = vmatprep.subr.bf16.mxu1 %v4287_v15  ;;  %636 = vmatprep.subr.bf16.mxu0 %v4287_v15 }
 0x122   : > { %4125 = vmatpush1.bf16.msra.mxu1 %v4289_v16  ;;  %637 = vmatpush1.bf16.msra.mxu0 %v4289_v16 }
 0x123   : > { %863 = vmatprep.subr.bf16.mxu1 %v4292_v19  ;;  %1104 = vmatprep.subr.bf16.mxu0 %v4316_v21 }
 0x125   : > { %695 = vmatmul.mubr.bf16.vlgmr.msra.gmra.mrb[0].mxu1 %v5393_v23  ;;  %655 = vmatmul.mubr.bf16.vlgmr.msra.gmra.mrb[0].mxu0 %v5395_v26 }
 0x126   : > { %864 = vmatpush1.bf16.msra.mxu1 %v4290_v24  ;;  %704 = vmatprep.mubr.bf16.mxu1 %v4985_v0 }
 0x127   : > { %865 = vmatprep.subr.bf16.mxu1 %v4295_v25  ;;  %664 = vmatprep.mubr.bf16.mxu0 %v4985_v0 }
 0x128   : > { %1105 = vmatpush1.bf16.msra.mxu0 %v4314_v27 }
 0x129   : > { %1106 = vmatprep.subr.bf16.mxu0 %v4319_v31 }
 0x12a   : > { %866 = vmatpush1.bf16.msra.mxu1 %v4293_v28 }
 0x12b   : > { %867 = vmatprep.subr.bf16.mxu1 %v4298_v32 }
 0x12c   : > { %1107 = vmatpush1.bf16.msra.mxu0 %v4317_v35 }
 0x12d   : > { %705 = vmatmul.mubr.bf16.gmra.mrb[4].mxu1 %v5405_v37  ;;  %665 = vmatmul.mubr.bf16.gmra.mrb[4].mxu0 %v5407_v40 }
 0x12e   : > { %868 = vmatpush1.bf16.msra.mxu1 %v4296_v36  ;;  %714 = vmatprep.mubr.bf16.mxu1 %v4985_v0 }
 0x12f   : > { %869 = vmatprep.subr.bf16.mxu1 %v4301_v38  ;;  %674 = vmatprep.mubr.bf16.mxu0 %v4985_v0 }
 0x130   : > { %1108 = vmatprep.subr.bf16.mxu0 %v4322_v39 }
 0x131   : > { %1109 = vmatpush1.bf16.msra.mxu0 %v4320_v41 }
 0x132   : > { %870 = vmatpush1.bf16.msra.mxu1 %v4299_v42  ;;  %1110 = vmatprep.subr.bf16.mxu0 %v4325_v45 }
 0x133   : > { %871 = vmatprep.subr.bf16.mxu1 %v4304_v46 }
 0x135   : > { %715 = vmatmul.mubr.bf16.gmra.mrb[8].mxu1 %v5417_v50  ;;  %675 = vmatmul.mubr.bf16.gmra.mrb[8].mxu0 %v520_v53 }
 0x136   : > { %872 = vmatpush1.bf16.msra.mxu1 %v4302_v49  ;;  %724 = vmatprep.mubr.bf16.mxu1 %v4985_v0 }
 0x137   : > { %873 = vmatprep.subr.bf16.mxu1 %v4307_v51  ;;  %684 = vmatprep.mubr.bf16.mxu0 %v4985_v0 }
 0x138   : > { %1111 = vmatpush1.bf16.msra.mxu0 %v4323_v52 }
 0x139   : > { %1112 = vmatprep.subr.bf16.mxu0 %v4328_v54 }
 0x13a   : > { %874 = vmatpush1.bf16.msra.mxu1 %v4305_v55 }
 0x13b   : > { %875 = vmatprep.subr.bf16.mxu1 %v4310_v58 }
 0x13c   : > { %1113 = vmatpush1.bf16.msra.mxu0 %v4326_v61 }
 0x13d   : > { %725 = vmatmul.mubr.bf16.gmra.mrb[12].mxu1 %v525_v63  ;;  %685 = vmatmul.mubr.bf16.gmra.mrb[12].mxu0 %v521_v2 }
 0x13e   : > { %876 = vmatpush1.bf16.msra.mxu1 %v4308_v62  ;;  %895 = vmatprep.mubr.bf16.mxu1 %v4985_v0 }
 0x13f   : > { %877 = vmatprep.subr.bf16.mxu1 %v4313_v1  ;;  %1136 = vmatprep.mubr.bf16.mxu0 %v4985_v0 }
 0x140   : > { %1114 = vmatprep.subr.bf16.mxu0 %v4331_v4 }
 0x141   : > { %1115 = vmatpush1.bf16.msra.mxu0 %v4329_v5 }
 0x142   : > { %878 = vmatpush1.bf16.msra.mxu1 %v4311_v3  ;;  %1116 = vmatprep.subr.bf16.mxu0 %v4334_v6 }
 0x145   : > { %896 = vmatmul.mubr.bf16.vlgmr.msra.gmra.mrb[16].mxu1 %v5395_v26  ;;  %1117 = vmatpush1.bf16.msra.mxu0 %v4332_v7 }
 0x146   : > { %905 = vmatprep.mubr.bf16.mxu1 %v4985_v0  ;;  %1118 = vmatprep.subr.bf16.mxu0 %v4337_v8 }
 0x149   : > { %1119 = vmatpush1.bf16.msra.mxu0 %v4335_v9 }
 0x14c   : > { %1137 = vmatmul.mubr.bf16.vlgmr.msra.gmra.mrb[16].mxu0 %v5395_v26 }
 0x14d   : > { %906 = vmatmul.mubr.bf16.gmra.mrb[20].mxu1 %v5407_v40  ;;  %1146 = vmatprep.mubr.bf16.mxu0 %v4985_v0 }
 0x14e   : > { %915 = vmatprep.mubr.bf16.mxu1 %v4985_v0 }
 0x154   : > { %1147 = vmatmul.mubr.bf16.gmra.mrb[20].mxu0 %v5407_v40 }
 0x155   : > { %916 = vmatmul.mubr.bf16.gmra.mrb[24].mxu1 %v520_v53  ;;  %1156 = vmatprep.mubr.bf16.mxu0 %v4985_v0 }
 0x156   : > { %925 = vmatprep.mubr.bf16.mxu1 %v4985_v0 }
 0x15c   : > { %1157 = vmatmul.mubr.bf16.gmra.mrb[24].mxu0 %v520_v53 }
 0x15d   : > { %926 = vmatmul.mubr.bf16.gmra.mrb[28].mxu1 %v521_v2  ;;  %1166 = vmatprep.mubr.bf16.mxu0 %v4985_v0 }
 0x15e   : > { %935 = vmatprep.mubr.bf16.mxu1 %v4985_v0 }
 0x164   : > { %1167 = vmatmul.mubr.bf16.gmra.mrb[28].mxu0 %v521_v2 }
 0x165   : > { %936 = vmatmul.mubr.bf16.gmra.mrb[32].mxu1 %v5393_v23  ;;  %1176 = vmatprep.mubr.bf16.mxu0 %v4985_v0 }
 0x166   : > { %945 = vmatprep.mubr.bf16.mxu1 %v4985_v0 }
 0x16c   : > { %1177 = vmatmul.mubr.bf16.gmra.mrb[32].mxu0 %v5393_v23 }
 0x16d   : > { %946 = vmatmul.mubr.bf16.gmra.mrb[36].mxu1 %v5405_v37  ;;  %1186 = vmatprep.mubr.bf16.mxu0 %v4985_v0 }
 0x16e   : > { %955 = vmatprep.mubr.bf16.mxu1 %v4985_v0 }
 0x174   : > { %1187 = vmatmul.mubr.bf16.gmra.mrb[36].mxu0 %v5405_v37 }
 0x175   : > { %956 = vmatmul.mubr.bf16.gmra.mrb[40].mxu1 %v5417_v50  ;;  %1196 = vmatprep.mubr.bf16.mxu0 %v4985_v0 }
 0x176   : > { %965 = vmatprep.mubr.bf16.mxu1 %v4985_v0 }
 0x17c   : > { %1197 = vmatmul.mubr.bf16.gmra.mrb[40].mxu0 %v5417_v50 }
 0x17d   : > { %966 = vmatmul.mubr.bf16.gmra.mrb[44].mxu1 %v525_v63  ;;  %1206 = vmatprep.mubr.bf16.mxu0 %v4985_v0 }
 0x184   : > { %1207 = vmatmul.mubr.bf16.gmra.mrb[44].mxu0 %v525_v63 }
 0x1f8   : > { %v5452_v10 = vpop.f32.mrb[0].mxu1  ;;  %v656_v11 = vpop.f32.mrb[0].mxu0 }
 0x1f9   : > { %v5454_v12 = vpop.f32.mrb[1].mxu1  ;;  %v658_v13 = vpop.f32.mrb[1].mxu0 }
 0x1fa   : > { %v5456_v14 = vpop.f32.mrb[2].mxu1  ;;  %v660_v15 = vpop.f32.mrb[2].mxu0 }
 0x1fb   : > { %v743_v16 = vpack.c.bf16 %v5456_v14, %v5452_v10  ;;  %v5460_v17 = vpop.f32.mrb[3].mxu1  ;;  %v735_v18 = vpack.c.bf16 %v660_v15, %v656_v11  ;;  %v662_v19 = vpop.f32.mrb[3].mxu0 }
 0x1fc   : > { %v744_v20 = vpack.c.bf16 %v5460_v17, %v5454_v12  ;;  %v736_v21 = vpack.c.bf16 %v662_v19, %v658_v13 }
 0x1fd   : > { %3998 = vmatprep.mubr.bf16.mxu1 %v735_v18 }
 0x1fe   : > { %4062 = vmatprep.mubr.bf16.mxu0 %v736_v21 }
 0x200   : > { %v5464_v22 = vpop.f32.mrb[4].mxu1  ;;  %v5466_v23 = vpop.f32.mrb[4].mxu0 }
 0x201   : > { %v5468_v24 = vpop.f32.mrb[5].mxu1  ;;  %v5470_v25 = vpop.f32.mrb[5].mxu0 }
 0x202   : > { %v5472_v26 = vpop.f32.mrb[6].mxu1  ;;  %v5474_v27 = vpop.f32.mrb[6].mxu0 }
 0x203   : > { %v745_v28 = vpack.c.bf16 %v5472_v26, %v5464_v22  ;;  %v5478_v29 = vpop.f32.mrb[7].mxu1  ;;  %v737_v30 = vpack.c.bf16 %v5474_v27, %v5466_v23  ;;  %v5482_v31 = vpop.f32.mrb[7].mxu0 }
 0x204   : > { %v746_v32 = vpack.c.bf16 %v5478_v29, %v5468_v24  ;;  %v738_v33 = vpack.c.bf16 %v5482_v31, %v5470_v25 }
 0x208   : > { %v5488_v34 = vpop.f32.mrb[8].mxu1  ;;  %v5490_v35 = vpop.f32.mrb[8].mxu0 }
 0x209   : > { %v5492_v36 = vpop.f32.mrb[9].mxu1  ;;  %v5494_v37 = vpop.f32.mrb[9].mxu0 }
 0x20a   : > { %v5496_v38 = vpop.f32.mrb[10].mxu1  ;;  %v5498_v39 = vpop.f32.mrb[10].mxu0 }
 0x20b   : > { %v747_v40 = vpack.c.bf16 %v5496_v38, %v5488_v34  ;;  %v5502_v41 = vpop.f32.mrb[11].mxu1  ;;  %v739_v42 = vpack.c.bf16 %v5498_v39, %v5490_v35  ;;  %v5506_v43 = vpop.f32.mrb[11].mxu0 }
 0x20c   : > { %v748_v44 = vpack.c.bf16 %v5502_v41, %v5492_v36  ;;  %v740_v45 = vpack.c.bf16 %v5506_v43, %v5494_v37 }
 0x210   : > { %v5512_v46 = vpop.f32.mrb[12].mxu1  ;;  %v5514_v47 = vpop.f32.mrb[12].mxu0 }
 0x211   : > { %v5516_v48 = vpop.f32.mrb[13].mxu1  ;;  %v5518_v49 = vpop.f32.mrb[13].mxu0 }
 0x212   : > { %v5520_v50 = vpop.f32.mrb[14].mxu1  ;;  %v5522_v51 = vpop.f32.mrb[14].mxu0 }
 0x213   : > { %v749_v52 = vpack.c.bf16 %v5520_v50, %v5512_v46  ;;  %v5526_v53 = vpop.f32.mrb[15].mxu1  ;;  %v741_v54 = vpack.c.bf16 %v5522_v51, %v5514_v47  ;;  %v5530_v55 = vpop.f32.mrb[15].mxu0 }
 0x214   : > { %v750_v56 = vpack.c.bf16 %v5526_v53, %v5516_v48  ;;  %v742_v57 = vpack.c.bf16 %v5530_v55, %v5518_v49 }
 0x218   : > { %v897_v58 = vpop.f32.mrb[16].mxu1 }
 0x219   : > { %v899_v59 = vpop.f32.mrb[17].mxu1 }
 0x21a   : > { %v901_v60 = vpop.f32.mrb[18].mxu1 }
 0x21b   : > { %v976_v61 = vpack.c.bf16 %v901_v60, %v897_v58  ;;  %v903_v62 = vpop.f32.mrb[19].mxu1 }
 0x21c   : > { %v977_v63 = vpack.c.bf16 %v903_v62, %v899_v59 }
 0x21d   : > { %3982 = vmatprep.subr.bf16.mxu1 %v976_v61 }
 0x21e   : > { %3983 = vmatpush3.bf16.xpose.msra.mxu1 %v976_v61  ;;  %4046 = vmatprep.subr.bf16.mxu0 %v977_v63 }
 0x21f   : > { %4047 = vmatpush3.bf16.xpose.msra.mxu0 %v977_v63 }
 0x220   : > { %v907_v1 = vpop.f32.mrb[20].mxu1 }
 0x221   : > { %v909_v2 = vpop.f32.mrb[21].mxu1 }
 0x222   : > { %v911_v3 = vpop.f32.mrb[22].mxu1 }
 0x223   : > { %v978_v4 = vpack.c.bf16 %v911_v3, %v907_v1  ;;  %v913_v5 = vpop.f32.mrb[23].mxu1 }
 0x224   : > { %v979_v6 = vpack.c.bf16 %v913_v5, %v909_v2 }
 0x225   : > { %3984 = vmatprep.subr.bf16.mxu1 %v978_v4 }
 0x226   : > { %3985 = vmatpush3.bf16.xpose.msra.mxu1 %v978_v4  ;;  %4048 = vmatprep.subr.bf16.mxu0 %v979_v6 }
 0x227   : > { %4049 = vmatpush3.bf16.xpose.msra.mxu0 %v979_v6 }
 0x228   : > { %v917_v7 = vpop.f32.mrb[24].mxu1 }
 0x229   : > { %v919_v8 = vpop.f32.mrb[25].mxu1 }
 0x22a   : > { %v921_v9 = vpop.f32.mrb[26].mxu1 }
 0x22b   : > { %v980_v11 = vpack.c.bf16 %v921_v9, %v917_v7  ;;  %v923_v13 = vpop.f32.mrb[27].mxu1 }
 0x22c   : > { %v981_v15 = vpack.c.bf16 %v923_v13, %v919_v8 }
 0x22d   : > { %3986 = vmatprep.subr.bf16.mxu1 %v980_v11 }
 0x22e   : > { %3987 = vmatpush3.bf16.xpose.msra.mxu1 %v980_v11  ;;  %4050 = vmatprep.subr.bf16.mxu0 %v981_v15 }
 0x22f   : > { %4051 = vmatpush3.bf16.xpose.msra.mxu0 %v981_v15 }
 0x230   : > { %v927_v18 = vpop.f32.mrb[28].mxu1 }
 0x231   : > { %v929_v19 = vpop.f32.mrb[29].mxu1 }
 0x232   : > { %v931_v21 = vpop.f32.mrb[30].mxu1 }
 0x233   : > { %v982_v58 = vpack.c.bf16 %v931_v21, %v927_v18  ;;  %v933_v59 = vpop.f32.mrb[31].mxu1 }
 0x234   : > { %v983_v60 = vpack.c.bf16 %v933_v59, %v929_v19 }
 0x235   : > { %3988 = vmatprep.subr.bf16.mxu1 %v982_v58 }
 0x236   : > { %3989 = vmatpush3.bf16.xpose.msra.mxu1 %v982_v58  ;;  %4052 = vmatprep.subr.bf16.mxu0 %v983_v60 }
 0x237   : > { %4053 = vmatpush3.bf16.xpose.msra.mxu0 %v983_v60 }
 0x238   : > { %v937_v61 = vpop.f32.mrb[32].mxu1 }
 0x239   : > { %v939_v62 = vpop.f32.mrb[33].mxu1 }
 0x23a   : > { %v941_v63 = vpop.f32.mrb[34].mxu1 }
 0x23b   : > { %v984_v1 = vpack.c.bf16 %v941_v63, %v937_v61  ;;  %v943_v2 = vpop.f32.mrb[35].mxu1 }
 0x23c   : > { %v985_v3 = vpack.c.bf16 %v943_v2, %v939_v62 }
 0x23d   : > { %3990 = vmatprep.subr.bf16.mxu1 %v984_v1 }
 0x23e   : > { %3991 = vmatpush3.bf16.xpose.msra.mxu1 %v984_v1  ;;  %4054 = vmatprep.subr.bf16.mxu0 %v985_v3  ;;  %v1138_v1 = vpop.f32.mrb[16].mxu0 }
 0x23f   : > { %4055 = vmatpush3.bf16.xpose.msra.mxu0 %v985_v3  ;;  %v1140_v2 = vpop.f32.mrb[17].mxu0 }
 0x240   : > { %v947_v4 = vpop.f32.mrb[36].mxu1  ;;  %v1142_v3 = vpop.f32.mrb[18].mxu0 }
 0x241   : > { %v949_v5 = vpop.f32.mrb[37].mxu1 }
 0x242   : > { %v951_v6 = vpop.f32.mrb[38].mxu1 }
 0x243   : > { %v986_v7 = vpack.c.bf16 %v951_v6, %v947_v4  ;;  %v953_v8 = vpop.f32.mrb[39].mxu1  ;;  %v1217_v4 = vpack.c.bf16 %v1142_v3, %v1138_v1 }
 0x244   : > { %v987_v9 = vpack.c.bf16 %v953_v8, %v949_v5  ;;  %v1144_v5 = vpop.f32.mrb[19].mxu0 }
 0x245   : > { %3992 = vmatprep.subr.bf16.mxu1 %v986_v7  ;;  %v5536_v6 = vpack.c.bf16 %v1144_v5, %v1140_v2 }
 0x246   : > { %3993 = vmatpush3.bf16.xpose.msra.mxu1 %v986_v7  ;;  %4056 = vmatprep.subr.bf16.mxu0 %v987_v9  ;;  %v1148_v7 = vpop.f32.mrb[20].mxu0 }
 0x247   : > { %4057 = vmatpush3.bf16.xpose.msra.mxu0 %v987_v9  ;;  %v1150_v8 = vpop.f32.mrb[21].mxu0 }
 0x248   : > { %v957_v11 = vpop.f32.mrb[40].mxu1  ;;  %v1152_v9 = vpop.f32.mrb[22].mxu0 }
 0x249   : > { %v959_v13 = vpop.f32.mrb[41].mxu1 }
 0x24a   : > { %v961_v15 = vpop.f32.mrb[42].mxu1 }
 0x24b   : > { %v988_v18 = vpack.c.bf16 %v961_v15, %v957_v11  ;;  %v963_v19 = vpop.f32.mrb[43].mxu1  ;;  %v1219_v11 = vpack.c.bf16 %v1152_v9, %v1148_v7 }
 0x24c   : > { %v989_v21 = vpack.c.bf16 %v963_v19, %v959_v13  ;;  %v1154_v13 = vpop.f32.mrb[23].mxu0 }
 0x24d   : > { %3994 = vmatprep.subr.bf16.mxu1 %v988_v18  ;;  %v5550_v23 = vpack.c.bf16 %v1154_v13, %v1150_v8  ;;  %v1158_v25 = vpop.f32.mrb[24].mxu0 }
 0x24e   : > { %3995 = vmatpush3.bf16.xpose.msra.mxu1 %v988_v18  ;;  %4058 = vmatprep.subr.bf16.mxu0 %v989_v21  ;;  %v1160_v27 = vpop.f32.mrb[25].mxu0 }
 0x24f   : > { %4059 = vmatpush3.bf16.xpose.msra.mxu0 %v989_v21 }
 0x250   : > { %v967_v58 = vpop.f32.mrb[44].mxu1 }
 0x251   : > { %v969_v59 = vpop.f32.mrb[45].mxu1 }
 0x252   : > { %v971_v60 = vpop.f32.mrb[46].mxu1 }
 0x253   : > { %v990_v61 = vpack.c.bf16 %v971_v60, %v967_v58  ;;  %v973_v62 = vpop.f32.mrb[47].mxu1 }
 0x254   : > { %v991_v63 = vpack.c.bf16 %v973_v62, %v969_v59 }
 0x255   : > { %3996 = vmatprep.subr.bf16.mxu1 %v990_v61 }
 0x256   : > { %3997 = vmatpush3.bf16.xpose.msra.mxu1 %v990_v61  ;;  %4060 = vmatprep.subr.bf16.mxu0 %v991_v63 }
 0x257   : > { %4061 = vmatpush3.bf16.xpose.msra.mxu0 %v991_v63  ;;  %4014 = vmatprep.subr.bf16.mxu1 %v1217_v4 }
 0x25d   : > { %3999 = vmatmul.mubr.bf16.vlgmr.msra.gmra.mrb[48].mxu1 %v737_v30  ;;  %v1162_v30 = vpop.f32.mrb[26].mxu0 }
 0x25e   : > { %4002 = vmatprep.mubr.bf16.mxu1 %v739_v42  ;;  %4063 = vmatmul.mubr.bf16.vlgmr.msra.gmra.mrb[48].mxu0 %v738_v33  ;;  %v1221_v31 = vpack.c.bf16 %v1162_v30, %v1158_v25  ;;  %v1164_v33 = vpop.f32.mrb[27].mxu0 }
 0x25f   : > { %4066 = vmatprep.mubr.bf16.mxu0 %v740_v45  ;;  %4015 = vmatpush3.bf16.msra.mxu1 %v1217_v4  ;;  %v5564_v35 = vpack.c.bf16 %v1164_v33, %v1160_v27  ;;  %v1168_v10 = vpop.f32.mrb[28].mxu0 }
 0x260   : > { %4016 = vmatprep.subr.bf16.mxu1 %v1219_v11  ;;  %v1170_v12 = vpop.f32.mrb[29].mxu0 }
 0x261   : > { %v1172_v14 = vpop.f32.mrb[30].mxu0 }
 0x262   : > { %v1174_v17 = vpop.f32.mrb[31].mxu0 }
 0x263   : > { %4017 = vmatpush3.bf16.msra.mxu1 %v1219_v11  ;;  %v1178_v22 = vpop.f32.mrb[32].mxu0 }
 0x264   : > { %4018 = vmatprep.subr.bf16.mxu1 %v1221_v31  ;;  %v1180_v24 = vpop.f32.mrb[33].mxu0 }
 0x265   : > { %4003 = vmatmul.mubr.bf16.gmra.mrb[52].mxu1 %v741_v54  ;;  %v1182_v26 = vpop.f32.mrb[34].mxu0 }
 0x266   : > { %4006 = vmatprep.mubr.bf16.mxu1 %v743_v16  ;;  %4067 = vmatmul.mubr.bf16.gmra.mrb[52].mxu0 %v742_v57  ;;  %v1223_v16 = vpack.c.bf16 %v1172_v14, %v1168_v10  ;;  %v1184_v29 = vpop.f32.mrb[35].mxu0 }
 0x267   : > { %4070 = vmatprep.mubr.bf16.mxu0 %v744_v20  ;;  %4019 = vmatpush3.bf16.msra.mxu1 %v1221_v31  ;;  %v5578_v20 = vpack.c.bf16 %v1174_v17, %v1170_v12  ;;  %v1188_v34 = vpop.f32.mrb[36].mxu0 }
 0x268   : > { %4020 = vmatprep.subr.bf16.mxu1 %v1223_v16  ;;  %v1190_v36 = vpop.f32.mrb[37].mxu0 }
 0x269   : > { %v1192_v37 = vpop.f32.mrb[38].mxu0 }
 0x26a   : > { %v1227_v38 = vpack.c.bf16 %v1192_v37, %v1188_v34  ;;  %v1194_v39 = vpop.f32.mrb[39].mxu0 }
 0x26b   : > { %4021 = vmatpush3.bf16.msra.mxu1 %v1223_v16  ;;  %v1198_v41 = vpop.f32.mrb[40].mxu0 }
 0x26c   : > { %v1200_v42 = vpop.f32.mrb[41].mxu0 }
 0x26d   : > { %4007 = vmatmul.mubr.bf16.gmra.mrb[56].mxu1 %v745_v28  ;;  %v1225_v28 = vpack.c.bf16 %v1182_v26, %v1178_v22  ;;  %v1202_v43 = vpop.f32.mrb[42].mxu0 }
 0x26e   : > { %4010 = vmatprep.mubr.bf16.mxu1 %v747_v40  ;;  %4071 = vmatmul.mubr.bf16.gmra.mrb[56].mxu0 %v746_v32  ;;  %v5586_v32 = vpack.c.bf16 %v1184_v29, %v1180_v24  ;;  %v5588_v40 = vpack.c.bf16 %v1194_v39, %v1190_v36  ;;  %v1204_v45 = vpop.f32.mrb[43].mxu0 }
 0x26f   : > { %4074 = vmatprep.mubr.bf16.mxu0 %v748_v44  ;;  %4022 = vmatprep.subr.bf16.mxu1 %v1225_v28  ;;  %v1229_v44 = vpack.c.bf16 %v1202_v43, %v1198_v41  ;;  %v5590_v46 = vpack.c.bf16 %v1204_v45, %v1200_v42  ;;  %v1208_v47 = vpop.f32.mrb[44].mxu0 }
 0x270   : > { %4023 = vmatpush3.bf16.msra.mxu1 %v1225_v28  ;;  %v1210_v48 = vpop.f32.mrb[45].mxu0 }
 0x271   : > { %4024 = vmatprep.subr.bf16.mxu1 %v1227_v38  ;;  %v1212_v49 = vpop.f32.mrb[46].mxu0 }
 0x272   : > { %v1231_v50 = vpack.c.bf16 %v1212_v49, %v1208_v47  ;;  %v1214_v51 = vpop.f32.mrb[47].mxu0 }
 0x274   : > { %4025 = vmatpush3.bf16.msra.mxu1 %v1227_v38 }
 0x275   : > { %4011 = vmatmul.mubr.bf16.gmra.mrb[60].mxu1 %v749_v52  ;;  %4026 = vmatprep.subr.bf16.mxu1 %v1229_v44  ;;  %v5592_v52 = vpack.c.bf16 %v1214_v51, %v1210_v48 }
 0x276   : > { %4075 = vmatmul.mubr.bf16.gmra.mrb[60].mxu0 %v750_v56 }
 0x278   : > { %4027 = vmatpush3.bf16.msra.mxu1 %v1229_v44 }
 0x279   : > { %4028 = vmatprep.subr.bf16.mxu1 %v1231_v50 }
 0x27c   : > { %4029 = vmatpush3.bf16.msra.mxu1 %v1231_v50 }
 0x27d   : > { %4078 = vmatprep.subr.bf16.mxu1 %v5536_v6 }
 0x330   : > { %v4000_v53 = vpop.f32.mrb[48].mxu1 }
 0x331   : > { %v5595_v54 = vmul.f32 0.088388346, %v4000_v53  ;;  %v1323_v55 = vpop.f32.mrb[49].mxu1  ;;  %v5597_v56 = vpop.f32.mrb[48].mxu0 }
 0x332   : > { %v5599_v57 = vmul.f32 0.088388346, %v1323_v55  ;;  %v4001_v15 = vpop.f32.mrb[50].mxu1  ;;  %v1789_v18 = vpop.f32.mrb[49].mxu0  ;;  %v5651_v47 = vmul.f32 0.088388346, %v5597_v56 }
 0x333   : > { %1406 = vmax.xlane.f32.xlu1 %v5595_v54  ;;  %v1326_v19 = vpop.f32.mrb[51].mxu1  ;;  %v4065_v21 = vpop.f32.mrb[50].mxu0  ;;  %v5603_v59 = vmul.f32 0.088388346, %v4001_v15  ;;  %v5644_v44 = vmul.f32 0.088388346, %v1789_v18 }
 0x334   : > { %1402 = vmax.xlane.f32.xlu0 %v5599_v57  ;;  %v1792_v58 = vpop.f32.mrb[51].mxu0  ;;  %v5605_v60 = vmul.f32 0.088388346, %v1326_v19  ;;  %v5654_v48 = vmul.f32 0.088388346, %v4065_v21 }
 0x335   : > { %v5647_v45 = vmul.f32 0.088388346, %v1792_v58 }
 0x337   : > { %1408 = vmax.xlane.f32.xlu1 %v5603_v59 }
 0x338   : > { %1404 = vmax.xlane.f32.xlu0 %v5605_v60  ;;  %v4004_v61 = vpop.f32.mrb[52].mxu1 }
 0x339   : > { %v1339_v62 = vpop.f32.mrb[53].mxu1  ;;  %v4068_v63 = vpop.f32.mrb[52].mxu0  ;;  %v5614_v9 = vmul.f32 0.088388346, %v4004_v61 }
 0x33a   : > { %v5609_v1 = vmul.f32 0.088388346, %v1339_v62  ;;  %v4005_v2 = vpop.f32.mrb[54].mxu1  ;;  %v1805_v3 = vpop.f32.mrb[53].mxu0  ;;  %v5663_v51 = vmul.f32 0.088388346, %v4068_v63 }
 0x33b   : > { %v1342_v4 = vpop.f32.mrb[55].mxu1  ;;  %v4069_v5 = vpop.f32.mrb[54].mxu0  ;;  %v5617_v11 = vmul.f32 0.088388346, %v4005_v2  ;;  %v5657_v49 = vmul.f32 0.088388346, %v1805_v3 }
 0x33c   : > { %v5611_v7 = vmul.f32 0.088388346, %v1342_v4  ;;  %1410 = vmax.xlane.f32.xlu0 %v5609_v1  ;;  %v1808_v8 = vpop.f32.mrb[55].mxu0  ;;  %v5666_v53 = vmul.f32 0.088388346, %v4069_v5 }
 0x33d   : > { %v5660_v50 = vmul.f32 0.088388346, %v1808_v8 }
 0x33e   : > { %1412 = vmax.xlane.f32.xlu1 %v5611_v7 }
 0x340   : > { %1414 = vmax.xlane.f32.xlu0 %v5614_v9  ;;  %v4008_v13 = vpop.f32.mrb[56].mxu1 }
 0x341   : > { %v1355_v25 = vpop.f32.mrb[57].mxu1  ;;  %v4072_v27 = vpop.f32.mrb[56].mxu0  ;;  %v5626_v17 = vmul.f32 0.088388346, %v4008_v13 }
 0x342   : > { %v5620_v30 = vmul.f32 0.088388346, %v1355_v25  ;;  %1416 = vmax.xlane.f32.xlu1 %v5617_v11  ;;  %v4009_v31 = vpop.f32.mrb[58].mxu1  ;;  %v1821_v33 = vpop.f32.mrb[57].mxu0  ;;  %v5675_v15 = vmul.f32 0.088388346, %v4072_v27 }
 0x343   : > { %v1358_v10 = vpop.f32.mrb[59].mxu1  ;;  %v4073_v12 = vpop.f32.mrb[58].mxu0  ;;  %v5629_v22 = vmul.f32 0.088388346, %v4009_v31  ;;  %v5669_v55 = vmul.f32 0.088388346, %v1821_v33 }
 0x344   : > { %v5623_v14 = vmul.f32 0.088388346, %v1358_v10  ;;  %1418 = vmax.xlane.f32.xlu0 %v5620_v30  ;;  %v1824_v16 = vpop.f32.mrb[59].mxu0  ;;  %v5678_v18 = vmul.f32 0.088388346, %v4073_v12 }
 0x345   : > { %v5672_v56 = vmul.f32 0.088388346, %v1824_v16 }
 0x346   : > { %1420 = vmax.xlane.f32.xlu1 %v5623_v14 }
 0x348   : > { %1422 = vmax.xlane.f32.xlu0 %v5626_v17  ;;  %v4012_v24 = vpop.f32.mrb[60].mxu1 }
 0x349   : > { %v1371_v26 = vpop.f32.mrb[61].mxu1  ;;  %v4076_v28 = vpop.f32.mrb[60].mxu0  ;;  %v5638_v42 = vmul.f32 0.088388346, %v4012_v24 }
 0x34a   : > { %v5632_v29 = vmul.f32 0.088388346, %v1371_v26  ;;  %1424 = vmax.xlane.f32.xlu1 %v5629_v22  ;;  %v4013_v34 = vpop.f32.mrb[62].mxu1  ;;  %v1837_v36 = vpop.f32.mrb[61].mxu0  ;;  %v5687_v58 = vmul.f32 0.088388346, %v4076_v28 }
 0x34b   : > { %v1374_v37 = vpop.f32.mrb[63].mxu1  ;;  %v4077_v38 = vpop.f32.mrb[62].mxu0  ;;  %v5641_v43 = vmul.f32 0.088388346, %v4013_v34  ;;  %v5681_v19 = vmul.f32 0.088388346, %v1837_v36 }
 0x34c   : > { %v5635_v39 = vmul.f32 0.088388346, %v1374_v37  ;;  %1426 = vmax.xlane.f32.xlu0 %v5632_v29  ;;  %v1840_v41 = vpop.f32.mrb[63].mxu0  ;;  %v5684_v21 = vmul.f32 0.088388346, %v4077_v38 }
 0x34d   : > { %v5690_v61 = vmul.f32 0.088388346, %v1840_v41 }
 0x34e   : > { %1428 = vmax.xlane.f32.xlu1 %v5635_v39 }
 0x350   : > { %1430 = vmax.xlane.f32.xlu0 %v5638_v42 }
 0x352   : > { %1432 = vmax.xlane.f32.xlu1 %v5641_v43 }
 0x354   : > { %1868 = vmax.xlane.f32.xlu0 %v5644_v44 }
 0x356   : > { %1870 = vmax.xlane.f32.xlu1 %v5647_v45 }
 0x358   : > { %1872 = vmax.xlane.f32.xlu0 %v5651_v47 }
 0x35a   : > { %1874 = vmax.xlane.f32.xlu1 %v5654_v48 }
 0x35c   : > { %1876 = vmax.xlane.f32.xlu0 %v5657_v49 }
 0x35e   : > { %1878 = vmax.xlane.f32.xlu1 %v5660_v50 }
 0x360   : > { %1880 = vmax.xlane.f32.xlu0 %v5663_v51 }
 0x362   : > { %1882 = vmax.xlane.f32.xlu1 %v5666_v53 }
 0x364   : > { %1884 = vmax.xlane.f32.xlu0 %v5669_v55 }
 0x366   : > { %1886 = vmax.xlane.f32.xlu1 %v5672_v56 }
 0x368   : > { %1888 = vmax.xlane.f32.xlu0 %v5675_v15 }
 0x36a   : > { %1890 = vmax.xlane.f32.xlu1 %v5678_v18 }
 0x36c   : > { %1892 = vmax.xlane.f32.xlu0 %v5681_v19 }
 0x36e   : > { %1898 = vmax.xlane.f32.xlu1 %v5684_v21 }
 0x370   : > { %1896 = vmax.xlane.f32.xlu0 %v5687_v58 }
 0x372   : > { %1894 = vmax.xlane.f32.xlu1 %v5690_v61 }
 0x3c0   : > { %v1407_v62 = vpop.xlane.xlu1 %1406 }
 0x3c1   : > { %v1436_v63 = vsub.f32 %v5595_v54, %v1407_v62  ;;  %v1403_v2 = vpop.xlane.xlu0 %1402 }
 0x3c2   : > { %v1434_v3 = vsub.f32 %v5599_v57, %v1403_v2 }
 0x3c3   : > { %v1454_v8 = vmul.f32 1.442695, %v1436_v63 }
 0x3c4   : > { %v1450_v4 = vmul.f32 1.442695, %v1434_v3  ;;  %v1409_v5 = vpop.xlane.xlu1 %1408 }
 0x3c5   : > { %v1437_v13 = vsub.f32 %v5603_v59, %v1409_v5  ;;  %v1405_v25 = vpop.xlane.xlu0 %1404 }
 0x3c6   : > { %4394 = vpow2.f32 %v1450_v4  ;;  %v1435_v27 = vsub.f32 %v5605_v60, %v1405_v25 }
 0x3c7   : > { %4396 = vpow2.f32 %v1454_v8  ;;  %v1456_v33 = vmul.f32 1.442695, %v1437_v13 }
 0x3c8   : > { %v1452_v31 = vmul.f32 1.442695, %v1435_v27 }
 0x3c9   : > { %v1411_v10 = vpop.xlane.xlu0 %1410 }
 0x3ca   : > { %4398 = vpow2.f32 %v1452_v31  ;;  %v1438_v12 = vsub.f32 %v5609_v1, %v1411_v10 }
 0x3cb   : > { %v1413_v54 = vpop.xlane.xlu1 %1412  ;;  %4400 = vpow2.f32 %v1456_v33 }
 0x3cc   : > { %v1458_v16 = vmul.f32 1.442695, %v1438_v12  ;;  %v1439_v57 = vsub.f32 %v5611_v7, %v1413_v54 }
 0x3cd   : > { %v1415_v24 = vpop.xlane.xlu0 %1414 }
 0x3ce   : > { %4402 = vpow2.f32 %v1458_v16  ;;  %v1460_v26 = vmul.f32 1.442695, %v1439_v57  ;;  %v1440_v59 = vsub.f32 %v5614_v9, %v1415_v24 }
 0x3cf   : > { %v1417_v28 = vpop.xlane.xlu1 %1416 }
 0x3d0   : > { %v5701_v34 = vpop.eup %4394  ;;  %v1462_v60 = vmul.f32 1.442695, %v1440_v59  ;;  %v1441_v36 = vsub.f32 %v5617_v11, %v1417_v28  ;;  %4404 = vpow2.f32 %v1460_v26 }
 0x3d1   : > { %v1419_v37 = vpop.xlane.xlu0 %1418  ;;  %1482 = vadd.xlane.f32.xlu0 %v5701_v34  ;;  %v5706_v38 = vpop.eup %4396 }
 0x3d2   : > { %4406 = vpow2.f32 %v1462_v60  ;;  %v1464_v1 = vmul.f32 1.442695, %v1441_v36  ;;  %v1442_v7 = vsub.f32 %v5620_v30, %v1419_v37 }
 0x3d3   : > { %v1421_v41 = vpop.xlane.xlu1 %1420 }
 0x3d4   : > { %v5708_v62 = vpop.eup %4398  ;;  %v1466_v9 = vmul.f32 1.442695, %v1442_v7  ;;  %v1443_v63 = vsub.f32 %v5623_v14, %v1421_v41  ;;  %4408 = vpow2.f32 %v1464_v1 }
 0x3d5   : > { %v1423_v2 = vpop.xlane.xlu0 %1422  ;;  %1486 = vadd.xlane.f32.xlu0 %v5706_v38  ;;  %1484 = vadd.xlane.f32.xlu1 %v5708_v62  ;;  %v5714_v4 = vpop.eup %4400 }
 0x3d6   : > { %4410 = vpow2.f32 %v1466_v9  ;;  %v1468_v11 = vmul.f32 1.442695, %v1443_v63  ;;  %v1444_v3 = vsub.f32 %v5626_v17, %v1423_v2 }
 0x3d7   : > { %v1425_v30 = vpop.xlane.xlu1 %1424 }
 0x3d8   : > { %v5716_v5 = vpop.eup %4402  ;;  %v1470_v8 = vmul.f32 1.442695, %v1444_v3  ;;  %v1445_v13 = vsub.f32 %v5629_v22, %v1425_v30  ;;  %4412 = vpow2.f32 %v1468_v11 }
 0x3d9   : > { %v1427_v14 = vpop.xlane.xlu0 %1426  ;;  %1490 = vadd.xlane.f32.xlu0 %v5716_v5  ;;  %1488 = vadd.xlane.f32.xlu1 %v5714_v4 }
 0x3da   : > { %4414 = vpow2.f32 %v1470_v8  ;;  %v1472_v25 = vmul.f32 1.442695, %v1445_v13  ;;  %v1446_v27 = vsub.f32 %v5632_v29, %v1427_v14  ;;  %v5722_v31 = vpop.eup %4404 }
 0x3db   : > { %v1429_v17 = vpop.xlane.xlu1 %1428 }
 0x3dc   : > { %v5724_v33 = vpop.eup %4406  ;;  %v1474_v10 = vmul.f32 1.442695, %v1446_v27  ;;  %v1447_v12 = vsub.f32 %v5635_v39, %v1429_v17  ;;  %4416 = vpow2.f32 %v1472_v25 }
 0x3dd   : > { %v1431_v22 = vpop.xlane.xlu0 %1430  ;;  %1494 = vadd.xlane.f32.xlu0 %v5724_v33  ;;  %1492 = vadd.xlane.f32.xlu1 %v5722_v31 }
 0x3de   : > { %4418 = vpow2.f32 %v1474_v10  ;;  %v1476_v54 = vmul.f32 1.442695, %v1447_v12  ;;  %v1448_v16 = vsub.f32 %v5638_v42, %v1431_v22  ;;  %v5730_v57 = vpop.eup %4408 }
 0x3df   : > { %v1433_v29 = vpop.xlane.xlu1 %1432 }
 0x3e0   : > { %v5732_v24 = vpop.eup %4410  ;;  %v1478_v26 = vmul.f32 1.442695, %v1448_v16  ;;  %v1449_v59 = vsub.f32 %v5641_v43, %v1433_v29  ;;  %4420 = vpow2.f32 %v1476_v54 }
 0x3e1   : > { %v1869_v39 = vpop.xlane.xlu0 %1868  ;;  %1498 = vadd.xlane.f32.xlu0 %v5732_v24  ;;  %1496 = vadd.xlane.f32.xlu1 %v5730_v57 }
 0x3e2   : > { %4422 = vpow2.f32 %v1478_v26  ;;  %v1480_v28 = vmul.f32 1.442695, %v1449_v59  ;;  %v1900_v60 = vsub.f32 %v5644_v44, %v1869_v39  ;;  %v5738_v36 = vpop.eup %4412 }
 0x3e3   : > { %v1871_v42 = vpop.xlane.xlu1 %1870 }
 0x3e4   : > { %v5740_v37 = vpop.eup %4414  ;;  %v1916_v1 = vmul.f32 1.442695, %v1900_v60  ;;  %v1901_v7 = vsub.f32 %v5647_v45, %v1871_v42  ;;  %4424 = vpow2.f32 %v1480_v28 }
 0x3e5   : > { %v1873_v43 = vpop.xlane.xlu0 %1872  ;;  %1502 = vadd.xlane.f32.xlu0 %v5740_v37  ;;  %1500 = vadd.xlane.f32.xlu1 %v5738_v36 }
 0x3e6   : > { %4426 = vpow2.f32 %v1916_v1  ;;  %v1918_v41 = vmul.f32 1.442695, %v1901_v7  ;;  %v1902_v9 = vsub.f32 %v5651_v47, %v1873_v43  ;;  %v5746_v63 = vpop.eup %4416 }
 0x3e7   : > { %v1875_v44 = vpop.xlane.xlu1 %1874 }
 0x3e8   : > { %v5748_v2 = vpop.eup %4418  ;;  %v1920_v11 = vmul.f32 1.442695, %v1902_v9  ;;  %v1903_v3 = vsub.f32 %v5654_v48, %v1875_v44  ;;  %4428 = vpow2.f32 %v1918_v41 }
 0x3e9   : > { %v1877_v45 = vpop.xlane.xlu0 %1876  ;;  %1506 = vadd.xlane.f32.xlu0 %v5748_v2  ;;  %1504 = vadd.xlane.f32.xlu1 %v5746_v63 }
 0x3ea   : > { %4430 = vpow2.f32 %v1920_v11  ;;  %v1922_v30 = vmul.f32 1.442695, %v1903_v3  ;;  %v1904_v8 = vsub.f32 %v5657_v49, %v1877_v45  ;;  %v5754_v13 = vpop.eup %4420 }
 0x3eb   : > { %v1879_v47 = vpop.xlane.xlu1 %1878 }
 0x3ec   : > { %v5756_v14 = vpop.eup %4422  ;;  %v1924_v25 = vmul.f32 1.442695, %v1904_v8  ;;  %v1905_v27 = vsub.f32 %v5660_v50, %v1879_v47  ;;  %4432 = vpow2.f32 %v1922_v30 }
 0x3ed   : > { %v1881_v48 = vpop.xlane.xlu0 %1880  ;;  %1510 = vadd.xlane.f32.xlu0 %v5756_v14  ;;  %1508 = vadd.xlane.f32.xlu1 %v5754_v13 }
 0x3ee   : > { %4434 = vpow2.f32 %v1924_v25  ;;  %v1926_v17 = vmul.f32 1.442695, %v1905_v27  ;;  %v1906_v10 = vsub.f32 %v5663_v51, %v1881_v48  ;;  %v5762_v12 = vpop.eup %4424 }
 0x3ef   : > { %v1883_v49 = vpop.xlane.xlu1 %1882 }
 0x3f0   : > { %v5764_v22 = vpop.eup %4426  ;;  %v1928_v54 = vmul.f32 1.442695, %v1906_v10  ;;  %v1907_v16 = vsub.f32 %v5666_v53, %v1883_v49  ;;  %4436 = vpow2.f32 %v1926_v17 }
 0x3f1   : > { %v1885_v50 = vpop.xlane.xlu0 %1884  ;;  %1948 = vadd.xlane.f32.xlu0 %v5764_v22  ;;  %1512 = vadd.xlane.f32.xlu1 %v5762_v12 }
 0x3f2   : > { %4438 = vpow2.f32 %v1928_v54  ;;  %v1930_v29 = vmul.f32 1.442695, %v1907_v16  ;;  %v1908_v26 = vsub.f32 %v5669_v55, %v1885_v50  ;;  %v5770_v59 = vpop.eup %4428 }
 0x3f3   : > { %v1887_v51 = vpop.xlane.xlu1 %1886 }
 0x3f4   : > { %v5772_v39 = vpop.eup %4430  ;;  %v1932_v28 = vmul.f32 1.442695, %v1908_v26  ;;  %v1909_v60 = vsub.f32 %v5672_v56, %v1887_v51  ;;  %4440 = vpow2.f32 %v1930_v29 }
 0x3f5   : > { %v1889_v53 = vpop.xlane.xlu0 %1888  ;;  %1952 = vadd.xlane.f32.xlu0 %v5772_v39  ;;  %1950 = vadd.xlane.f32.xlu1 %v5770_v59 }
 0x3f6   : > { %4442 = vpow2.f32 %v1932_v28  ;;  %v1934_v42 = vmul.f32 1.442695, %v1909_v60  ;;  %v1910_v1 = vsub.f32 %v5675_v15, %v1889_v53  ;;  %v5778_v7 = vpop.eup %4432 }
 0x3f7   : > { %v1891_v55 = vpop.xlane.xlu1 %1890 }
 0x3f8   : > { %v5780_v43 = vpop.eup %4434  ;;  %v1936_v41 = vmul.f32 1.442695, %v1910_v1  ;;  %v1911_v9 = vsub.f32 %v5678_v18, %v1891_v55  ;;  %4444 = vpow2.f32 %v1934_v42 }
 0x3f9   : > { %1956 = vadd.xlane.f32.xlu0 %v5780_v43  ;;  %v1893_v56 = vpop.xlane.xlu0 %1892  ;;  %1954 = vadd.xlane.f32.xlu1 %v5778_v7 }
 0x3fa   : > { %4446 = vpow2.f32 %v1936_v41  ;;  %v1938_v44 = vmul.f32 1.442695, %v1911_v9  ;;  %v1912_v11 = vsub.f32 %v5681_v19, %v1893_v56  ;;  %v5786_v3 = vpop.eup %4436 }
 0x3fb   : > { %v1899_v15 = vpop.xlane.xlu1 %1898 }
 0x3fc   : > { %v5788_v45 = vpop.eup %4438  ;;  %v1940_v30 = vmul.f32 1.442695, %v1912_v11  ;;  %4448 = vpow2.f32 %v1938_v44  ;;  %v1915_v19 = vsub.f32 %v5684_v21, %v1899_v15 }
 0x3fd   : > { %1960 = vadd.xlane.f32.xlu0 %v5788_v45  ;;  %v1897_v18 = vpop.xlane.xlu0 %1896  ;;  %1958 = vadd.xlane.f32.xlu1 %v5786_v3 }
 0x3fe   : > { %4450 = vpow2.f32 %v1940_v30  ;;  %v1914_v8 = vsub.f32 %v5687_v58, %v1897_v18  ;;  %v5793_v47 = vpop.eup %4440  ;;  %v1946_v58 = vmul.f32 1.442695, %v1915_v19 }
 0x3ff   : > { %v1895_v25 = vpop.xlane.xlu1 %1894 }
 0x400   : > { %v5795_v27 = vpop.eup %4442  ;;  %v1944_v48 = vmul.f32 1.442695, %v1914_v8  ;;  %v1913_v17 = vsub.f32 %v5690_v61, %v1895_v25 }
 0x401   : > { %1964 = vadd.xlane.f32.xlu0 %v5795_v27  ;;  %1962 = vadd.xlane.f32.xlu1 %v5793_v47 }
 0x402   : > { %4452 = vpow2.f32 %v1944_v48  ;;  %v1942_v10 = vmul.f32 1.442695, %v1913_v17  ;;  %v5801_v49 = vpop.eup %4444 }
 0x404   : > { %v5803_v54 = vpop.eup %4446  ;;  %4454 = vpow2.f32 %v1942_v10 }
 0x405   : > { %1968 = vadd.xlane.f32.xlu0 %v5803_v54  ;;  %1966 = vadd.xlane.f32.xlu1 %v5801_v49  ;;  %4456 = vpow2.f32 %v1946_v58 }
 0x406   : > { %v5807_v21 = vpop.eup %4448 }
 0x408   : > { %v5809_v16 = vpop.eup %4450 }
 0x409   : > { %1972 = vadd.xlane.f32.xlu0 %v5809_v16  ;;  %1970 = vadd.xlane.f32.xlu1 %v5807_v21 }
 0x40c   : > { %v5813_v61 = vpop.eup %4452 }
 0x40d   : > { %1976 = vadd.xlane.f32.xlu0 %v5813_v61 }
 0x40e   : > { %v5816_v50 = vpop.eup %4454 }
 0x40f   : > { %1974 = vadd.xlane.f32.xlu1 %v5816_v50  ;;  %v5819_v29 = vpop.eup %4456 }
 0x413   : > { %1978 = vadd.xlane.f32.xlu1 %v5819_v29 }
 0x45e   : > { %v1483_v26 = vpop.xlane.xlu0 %1482 }
 0x45f   : > { %4458 = vrcp.f32 %v1483_v26 }
 0x462   : > { %v1487_v51 = vpop.xlane.xlu0 %1486  ;;  %v1485_v28 = vpop.xlane.xlu1 %1484 }
 0x463   : > { %4460 = vrcp.f32 %v1485_v28 }
 0x464   : > { %4462 = vrcp.f32 %v1487_v51 }
 0x466   : > { %v1491_v60 = vpop.xlane.xlu0 %1490  ;;  %v1489_v53 = vpop.xlane.xlu1 %1488 }
 0x467   : > { %4464 = vrcp.f32 %v1489_v53 }
 0x468   : > { %4466 = vrcp.f32 %v1491_v60 }
 0x469   : > { %v4459_v55 = vpop.eup %4458 }
 0x46a   : > { %v1495_v42 = vpop.xlane.xlu0 %1494  ;;  %v1493_v1 = vpop.xlane.xlu1 %1492  ;;  %v5823_v44 = vmul.f32 %v4459_v55, %v5701_v34 }
 0x46b   : > { %4468 = vrcp.f32 %v1493_v1 }
 0x46c   : > { %4470 = vrcp.f32 %v1495_v42 }
 0x46d   : > { %v4461_v41 = vpop.eup %4460 }
 0x46e   : > { %v1499_v9 = vpop.xlane.xlu0 %1498  ;;  %v1497_v56 = vpop.xlane.xlu1 %1496  ;;  %v5826_v11 = vmul.f32 %v4461_v41, %v5708_v62 }
 0x46f   : > { %v4463_v15 = vpop.eup %4462  ;;  %4472 = vrcp.f32 %v1497_v56 }
 0x470   : > { %v1610_v30 = vpack.c.bf16 %v5826_v11, %v5823_v44  ;;  %4474 = vrcp.f32 %v1499_v9  ;;  %v5831_v19 = vmul.f32 %v4463_v15, %v5706_v38 }
 0x471   : > { %v4465_v18 = vpop.eup %4464 }
 0x472   : > { %v1503_v8 = vpop.xlane.xlu0 %1502  ;;  %v1501_v25 = vpop.xlane.xlu1 %1500  ;;  %v5834_v48 = vmul.f32 %v4465_v18, %v5714_v4  ;;  %4030 = vmatprep.mubr.bf16.mxu1 %v1610_v30 }
 0x473   : > { %v4467_v34 = vpop.eup %4466  ;;  %4476 = vrcp.f32 %v1501_v25 }
 0x474   : > { %v1611_v62 = vpack.c.bf16 %v5834_v48, %v5831_v19  ;;  %4478 = vrcp.f32 %v1503_v8  ;;  %v5839_v26 = vmul.f32 %v4467_v34, %v5716_v5 }
 0x475   : > { %v4469_v17 = vpop.eup %4468 }
 0x476   : > { %v1507_v10 = vpop.xlane.xlu0 %1506  ;;  %v1505_v58 = vpop.xlane.xlu1 %1504  ;;  %4031 = vmatmul.mubr.bf16.vlgmr.msra.gmra.mrb[64].mxu1 %v1611_v62  ;;  %v5842_v38 = vmul.f32 %v4469_v17, %v5722_v31 }
 0x477   : > { %v4471_v51 = vpop.eup %4470  ;;  %4079 = vmatpush3.bf16.msra.mxu1 %v5536_v6  ;;  %4480 = vrcp.f32 %v1505_v58 }
 0x478   : > { %4080 = vmatprep.subr.bf16.mxu1 %v5550_v23  ;;  %v1612_v4 = vpack.c.bf16 %v5842_v38, %v5839_v26  ;;  %4482 = vrcp.f32 %v1507_v10  ;;  %v5849_v5 = vmul.f32 %v4471_v51, %v5724_v33 }
 0x479   : > { %v4473_v28 = vpop.eup %4472 }
 0x47a   : > { %v1511_v60 = vpop.xlane.xlu0 %1510  ;;  %v1509_v53 = vpop.xlane.xlu1 %1508  ;;  %4034 = vmatprep.mubr.bf16.mxu1 %v1612_v4  ;;  %v5852_v31 = vmul.f32 %v4473_v28, %v5730_v57 }
 0x47b   : > { %v4475_v42 = vpop.eup %4474  ;;  %4081 = vmatpush3.bf16.msra.mxu1 %v5550_v23  ;;  %4484 = vrcp.f32 %v1509_v53  ;;  %v1563_v53 = vmul.f32 0.5, %v5826_v11 }
 0x47c   : > { %4082 = vmatprep.subr.bf16.mxu1 %v5564_v35  ;;  %v1613_v6 = vpack.c.bf16 %v5852_v31, %v5849_v5  ;;  %4486 = vrcp.f32 %v1511_v60  ;;  %v5859_v33 = vmul.f32 %v4475_v42, %v5732_v24 }
 0x47d   : > { %v4477_v1 = vpop.eup %4476 }
 0x47e   : > { %v1949_v55 = vpop.xlane.xlu0 %1948  ;;  %v1513_v41 = vpop.xlane.xlu1 %1512  ;;  %4035 = vmatmul.mubr.bf16.gmra.mrb[68].mxu1 %v1613_v6  ;;  %v5862_v57 = vmul.f32 %v4477_v1, %v5738_v36 }
 0x47f   : > { %4488 = vrcp.f32 %v1949_v55  ;;  %v4479_v9 = vpop.eup %4478  ;;  %4083 = vmatpush3.bf16.msra.mxu1 %v5564_v35 }
 0x480   : > { %4490 = vrcp.f32 %v1513_v41  ;;  %4084 = vmatprep.subr.bf16.mxu1 %v5578_v20  ;;  %v1614_v23 = vpack.c.bf16 %v5862_v57, %v5859_v33  ;;  %v5869_v24 = vmul.f32 %v4479_v9, %v5740_v37 }
 0x481   : > { %v4481_v56 = vpop.eup %4480 }
 0x482   : > { %v1953_v15 = vpop.xlane.xlu0 %1952  ;;  %v1951_v30 = vpop.xlane.xlu1 %1950  ;;  %4038 = vmatprep.mubr.bf16.mxu1 %v1614_v23  ;;  %v5872_v36 = vmul.f32 %v4481_v56, %v5746_v63 }
 0x483   : > { %4492 = vrcp.f32 %v1953_v15  ;;  %v4483_v18 = vpop.eup %4482  ;;  %4085 = vmatpush3.bf16.msra.mxu1 %v5578_v20  ;;  %v1562_v20 = vmul.f32 0.5, %v5823_v44 }
 0x484   : > { %4494 = vrcp.f32 %v1951_v30  ;;  %4086 = vmatprep.subr.bf16.mxu1 %v5586_v32  ;;  %v1615_v35 = vpack.c.bf16 %v5872_v36, %v5869_v24  ;;  %v5879_v37 = vmul.f32 %v4483_v18, %v5748_v2  ;;  %v1568_v18 = vmul.f32 0.5, %v5849_v5 }
 0x485   : > { %v4485_v8 = vpop.eup %4484 }
 0x486   : > { %v1957_v25 = vpop.xlane.xlu0 %1956  ;;  %v1955_v34 = vpop.xlane.xlu1 %1954  ;;  %4039 = vmatmul.mubr.bf16.gmra.mrb[72].mxu1 %v1615_v35  ;;  %v5882_v63 = vmul.f32 %v4485_v8, %v5754_v13  ;;  %v1567_v8 = vmul.f32 0.5, %v5842_v38 }
 0x487   : > { %4496 = vrcp.f32 %v1957_v25  ;;  %v4487_v62 = vpop.eup %4486  ;;  %4087 = vmatpush3.bf16.msra.mxu1 %v5586_v32  ;;  %v1564_v32 = vmul.f32 0.5, %v5831_v19  ;;  %v1566_v19 = vmul.f32 0.5, %v5839_v26 }
 0x488   : > { %4498 = vrcp.f32 %v1955_v34  ;;  %4088 = vmatprep.subr.bf16.mxu1 %v5588_v40  ;;  %v1616_v10 = vpack.c.bf16 %v5882_v63, %v5879_v37  ;;  %v5891_v13 = vmul.f32 %v4487_v62, %v5756_v14 }
 0x489   : > { %v4489_v17 = vpop.eup %4488 }
 0x48a   : > { %v4491_v58 = vpop.eup %4490  ;;  %v1961_v51 = vpop.xlane.xlu0 %1960  ;;  %v1996_v2 = vmul.f32 %v4489_v17, %v5764_v22  ;;  %4042 = vmatprep.mubr.bf16.mxu1 %v1616_v10  ;;  %v1570_v10 = vmul.f32 0.5, %v5859_v33 }
 0x48b   : > { %v1959_v4 = vpop.xlane.xlu1 %1958  ;;  %4500 = vrcp.f32 %v1961_v51  ;;  %v5894_v44 = vmul.f32 %v4491_v58, %v5762_v12  ;;  %4089 = vmatpush3.bf16.msra.mxu1 %v5588_v40  ;;  %v1569_v51 = vmul.f32 0.5, %v5852_v31 }
 0x48c   : > { %4502 = vrcp.f32 %v1959_v4  ;;  %v2028_v28 = vmul.f32 0.5, %v1996_v2  ;;  %4090 = vmatprep.subr.bf16.mxu1 %v5590_v46 }
 0x48d   : > { %v4493_v60 = vpop.eup %4492  ;;  %v1617_v22 = vpack.c.bf16 %v5894_v44, %v5891_v13 }
 0x48e   : > { %v4495_v14 = vpop.eup %4494  ;;  %v1998_v42 = vmul.f32 %v4493_v60, %v5772_v39  ;;  %v1965_v12 = vpop.xlane.xlu0 %1964  ;;  %v2044_v1 = vadd.f32 %v2028_v28, %v1562_v20  ;;  %v1565_v39 = vmul.f32 0.5, %v5834_v48 }
 0x48f   : > { %v1963_v6 = vpop.xlane.xlu1 %1962  ;;  %4504 = vrcp.f32 %v1965_v12  ;;  %4043 = vmatmul.mubr.bf16.gmra.mrb[76].mxu1 %v1617_v22  ;;  %v1997_v40 = vmul.f32 %v4495_v14, %v5770_v59  ;;  %v1572_v22 = vmul.f32 0.5, %v5869_v24 }
 0x490   : > { %v2030_v55 = vmul.f32 0.5, %v1998_v42  ;;  %4091 = vmatpush3.bf16.msra.mxu1 %v5590_v46  ;;  %4506 = vrcp.f32 %v1963_v6  ;;  %2060 = vst [vmem:[%s5907_s20] sm:$0xff] %v2044_v1 }
 0x491   : > { %v4497_v11 = vpop.eup %4496  ;;  %4092 = vmatprep.subr.bf16.mxu1 %v5592_v52  ;;  %v2029_v41 = vmul.f32 0.5, %v1997_v40  ;;  %v2076_v9 = vpack.c.bf16 %v1997_v40, %v1996_v2 }
 0x492   : > { %v4499_v23 = vpop.eup %4498  ;;  %v2046_v59 = vadd.f32 %v2030_v55, %v1564_v32  ;;  %v1969_v26 = vpop.xlane.xlu0 %1968  ;;  %v2000_v46 = vmul.f32 %v4497_v11, %v5780_v43 }
 0x493   : > { %v1967_v56 = vpop.xlane.xlu1 %1966  ;;  %v1999_v15 = vmul.f32 %v4499_v23, %v5778_v7  ;;  %4508 = vrcp.f32 %v1969_v26  ;;  %v2045_v30 = vadd.f32 %v2029_v41, %v1563_v53  ;;  %4094 = vmatprep.mubr.bf16.mxu1 %v2076_v9  ;;  %v1571_v53 = vmul.f32 0.5, %v5862_v57 }
 0x494   : > { %2062 = vst [vmem:[%s5907_s20 + $0x10] sm:$0xff] %v2046_v59  ;;  %4093 = vmatpush3.bf16.msra.mxu1 %v5592_v52  ;;  %4510 = vrcp.f32 %v1967_v56  ;;  %v2032_v48 = vmul.f32 0.5, %v2000_v46  ;;  %v1574_v57 = vmul.f32 0.5, %v5879_v37  ;;  %v1576_v37 = vmul.f32 0.5, %v5891_v13 }
 0x495   : > { %v4501_v35 = vpop.eup %4500  ;;  %v2031_v25 = vmul.f32 0.5, %v1999_v15  ;;  %2061 = vst [vmem:[%s5907_s20 + $0x8] sm:$0xff] %v2045_v30  ;;  %v2077_v34 = vpack.c.bf16 %v1999_v15, %v1998_v42 }
 0x496   : > { %v4503_v43 = vpop.eup %4502  ;;  %v1973_v7 = vpop.xlane.xlu0 %1972  ;;  %v2048_v20 = vadd.f32 %v2032_v48, %v1566_v19  ;;  %v2002_v17 = vmul.f32 %v4501_v35, %v5788_v45 }
 0x497   : > { %v1971_v62 = vpop.xlane.xlu1 %1970  ;;  %v2047_v5 = vadd.f32 %v2031_v25, %v1565_v39  ;;  %4512 = vrcp.f32 %v1973_v7  ;;  %4095 = vmatmul.mubr.bf16.vlgmr.msra.gmra.mrb[80].mxu1 %v2077_v34  ;;  %v2001_v52 = vmul.f32 %v4503_v43, %v5786_v3  ;;  %v1573_v39 = vmul.f32 0.5, %v5872_v36 }
 0x498   : > { %4514 = vrcp.f32 %v1971_v62  ;;  %2064 = vst [vmem:[%s5907_s20 + $0x20] sm:$0xff] %v2048_v20  ;;  %v2034_v38 = vmul.f32 0.5, %v2002_v17 }
 0x499   : > { %v4505_v58 = vpop.eup %4504  ;;  %2063 = vst [vmem:[%s5907_s20 + $0x18] sm:$0xff] %v2047_v5  ;;  %v2033_v4 = vmul.f32 0.5, %v2001_v52  ;;  %v2078_v2 = vpack.c.bf16 %v2001_v52, %v2000_v46  ;;  %v1575_v46 = vmul.f32 0.5, %v5882_v63  ;;  %v4340_v5 = vld [vmem:[#allocation14 + $0x48] sm:$0xff]  }
 0x49a   : > { %v4507_v32 = vpop.eup %4506  ;;  %v1977_v45 = vpop.xlane.xlu0 %1976  ;;  %v2050_v28 = vadd.f32 %v2034_v38, %v1568_v18  ;;  %v2004_v60 = vmul.f32 %v4505_v58, %v5795_v27  ;;  %v4341_v52 = vld [vmem:[#allocation14 + $0x8] sm:$0xff]   ;;  %v4344_v38 = vld [vmem:[#allocation14 + $0x58] sm:$0xff]  }
 0x49b   : > { %4516 = vrcp.f32 %v1977_v45  ;;  %v2049_v3 = vadd.f32 %v2033_v4, %v1567_v8  ;;  %4098 = vmatprep.mubr.bf16.mxu1 %v2078_v2  ;;  %v2003_v33 = vmul.f32 %v4507_v32, %v5793_v47  ;;  %v1577_v8 = vmul.f32 0.5, %v5894_v44  ;;  %v4339_v44 = vld [vmem:[#allocation14] sm:$0xff]   ;;  %v4345_v58 = vld [vmem:[#allocation14 + $0x18] sm:$0xff]   ;;  %v4348_v2 = vld [vmem:[#allocation14 + $0x68] sm:$0xff]  }
 0x49c   : > { %v1975_v14 = vpop.xlane.xlu1 %1974  ;;  %2066 = vst [vmem:[%s5907_s20 + $0x30] sm:$0xff] %v2050_v28  ;;  %v2036_v31 = vmul.f32 0.5, %v2004_v60  ;;  %v4347_v4 = vld [vmem:[#allocation14 + $0x20] sm:$0xff]   ;;  %v4349_v32 = vld [vmem:[#allocation14 + $0x28] sm:$0xff]   ;;  %v4350_v45 = vld [vmem:[#allocation14 + $0x70] sm:$0xff]  }
 0x49d   : > { %v4509_v42 = vpop.eup %4508  ;;  %2065 = vst [vmem:[%s5907_s20 + $0x28] sm:$0xff] %v2049_v3  ;;  %4518 = vrcp.f32 %v1975_v14  ;;  %v2035_v12 = vmul.f32 0.5, %v2003_v33  ;;  %v2079_v6 = vpack.c.bf16 %v2003_v33, %v2002_v17  ;;  %v4351_v28 = vld [vmem:[#allocation14 + $0x30] sm:$0xff]   ;;  %v4353_v3 = vld [vmem:[#allocation14 + $0x38] sm:$0xff]  }
 0x49e   : > { %v4511_v27 = vpop.eup %4510  ;;  %v2052_v1 = vadd.f32 %v2036_v31, %v1570_v10  ;;  %v2006_v40 = vmul.f32 %v4509_v42, %v5803_v54  ;;  %v4342_v10 = vld [vmem:[#allocation14 + $0x50] sm:$0xff]  }
 0x49f   : > { %v2051_v19 = vadd.f32 %v2035_v12, %v1569_v51  ;;  %4099 = vmatmul.mubr.bf16.gmra.mrb[84].mxu1 %v2079_v6  ;;  %v2005_v47 = vmul.f32 %v4511_v27, %v5801_v49  ;;  %v4346_v51 = vld [vmem:[#allocation14 + $0x60] sm:$0xff]  }
 0x4a0   : > { %v1979_v24 = vpop.xlane.xlu1 %1978  ;;  %2068 = vst [vmem:[%s5907_s20 + $0x40] sm:$0xff] %v2052_v1  ;;  %v2038_v55 = vmul.f32 0.5, %v2006_v40 }
 0x4a1   : > { %v4513_v11 = vpop.eup %4512  ;;  %2067 = vst [vmem:[%s5907_s20 + $0x38] sm:$0xff] %v2051_v19  ;;  %4520 = vrcp.f32 %v1979_v24  ;;  %v2037_v41 = vmul.f32 0.5, %v2005_v47  ;;  %v2080_v9 = vpack.c.bf16 %v2005_v47, %v2004_v60  ;;  %v4352_v60 = vld [vmem:[#allocation14 + $0x78] sm:$0xff]  }
 0x4a2   : > { %v4515_v23 = vpop.eup %4514  ;;  %v2054_v54 = vadd.f32 %v2038_v55, %v1572_v22  ;;  %v2008_v59 = vmul.f32 %v4513_v11, %v5809_v16 }
 0x4a3   : > { %v2053_v26 = vadd.f32 %v2037_v41, %v1571_v53  ;;  %4102 = vmatprep.mubr.bf16.mxu1 %v2080_v9  ;;  %v2007_v49 = vmul.f32 %v4515_v23, %v5807_v21 }
 0x4a4   : > { %2070 = vst [vmem:[%s5907_s20 + $0x50] sm:$0xff] %v2054_v54  ;;  %v2040_v56 = vmul.f32 0.5, %v2008_v59 }
 0x4a5   : > { %v4517_v36 = vpop.eup %4516  ;;  %2069 = vst [vmem:[%s5907_s20 + $0x48] sm:$0xff] %v2053_v26  ;;  %v2039_v15 = vmul.f32 0.5, %v2007_v49  ;;  %v2081_v30 = vpack.c.bf16 %v2007_v49, %v2006_v40 }
 0x4a6   : > { %v2056_v18 = vadd.f32 %v2040_v56, %v1574_v57  ;;  %v2010_v48 = vmul.f32 %v4517_v36, %v5813_v61 }
 0x4a7   : > { %v4519_v16 = vpop.eup %4518  ;;  %v2055_v35 = vadd.f32 %v2039_v15, %v1573_v39  ;;  %4103 = vmatmul.mubr.bf16.gmra.mrb[88].mxu1 %v2081_v30 }
 0x4a8   : > { %v2009_v21 = vmul.f32 %v4519_v16, %v5816_v50  ;;  %2072 = vst [vmem:[%s5907_s20 + $0x60] sm:$0xff] %v2056_v18  ;;  %v2042_v13 = vmul.f32 0.5, %v2010_v48  ;;  %v4338_v50 = vld [vmem:[#allocation14 + $0x40] sm:$0xff]  }
 0x4a9   : > { %2071 = vst [vmem:[%s5907_s20 + $0x58] sm:$0xff] %v2055_v35  ;;  %3854 = vmatprep.subr.bf16.mxu0 %v4338_v50 }
 0x4aa   : > { %v2041_v63 = vmul.f32 0.5, %v2009_v21  ;;  %v2082_v25 = vpack.c.bf16 %v2009_v21, %v2008_v59  ;;  %v2058_v34 = vadd.f32 %v2042_v13, %v1576_v37  ;;  %3855 = vmatpush3.bf16.msra.mxu0 %v4339_v44 }
 0x4ab   : > { %v4521_v43 = vpop.eup %4520  ;;  %3856 = vmatprep.subr.bf16.mxu0 %v4340_v5  ;;  %v5953_v5 = vld [vmem:[#allocation18] ss:$0 sm:$0xff] }
 0x4ac   : > { %v2057_v7 = vadd.f32 %v2041_v63, %v1575_v46  ;;  %4106 = vmatprep.mubr.bf16.mxu1 %v2082_v25  ;;  %v2011_v61 = vmul.f32 %v4521_v43, %v5819_v29  ;;  %2074 = vst [vmem:[%s5907_s20 + $0x70] sm:$0xff] %v2058_v34  ;;  %v4343_v29 = vld [vmem:[#allocation14 + $0x10] sm:$0xff]  }
 0x4ae   : > { %2073 = vst [vmem:[%s5907_s20 + $0x68] sm:$0xff] %v2057_v7  ;;  %v2043_v62 = vmul.f32 0.5, %v2011_v61  ;;  %v2083_v20 = vpack.c.bf16 %v2011_v61, %v2010_v48  ;;  %3857 = vmatpush3.bf16.msra.mxu0 %v4341_v52 }
 0x4af   : > { %3858 = vmatprep.subr.bf16.mxu0 %v4342_v10 }
 0x4b0   : > { %v2059_v17 = vadd.f32 %v2043_v62, %v1577_v8  ;;  %4107 = vmatmul.mubr.bf16.gmra.mrb[92].mxu1 %v2083_v20 }
 0x4b1   : > { %2829 = vmatprep.mubr.bf16.mxu1 %v4985_v0 }
 0x4b2   : > { %2075 = vst [vmem:[%s5907_s20 + $0x78] sm:$0xff] %v2059_v17  ;;  %3859 = vmatpush3.bf16.msra.mxu0 %v4343_v29 }
 0x4b3   : > { %3860 = vmatprep.subr.bf16.mxu0 %v4344_v38 }
 0x4b6   : > { %3861 = vmatpush3.bf16.msra.mxu0 %v4345_v58 }
 0x4b7   : > { %3862 = vmatprep.subr.bf16.mxu0 %v4346_v51 }
 0x4ba   : > { %3863 = vmatpush3.bf16.msra.mxu0 %v4347_v4 }
 0x4bb   : > { %3864 = vmatprep.subr.bf16.mxu0 %v4348_v2  ;;  %v4586_v2 = vld [vmem:[%s5365_s17] sm:$0xff] }
 0x4be   : > { %3865 = vmatpush3.bf16.msra.mxu0 %v4349_v32 }
 0x4bf   : > { %3866 = vmatprep.subr.bf16.mxu0 %v4350_v45 }
 0x4c2   : > { %3867 = vmatpush3.bf16.msra.mxu0 %v4351_v28  ;;  %v4587_v28 = vld [vmem:[%s5365_s17 + $0x8] sm:$0xff] }
 0x4c3   : > { %3868 = vmatprep.subr.bf16.mxu0 %v4352_v60 }
 0x4c6   : > { %3869 = vmatpush3.bf16.msra.mxu0 %v4353_v3 }
 0x549   : > { %v4032_v33 = vpop.f32.mrb[64].mxu1 }
 0x54a   : > { %v1652_v53 = vpop.f32.mrb[65].mxu1 }
 0x54b   : > { %v4033_v22 = vpop.f32.mrb[66].mxu1 }
 0x54c   : > { %v1716_v14 = vpack.c.bf16 %v4033_v22, %v4032_v33  ;;  %v1655_v31 = vpop.f32.mrb[67].mxu1 }
 0x54d   : > { %v1715_v42 = vpack.c.bf16 %v1655_v31, %v1652_v53 }
 0x551   : > { %v4036_v12 = vpop.f32.mrb[68].mxu1 }
 0x552   : > { %v1668_v6 = vpop.f32.mrb[69].mxu1 }
 0x553   : > { %v4037_v27 = vpop.f32.mrb[70].mxu1 }
 0x554   : > { %v1718_v1 = vpack.c.bf16 %v4037_v27, %v4036_v12  ;;  %v1671_v40 = vpop.f32.mrb[71].mxu1  ;;  %v4588_v12 = vld [vmem:[%s5365_s17 + $0x10] sm:$0xff] }
 0x555   : > { %v1717_v19 = vpack.c.bf16 %v1671_v40, %v1668_v6 }
 0x559   : > { %v4040_v47 = vpop.f32.mrb[72].mxu1 }
 0x55a   : > { %v1684_v57 = vpop.f32.mrb[73].mxu1 }
 0x55b   : > { %v4041_v24 = vpop.f32.mrb[74].mxu1 }
 0x55c   : > { %v1720_v55 = vpack.c.bf16 %v4041_v24, %v4040_v47  ;;  %v1687_v11 = vpop.f32.mrb[75].mxu1 }
 0x55d   : > { %v1719_v39 = vpack.c.bf16 %v1687_v11, %v1684_v57 }
 0x562   : > { %v4044_v41 = vpop.f32.mrb[76].mxu1 }
 0x563   : > { %v1700_v9 = vpop.f32.mrb[77].mxu1 }
 0x564   : > { %v4045_v23 = vpop.f32.mrb[78].mxu1 }
 0x565   : > { %v1722_v54 = vpack.c.bf16 %v4045_v23, %v4044_v41  ;;  %v1703_v59 = vpop.f32.mrb[79].mxu1  ;;  %v4590_v41 = vld [vmem:[%s5365_s17 + $0x20] sm:$0xff] }
 0x566   : > { %v1721_v26 = vpack.c.bf16 %v1703_v59, %v1700_v9 }
 0x56a   : > { %v4096_v49 = vpop.f32.mrb[80].mxu1 }
 0x56b   : > { %v2118_v37 = vpop.f32.mrb[81].mxu1 }
 0x56c   : > { %v4097_v56 = vpop.f32.mrb[82].mxu1 }
 0x56d   : > { %v2182_v36 = vpack.c.bf16 %v4097_v56, %v4096_v49  ;;  %v2121_v46 = vpop.f32.mrb[83].mxu1 }
 0x56e   : > { %v2181_v15 = vpack.c.bf16 %v2121_v46, %v2118_v37 }
 0x570   : > { %2383 = vmatprep.mubr.bf16.mxu0 %v2181_v15 }
 0x571   : > { %2384 = vmatmul.mubr.bf16.vlgmr.msra.gmra.mrb[64].mxu0 %v1715_v42 }
 0x572   : > { %v4100_v30 = vpop.f32.mrb[84].mxu1  ;;  %2391 = vmatprep.mubr.bf16.mxu0 %v2182_v36 }
 0x573   : > { %v2134_v18 = vpop.f32.mrb[85].mxu1 }
 0x574   : > { %v4101_v48 = vpop.f32.mrb[86].mxu1 }
 0x575   : > { %v2184_v16 = vpack.c.bf16 %v4101_v48, %v4100_v30  ;;  %v2137_v35 = vpop.f32.mrb[87].mxu1  ;;  %v4592_v30 = vld [vmem:[%s5365_s17 + $0x30] sm:$0xff] }
 0x576   : > { %v2183_v21 = vpack.c.bf16 %v2137_v35, %v2134_v18 }
 0x579   : > { %2392 = vmatmul.mubr.bf16.gmra.mrb[68].mxu0 %v1716_v14 }
 0x57a   : > { %v4104_v13 = vpop.f32.mrb[88].mxu1  ;;  %2399 = vmatprep.mubr.bf16.mxu0 %v2183_v21 }
 0x57b   : > { %v2150_v8 = vpop.f32.mrb[89].mxu1 }
 0x57c   : > { %v4105_v63 = vpop.f32.mrb[90].mxu1 }
 0x57d   : > { %v2186_v25 = vpack.c.bf16 %v4105_v63, %v4104_v13  ;;  %v2153_v34 = vpop.f32.mrb[91].mxu1 }
 0x57e   : > { %v2185_v43 = vpack.c.bf16 %v2153_v34, %v2150_v8 }
 0x581   : > { %2400 = vmatmul.mubr.bf16.gmra.mrb[72].mxu0 %v1717_v19 }
 0x582   : > { %2407 = vmatprep.mubr.bf16.mxu0 %v2184_v16  ;;  %v4593_v16 = vld [vmem:[%s5365_s17 + $0x38] sm:$0xff] }
 0x583   : > { %v4108_v7 = vpop.f32.mrb[92].mxu1 }
 0x584   : > { %v2166_v61 = vpop.f32.mrb[93].mxu1 }
 0x585   : > { %v4109_v62 = vpop.f32.mrb[94].mxu1 }
 0x586   : > { %v2188_v20 = vpack.c.bf16 %v4109_v62, %v4108_v7  ;;  %v2169_v17 = vpop.f32.mrb[95].mxu1  ;;  %v4594_v7 = vld [vmem:[%s5365_s17 + $0x40] sm:$0xff] }
 0x587   : > { %v2187_v50 = vpack.c.bf16 %v2169_v17, %v2166_v61 }
 0x589   : > { %2408 = vmatmul.mubr.bf16.gmra.mrb[76].mxu0 %v1718_v1  ;;  %v4589_v1 = vld [vmem:[%s5365_s17 + $0x18] sm:$0xff] }
 0x58a   : > { %2415 = vmatprep.mubr.bf16.mxu0 %v2185_v43 }
 0x591   : > { %2416 = vmatmul.mubr.bf16.gmra.mrb[80].mxu0 %v1719_v39 }
 0x592   : > { %2423 = vmatprep.mubr.bf16.mxu0 %v2186_v25 }
 0x599   : > { %2424 = vmatmul.mubr.bf16.gmra.mrb[84].mxu0 %v1720_v55 }
 0x59a   : > { %2431 = vmatprep.mubr.bf16.mxu0 %v2187_v50 }
 0x5a1   : > { %2432 = vmatmul.mubr.bf16.gmra.mrb[88].mxu0 %v1721_v26 }
 0x5a2   : > { %2439 = vmatprep.mubr.bf16.mxu0 %v2188_v20  ;;  %v4595_v20 = vld [vmem:[%s5365_s17 + $0x48] sm:$0xff] }
 0x5a9   : > { %2440 = vmatmul.mubr.bf16.gmra.mrb[92].mxu0 %v1722_v54  ;;  %v4591_v54 = vld [vmem:[%s5365_s17 + $0x28] sm:$0xff] }
 0x644   : > { %v3870_v44 = vpop.f32.mrb[64].mxu0 }
 0x645   : > { %v3871_v52 = vpop.f32.mrb[65].mxu0 }
 0x646   : > { %v3872_v10 = vadd.f32 %v3871_v52, %v3870_v44  ;;  %v3873_v29 = vpop.f32.mrb[66].mxu0 }
 0x647   : > { %v3874_v38 = vpop.f32.mrb[67].mxu0 }
 0x648   : > { %v2386_v58 = vadd.f32 %v3872_v10, %v5953_v5  ;;  %v3875_v51 = vadd.f32 %v3874_v38, %v3873_v29 }
 0x64a   : > { %v2389_v4 = vadd.f32 %v3875_v51, %v5953_v5  ;;  %v5958_v32 = vadd.f32 %v4586_v2, %v2386_v58  ;;  %v4596_v51 = vld [vmem:[%s5365_s17 + $0x50] sm:$0xff] }
 0x64c   : > { %v3876_v45 = vpop.f32.mrb[68].mxu0  ;;  %2464 = vadd.xlane.f32.xlu0 %v5958_v32  ;;  %v5962_v60 = vadd.f32 %v4587_v28, %v2389_v4 }
 0x64d   : > { %v3877_v3 = vpop.f32.mrb[69].mxu0 }
 0x64e   : > { %v3878_v33 = vadd.f32 %v3877_v3, %v3876_v45  ;;  %v3879_v53 = vpop.f32.mrb[70].mxu0  ;;  %2466 = vadd.xlane.f32.xlu1 %v5962_v60  ;;  %v4597_v45 = vld [vmem:[%s5365_s17 + $0x58] sm:$0xff] }
 0x64f   : > { %v3880_v22 = vpop.f32.mrb[71].mxu0 }
 0x650   : > { %v2394_v14 = vadd.f32 %v3878_v33, %v5953_v5  ;;  %v3881_v31 = vadd.f32 %v3880_v22, %v3879_v53 }
 0x652   : > { %v2397_v42 = vadd.f32 %v3881_v31, %v5953_v5  ;;  %v5968_v6 = vadd.f32 %v4588_v12, %v2394_v14  ;;  %v4598_v12 = vld [vmem:[%s5365_s17 + $0x60] sm:$0xff] }
 0x654   : > { %2468 = vadd.xlane.f32.xlu0 %v5968_v6  ;;  %v3882_v27 = vpop.f32.mrb[72].mxu0  ;;  %v5972_v40 = vadd.f32 %v4589_v1, %v2397_v42 }
 0x655   : > { %v3883_v19 = vpop.f32.mrb[73].mxu0 }
 0x656   : > { %v3884_v47 = vadd.f32 %v3883_v19, %v3882_v27  ;;  %2470 = vadd.xlane.f32.xlu1 %v5972_v40  ;;  %v3885_v57 = vpop.f32.mrb[74].mxu0  ;;  %v4599_v19 = vld [vmem:[%s5365_s17 + $0x68] sm:$0xff] }
 0x657   : > { %v3886_v24 = vpop.f32.mrb[75].mxu0 }
 0x658   : > { %v2402_v55 = vadd.f32 %v3884_v47, %v5953_v5  ;;  %v3887_v11 = vadd.f32 %v3886_v24, %v3885_v57 }
 0x65a   : > { %v2405_v39 = vadd.f32 %v3887_v11, %v5953_v5  ;;  %v5978_v9 = vadd.f32 %v4590_v41, %v2402_v55 }
 0x65c   : > { %v3888_v23 = vpop.f32.mrb[76].mxu0  ;;  %2472 = vadd.xlane.f32.xlu0 %v5978_v9  ;;  %v5982_v59 = vadd.f32 %v4591_v54, %v2405_v39  ;;  %v4600_v54 = vld [vmem:[%s5365_s17 + $0x70] sm:$0xff] }
 0x65d   : > { %v3889_v26 = vpop.f32.mrb[77].mxu0 }
 0x65e   : > { %v3890_v49 = vadd.f32 %v3889_v26, %v3888_v23  ;;  %v3891_v37 = vpop.f32.mrb[78].mxu0  ;;  %2474 = vadd.xlane.f32.xlu1 %v5982_v59 }
 0x65f   : > { %v3892_v56 = vpop.f32.mrb[79].mxu0 }
 0x660   : > { %v2410_v36 = vadd.f32 %v3890_v49, %v5953_v5  ;;  %v3893_v46 = vadd.f32 %v3892_v56, %v3891_v37  ;;  %v4601_v49 = vld [vmem:[%s5365_s17 + $0x78] sm:$0xff]  ;;  %v4354_v56 = vld [vmem:[#allocation15] ss:$8 sps:$4 sm:$0xff]   ;;  %s4862_s17 = scalar_lea.vmem %s4861_s9, 4096 }
 0x661   : > { %p4864_p8 = scmp.lt.s32.totalorder %s4862_s17, %s4856_s18 }
 0x662   : > { %v2413_v15 = vadd.f32 %v3893_v46, %v5953_v5  ;;  %v5988_v18 = vadd.f32 %v4592_v30, %v2410_v36  ;;  %v4356_v36 = vld [vmem:[#allocation15 + $0x4] ss:$8 sps:$4 sm:$0xff]   ;;  %v4359_v46 = vld [vmem:[#allocation15 + $0x14] ss:$8 sps:$4 sm:$0xff]  }
 0x663   : > { %2797 = vmatprep.subr.bf16.mxu1 %v4356_v36  ;;  %p4865_p4 = por %p4864_p8, %p4863_p2 }
 0x664   : > { %2476 = vadd.xlane.f32.xlu0 %v5988_v18  ;;  %v3894_v48 = vpop.f32.mrb[80].mxu0  ;;  %v5992_v35 = vadd.f32 %v4593_v16, %v2413_v15  ;;  %2798 = vmatpush1.bf16.msra.mxu1 %v4354_v56  ;;  %v4357_v15 = vld [vmem:[#allocation15 + $0x10] ss:$8 sps:$4 sm:$0xff]   ;;  %v4377_v56 = vld [vmem:[#allocation15 + $0x74] ss:$8 sps:$4 sm:$0xff]  }
 0x665   : > { %v3895_v21 = vpop.f32.mrb[81].mxu0  ;;  %2799 = vmatprep.subr.bf16.mxu1 %v4359_v46  ;;  %v4375_v46 = vld [vmem:[#allocation15 + $0x70] ss:$8 sps:$4 sm:$0xff]   ;;  %p4866_p10 = pnand %p4865_p4, %p4859_p3 }
 0x666   : > { %v3896_v13 = vadd.f32 %v3895_v21, %v3894_v48  ;;  %2478 = vadd.xlane.f32.xlu1 %v5992_v35  ;;  %v3897_v8 = vpop.f32.mrb[82].mxu0 }
 0x667   : > { %v3898_v63 = vpop.f32.mrb[83].mxu0 }
 0x668   : > { %v2418_v25 = vadd.f32 %v3896_v13, %v5953_v5  ;;  %v3899_v34 = vadd.f32 %v3898_v63, %v3897_v8  ;;  %2800 = vmatpush1.bf16.msra.mxu1 %v4357_v15 }
 0x66a   : > { %v2421_v43 = vadd.f32 %v3899_v34, %v5953_v5  ;;  %v5998_v61 = vadd.f32 %v4594_v7, %v2418_v25 }
 0x66c   : > { %v3900_v62 = vpop.f32.mrb[84].mxu0  ;;  %2480 = vadd.xlane.f32.xlu0 %v5998_v61  ;;  %v6002_v17 = vadd.f32 %v4595_v20, %v2421_v43 }
 0x66d   : > { %v3901_v50 = vpop.f32.mrb[85].mxu0 }
 0x66e   : > { %v3902_v44 = vadd.f32 %v3901_v50, %v3900_v62  ;;  %v3903_v52 = vpop.f32.mrb[86].mxu0  ;;  %2482 = vadd.xlane.f32.xlu1 %v6002_v17 }
 0x66f   : > { %v3904_v10 = vpop.f32.mrb[87].mxu0 }
 0x670   : > { %v2426_v29 = vadd.f32 %v3902_v44, %v5953_v5  ;;  %v3905_v38 = vadd.f32 %v3904_v10, %v3903_v52 }
 0x672   : > { %v2429_v58 = vadd.f32 %v3905_v38, %v5953_v5  ;;  %v6008_v4 = vadd.f32 %v4596_v51, %v2426_v29  ;;  %v4362_v38 = vld [vmem:[#allocation15 + $0x24] ss:$8 sps:$4 sm:$0xff]  }
 0x673   : > { %2801 = vmatprep.subr.bf16.mxu1 %v4362_v38  ;;  %v4380_v38 = vld [vmem:[#allocation17 + $0x48] sm:$0xff]  }
 0x674   : > { %2484 = vadd.xlane.f32.xlu0 %v6008_v4  ;;  %v3906_v2 = vpop.f32.mrb[88].mxu0  ;;  %v6012_v28 = vadd.f32 %v4597_v45, %v2429_v58  ;;  %v4360_v58 = vld [vmem:[#allocation15 + $0x20] ss:$8 sps:$4 sm:$0xff]  }
 0x675   : > { %v3907_v3 = vpop.f32.mrb[89].mxu0  ;;  %2802 = vmatpush1.bf16.msra.mxu1 %v4360_v58  ;;  %v4381_v58 = vld [vmem:[#allocation17 + $0x8] sm:$0xff]  }
 0x676   : > { %v3908_v33 = vadd.f32 %v3907_v3, %v3906_v2  ;;  %2486 = vadd.xlane.f32.xlu1 %v6012_v28  ;;  %v3909_v53 = vpop.f32.mrb[90].mxu0 }
 0x677   : > { %v3910_v22 = vpop.f32.mrb[91].mxu0 }
 0x678   : > { %v2434_v14 = vadd.f32 %v3908_v33, %v5953_v5  ;;  %v3911_v31 = vadd.f32 %v3910_v22, %v3909_v53  ;;  %v4363_v33 = vld [vmem:[#allocation15 + $0x30] ss:$8 sps:$4 sm:$0xff]  }
 0x67a   : > { %v2437_v42 = vadd.f32 %v3911_v31, %v5953_v5  ;;  %v6018_v27 = vadd.f32 %v4598_v12, %v2434_v14  ;;  %v4368_v31 = vld [vmem:[#allocation15 + $0x44] ss:$8 sps:$4 sm:$0xff]  }
 0x67c   : > { %v3912_v1 = vpop.f32.mrb[92].mxu0  ;;  %2488 = vadd.xlane.f32.xlu0 %v6018_v27  ;;  %v6022_v47 = vadd.f32 %v4599_v19, %v2437_v42  ;;  %v4366_v42 = vld [vmem:[#allocation15 + $0x40] ss:$8 sps:$4 sm:$0xff]   ;;  %v4371_v19 = vld [vmem:[#allocation15 + $0x54] ss:$8 sps:$4 sm:$0xff]  }
 0x67d   : > { %v3913_v57 = vpop.f32.mrb[93].mxu0 }
 0x67e   : > { %v3914_v24 = vadd.f32 %v3913_v57, %v3912_v1  ;;  %v3915_v55 = vpop.f32.mrb[94].mxu0  ;;  %2490 = vadd.xlane.f32.xlu1 %v6022_v47 }
 0x67f   : > { %v3916_v11 = vpop.f32.mrb[95].mxu0 }
 0x680   : > { %v2442_v39 = vadd.f32 %v3914_v24, %v5953_v5  ;;  %v3917_v41 = vadd.f32 %v3916_v11, %v3915_v55  ;;  %v4369_v24 = vld [vmem:[#allocation15 + $0x50] ss:$8 sps:$4 sm:$0xff]  }
 0x682   : > { %v2445_v23 = vadd.f32 %v3917_v41, %v5953_v5  ;;  %v6028_v26 = vadd.f32 %v4600_v54, %v2442_v39  ;;  %v4374_v41 = vld [vmem:[#allocation15 + $0x64] ss:$8 sps:$4 sm:$0xff]  }
 0x684   : > { %2492 = vadd.xlane.f32.xlu0 %v6028_v26  ;;  %v6032_v37 = vadd.f32 %v4601_v49, %v2445_v23  ;;  %v4372_v23 = vld [vmem:[#allocation15 + $0x60] ss:$8 sps:$4 sm:$0xff]  }
 0x686   : > { %2494 = vadd.xlane.f32.xlu1 %v6032_v37 }
 0x6d9   : > { %v2465_v30 = vpop.xlane.xlu0 %2464 }
 0x6da   : > { %v2497_v5 = vmul.f32 0.0078125, %v2465_v30 }
 0x6db   : > { %v2467_v48 = vpop.xlane.xlu1 %2466 }
 0x6dc   : > { %v6036_v16 = vsub.f32 %v5958_v32, %v2497_v5  ;;  %v2498_v21 = vmul.f32 0.0078125, %v2467_v48 }
 0x6de   : > { %v6039_v13 = vsub.f32 %v5962_v60, %v2498_v21  ;;  %v2529_v8 = vmul.f32 %v6036_v16, %v6036_v16 }
 0x6e0   : > { %2545 = vadd.xlane.f32.xlu0 %v2529_v8  ;;  %v2530_v63 = vmul.f32 %v6039_v13, %v6039_v13 }
 0x6e1   : > { %v2469_v25 = vpop.xlane.xlu0 %2468 }
 0x6e2   : > { %v2499_v34 = vmul.f32 0.0078125, %v2469_v25  ;;  %2547 = vadd.xlane.f32.xlu1 %v2530_v63 }
 0x6e3   : > { %v2471_v43 = vpop.xlane.xlu1 %2470 }
 0x6e4   : > { %v6046_v7 = vsub.f32 %v5968_v6, %v2499_v34  ;;  %v2500_v32 = vmul.f32 0.0078125, %v2471_v43 }
 0x6e6   : > { %v6049_v62 = vsub.f32 %v5972_v40, %v2500_v32  ;;  %v2531_v60 = vmul.f32 %v6046_v7, %v6046_v7 }
 0x6e8   : > { %2549 = vadd.xlane.f32.xlu0 %v2531_v60  ;;  %v2532_v20 = vmul.f32 %v6049_v62, %v6049_v62 }
 0x6e9   : > { %v2473_v50 = vpop.xlane.xlu0 %2472 }
 0x6ea   : > { %v2501_v44 = vmul.f32 0.0078125, %v2473_v50  ;;  %2551 = vadd.xlane.f32.xlu1 %v2532_v20 }
 0x6eb   : > { %v2475_v52 = vpop.xlane.xlu1 %2474 }
 0x6ec   : > { %v6056_v10 = vsub.f32 %v5978_v9, %v2501_v44  ;;  %v2502_v6 = vmul.f32 0.0078125, %v2475_v52  ;;  %v4365_v9 = vld [vmem:[#allocation15 + $0x34] ss:$8 sps:$4 sm:$0xff]  }
 0x6ed   : > { %2803 = vmatprep.subr.bf16.mxu1 %v4365_v9  ;;  %v4387_v9 = vld [vmem:[#allocation17 + $0x20] sm:$0xff]  }
 0x6ee   : > { %v6059_v29 = vsub.f32 %v5982_v59, %v2502_v6  ;;  %v2533_v40 = vmul.f32 %v6056_v10, %v6056_v10  ;;  %2804 = vmatpush1.bf16.msra.mxu1 %v4363_v33  ;;  %v4378_v6 = vld [vmem:[#allocation17 + $0x40] sm:$0xff]   ;;  %v4389_v33 = vld [vmem:[#allocation17 + $0x28] sm:$0xff]  }
 0x6ef   : > { %2805 = vmatprep.subr.bf16.mxu1 %v4368_v31  ;;  %3918 = vmatprep.subr.bf16.mxu0 %v4378_v6 }
 0x6f0   : > { %2553 = vadd.xlane.f32.xlu0 %v2533_v40  ;;  %v2534_v51 = vmul.f32 %v6059_v29, %v6059_v29  ;;  %v4379_v40 = vld [vmem:[#allocation17] sm:$0xff]  }
 0x6f1   : > { %v2477_v2 = vpop.xlane.xlu0 %2476  ;;  %3919 = vmatpush3.bf16.msra.mxu0 %v4379_v40 }
 0x6f2   : > { %v2503_v45 = vmul.f32 0.0078125, %v2477_v2  ;;  %2555 = vadd.xlane.f32.xlu1 %v2534_v51  ;;  %2806 = vmatpush1.bf16.msra.mxu1 %v4366_v42  ;;  %v4383_v51 = vld [vmem:[#allocation17 + $0x10] sm:$0xff]   ;;  %v4385_v2 = vld [vmem:[#allocation17 + $0x18] sm:$0xff]  }
 0x6f3   : > { %v2479_v3 = vpop.xlane.xlu1 %2478  ;;  %2807 = vmatprep.subr.bf16.mxu1 %v4371_v19  ;;  %3920 = vmatprep.subr.bf16.mxu0 %v4380_v38 }
 0x6f4   : > { %v6066_v59 = vsub.f32 %v5988_v18, %v2503_v45  ;;  %v2504_v53 = vmul.f32 0.0078125, %v2479_v3  ;;  %v4386_v45 = vld [vmem:[#allocation17 + $0x60] sm:$0xff]   ;;  %v4388_v3 = vld [vmem:[#allocation17 + $0x68] sm:$0xff]  }
 0x6f5   : > { %3921 = vmatpush3.bf16.msra.mxu0 %v4381_v58 }
 0x6f6   : > { %v6069_v22 = vsub.f32 %v5992_v35, %v2504_v53  ;;  %v2535_v14 = vmul.f32 %v6066_v59, %v6066_v59  ;;  %2808 = vmatpush1.bf16.msra.mxu1 %v4369_v24  ;;  %v4390_v53 = vld [vmem:[#allocation17 + $0x70] sm:$0xff]  }
 0x6f7   : > { %2809 = vmatprep.subr.bf16.mxu1 %v4374_v41 }
 0x6f8   : > { %2557 = vadd.xlane.f32.xlu0 %v2535_v14  ;;  %v2536_v12 = vmul.f32 %v6069_v22, %v6069_v22  ;;  %v4391_v14 = vld [vmem:[#allocation17 + $0x30] sm:$0xff]  }
 0x6f9   : > { %v2481_v1 = vpop.xlane.xlu0 %2480 }
 0x6fa   : > { %v2505_v18 = vmul.f32 0.0078125, %v2481_v1  ;;  %2559 = vadd.xlane.f32.xlu1 %v2536_v12  ;;  %2810 = vmatpush1.bf16.msra.mxu1 %v4372_v23 }
 0x6fb   : > { %v2483_v57 = vpop.xlane.xlu1 %2482  ;;  %2811 = vmatprep.subr.bf16.mxu1 %v4377_v56 }
 0x6fc   : > { %v6076_v35 = vsub.f32 %v5998_v61, %v2505_v18  ;;  %v2506_v55 = vmul.f32 0.0078125, %v2483_v57 }
 0x6fe   : > { %v6079_v11 = vsub.f32 %v6002_v17, %v2506_v55  ;;  %v2537_v39 = vmul.f32 %v6076_v35, %v6076_v35  ;;  %2812 = vmatpush1.bf16.msra.mxu1 %v4375_v46 }
 0x700   : > { %2561 = vadd.xlane.f32.xlu0 %v2537_v39  ;;  %v2538_v54 = vmul.f32 %v6079_v11, %v6079_v11 }
 0x701   : > { %v2485_v49 = vpop.xlane.xlu0 %2484 }
 0x702   : > { %v2507_v61 = vmul.f32 0.0078125, %v2485_v49  ;;  %2563 = vadd.xlane.f32.xlu1 %v2538_v54  ;;  %v6115_v49 = vld [vmem:[#allocation18 + $0x1] ss:$0 sm:$0xff] }
 0x703   : > { %v2487_v36 = vpop.xlane.xlu1 %2486 }
 0x704   : > { %v6086_v17 = vsub.f32 %v6008_v4, %v2507_v61  ;;  %v2508_v15 = vmul.f32 0.0078125, %v2487_v36 }
 0x706   : > { %v6089_v30 = vsub.f32 %v6012_v28, %v2508_v15  ;;  %v2539_v5 = vmul.f32 %v6086_v17, %v6086_v17 }
 0x708   : > { %2565 = vadd.xlane.f32.xlu0 %v2539_v5  ;;  %v2540_v48 = vmul.f32 %v6089_v30, %v6089_v30 }
 0x709   : > { %v2489_v21 = vpop.xlane.xlu0 %2488 }
 0x70a   : > { %v2509_v8 = vmul.f32 0.0078125, %v2489_v21  ;;  %2567 = vadd.xlane.f32.xlu1 %v2540_v48 }
 0x70b   : > { %v2491_v63 = vpop.xlane.xlu1 %2490 }
 0x70c   : > { %v6096_v4 = vsub.f32 %v6018_v27, %v2509_v8  ;;  %v2510_v25 = vmul.f32 0.0078125, %v2491_v63  ;;  %v6120_v63 = vld [vmem:[#allocation18 + $0x2] ss:$0 sm:$0xff] }
 0x70e   : > { %v6099_v34 = vsub.f32 %v6022_v47, %v2510_v25  ;;  %v2541_v28 = vmul.f32 %v6096_v4, %v6096_v4 }
 0x710   : > { %2569 = vadd.xlane.f32.xlu0 %v2541_v28  ;;  %v2542_v43 = vmul.f32 %v6099_v34, %v6099_v34 }
 0x711   : > { %v2493_v32 = vpop.xlane.xlu0 %2492 }
 0x712   : > { %v2511_v60 = vmul.f32 0.0078125, %v2493_v32  ;;  %2571 = vadd.xlane.f32.xlu1 %v2542_v43 }
 0x713   : > { %v2495_v20 = vpop.xlane.xlu1 %2494 }
 0x714   : > { %v6106_v50 = vsub.f32 %v6028_v26, %v2511_v60  ;;  %v2512_v27 = vmul.f32 0.0078125, %v2495_v20  ;;  %v4382_v26 = vld [vmem:[#allocation17 + $0x50] sm:$0xff]  }
 0x715   : > { %3922 = vmatprep.subr.bf16.mxu0 %v4382_v26 }
 0x716   : > { %v6109_v44 = vsub.f32 %v6032_v37, %v2512_v27  ;;  %v2543_v47 = vmul.f32 %v6106_v50, %v6106_v50  ;;  %v4384_v37 = vld [vmem:[#allocation17 + $0x58] sm:$0xff]   ;;  %3923 = vmatpush3.bf16.msra.mxu0 %v4383_v51 }
 0x717   : > { %3924 = vmatprep.subr.bf16.mxu0 %v4384_v37 }
 0x718   : > { %2573 = vadd.xlane.f32.xlu0 %v2543_v47  ;;  %v2544_v52 = vmul.f32 %v6109_v44, %v6109_v44 }
 0x71a   : > { %2575 = vadd.xlane.f32.xlu1 %v2544_v52  ;;  %3925 = vmatpush3.bf16.msra.mxu0 %v4385_v2 }
 0x71b   : > { %3926 = vmatprep.subr.bf16.mxu0 %v4386_v45 }
 0x71e   : > { %3927 = vmatpush3.bf16.msra.mxu0 %v4387_v9 }
 0x71f   : > { %3928 = vmatprep.subr.bf16.mxu0 %v4388_v3 }
 0x722   : > { %3929 = vmatpush3.bf16.msra.mxu0 %v4389_v33 }
 0x723   : > { %3930 = vmatprep.subr.bf16.mxu0 %v4390_v53 }
 0x726   : > { %3931 = vmatpush3.bf16.msra.mxu0 %v4391_v14 }
 0x76d   : > { %v2546_v31 = vpop.xlane.xlu0 %2545 }
 0x76e   : > { %v2577_v42 = vmul.f32 0.0078125, %v2546_v31 }
 0x76f   : > { %v2548_v12 = vpop.xlane.xlu1 %2547 }
 0x770   : > { %v2593_v1 = vadd.f32 1e-05, %v2577_v42  ;;  %v2578_v18 = vmul.f32 0.0078125, %v2548_v12 }
 0x772   : > { %4522 = vrsqrt.f32 %v2593_v1  ;;  %v2594_v19 = vadd.f32 1e-05, %v2578_v18 }
 0x774   : > { %4524 = vrsqrt.f32 %v2594_v19 }
 0x775   : > { %v2550_v57 = vpop.xlane.xlu0 %2549 }
 0x776   : > { %v2579_v24 = vmul.f32 0.0078125, %v2550_v57 }
 0x777   : > { %v2552_v55 = vpop.xlane.xlu1 %2551 }
 0x778   : > { %v2595_v39 = vadd.f32 1e-05, %v2579_v24  ;;  %v2580_v41 = vmul.f32 0.0078125, %v2552_v55 }
 0x77a   : > { %4526 = vrsqrt.f32 %v2595_v39  ;;  %v2596_v23 = vadd.f32 1e-05, %v2580_v41 }
 0x77c   : > { %v4523_v54 = vpop.eup %4522  ;;  %4528 = vrsqrt.f32 %v2596_v23 }
 0x77d   : > { %v2625_v61 = vmul.f32 %v4523_v54, %v6036_v16  ;;  %v2554_v56 = vpop.xlane.xlu0 %2553 }
 0x77e   : > { %v4525_v36 = vpop.eup %4524  ;;  %v2581_v46 = vmul.f32 0.0078125, %v2554_v56 }
 0x77f   : > { %v2645_v15 = vmul.f32 %v6115_v49, %v2625_v61  ;;  %v2626_v5 = vmul.f32 %v4525_v36, %v6039_v13  ;;  %v2556_v48 = vpop.xlane.xlu1 %2555 }
 0x780   : > { %v2597_v21 = vadd.f32 1e-05, %v2581_v46  ;;  %v2582_v8 = vmul.f32 0.0078125, %v2556_v48 }
 0x781   : > { %v2646_v25 = vmul.f32 %v6115_v49, %v2626_v5  ;;  %v6124_v43 = vadd.f32 %v6120_v63, %v2645_v15 }
 0x782   : > { %4530 = vrsqrt.f32 %v2597_v21  ;;  %v2598_v28 = vadd.f32 1e-05, %v2582_v8 }
 0x783   : > { %v6127_v16 = vadd.f32 %v6120_v63, %v2646_v25 }
 0x784   : > { %v4527_v32 = vpop.eup %4526  ;;  %4532 = vrsqrt.f32 %v2598_v28 }
 0x785   : > { %v2558_v60 = vpop.xlane.xlu0 %2557  ;;  %v2681_v13 = vpack.c.bf16 %v6127_v16, %v6124_v43  ;;  %v2627_v20 = vmul.f32 %v4527_v32, %v6046_v7 }
 0x786   : > { %v4529_v27 = vpop.eup %4528  ;;  %v2583_v47 = vmul.f32 0.0078125, %v2558_v60 }
 0x787   : > { %2830 = vmatmul.mubr.bf16.vlgmr.msra.gmra.mrb[96].mxu1 %v2681_v13  ;;  %v2560_v52 = vpop.xlane.xlu1 %2559  ;;  %v2628_v6 = vmul.f32 %v4529_v27, %v6049_v62  ;;  %v2647_v40 = vmul.f32 %v6115_v49, %v2627_v20 }
 0x788   : > { %v2599_v38 = vadd.f32 1e-05, %v2583_v47  ;;  %v2584_v58 = vmul.f32 0.0078125, %v2560_v52  ;;  %2839 = vmatprep.mubr.bf16.mxu1 %v4985_v0 }
 0x789   : > { %v2648_v26 = vmul.f32 %v6115_v49, %v2628_v6  ;;  %v6137_v37 = vadd.f32 %v6120_v63, %v2647_v40 }
 0x78a   : > { %4534 = vrsqrt.f32 %v2599_v38  ;;  %v2600_v51 = vadd.f32 1e-05, %v2584_v58 }
 0x78b   : > { %v6140_v7 = vadd.f32 %v6120_v63, %v2648_v26 }
 0x78c   : > { %v4531_v2 = vpop.eup %4530  ;;  %4536 = vrsqrt.f32 %v2600_v51 }
 0x78d   : > { %v2562_v45 = vpop.xlane.xlu0 %2561  ;;  %v2682_v62 = vpack.c.bf16 %v6140_v7, %v6137_v37  ;;  %v2629_v9 = vmul.f32 %v4531_v2, %v6056_v10 }
 0x78e   : > { %v4533_v3 = vpop.eup %4532  ;;  %v2585_v33 = vmul.f32 0.0078125, %v2562_v45 }
 0x78f   : > { %2840 = vmatmul.mubr.bf16.gmra.mrb[100].mxu1 %v2682_v62  ;;  %v2564_v53 = vpop.xlane.xlu1 %2563  ;;  %v2630_v14 = vmul.f32 %v4533_v3, %v6059_v29  ;;  %v2649_v31 = vmul.f32 %v6115_v49, %v2629_v9 }
 0x790   : > { %v2601_v42 = vadd.f32 1e-05, %v2585_v33  ;;  %v2586_v12 = vmul.f32 0.0078125, %v2564_v53  ;;  %2849 = vmatprep.mubr.bf16.mxu1 %v4985_v0 }
 0x791   : > { %v2650_v1 = vmul.f32 %v6115_v49, %v2630_v14  ;;  %v6150_v19 = vadd.f32 %v6120_v63, %v2649_v31 }
 0x792   : > { %4538 = vrsqrt.f32 %v2601_v42  ;;  %v2602_v18 = vadd.f32 1e-05, %v2586_v12 }
 0x793   : > { %v6153_v10 = vadd.f32 %v6120_v63, %v2650_v1 }
 0x794   : > { %v4535_v57 = vpop.eup %4534  ;;  %4540 = vrsqrt.f32 %v2602_v18 }
 0x795   : > { %v2566_v24 = vpop.xlane.xlu0 %2565  ;;  %v2683_v29 = vpack.c.bf16 %v6153_v10, %v6150_v19  ;;  %v2631_v55 = vmul.f32 %v4535_v57, %v6066_v59 }
 0x796   : > { %v4537_v39 = vpop.eup %4536  ;;  %v2587_v41 = vmul.f32 0.0078125, %v2566_v24 }
 0x797   : > { %2850 = vmatmul.mubr.bf16.gmra.mrb[104].mxu1 %v2683_v29  ;;  %v2568_v23 = vpop.xlane.xlu1 %2567  ;;  %v2632_v54 = vmul.f32 %v4537_v39, %v6069_v22  ;;  %v2651_v61 = vmul.f32 %v6115_v49, %v2631_v55 }
 0x798   : > { %v2603_v56 = vadd.f32 1e-05, %v2587_v41  ;;  %v2588_v36 = vmul.f32 0.0078125, %v2568_v23  ;;  %2859 = vmatprep.mubr.bf16.mxu1 %v4985_v0 }
 0x799   : > { %v2652_v46 = vmul.f32 %v6115_v49, %v2632_v54  ;;  %v6163_v5 = vadd.f32 %v6120_v63, %v2651_v61 }
 0x79a   : > { %4542 = vrsqrt.f32 %v2603_v56  ;;  %v2604_v15 = vadd.f32 1e-05, %v2588_v36 }
 0x79b   : > { %v6166_v59 = vadd.f32 %v6120_v63, %v2652_v46  ;;  %v4393_v46 = vld [vmem:[#allocation17 + $0x38] sm:$0xff]  }
 0x79c   : > { %v4539_v48 = vpop.eup %4538  ;;  %4544 = vrsqrt.f32 %v2604_v15 }
 0x79d   : > { %v2570_v21 = vpop.xlane.xlu0 %2569  ;;  %v2684_v22 = vpack.c.bf16 %v6166_v59, %v6163_v5  ;;  %v2633_v8 = vmul.f32 %v4539_v48, %v6076_v35 }
 0x79e   : > { %v4541_v25 = vpop.eup %4540  ;;  %v2589_v28 = vmul.f32 0.0078125, %v2570_v21 }
 0x79f   : > { %2860 = vmatmul.mubr.bf16.gmra.mrb[108].mxu1 %v2684_v22  ;;  %v2572_v32 = vpop.xlane.xlu1 %2571  ;;  %v2634_v60 = vmul.f32 %v4541_v25, %v6079_v11  ;;  %v2653_v13 = vmul.f32 %v6115_v49, %v2633_v8 }
 0x7a0   : > { %v2605_v20 = vadd.f32 1e-05, %v2589_v28  ;;  %v2590_v27 = vmul.f32 0.0078125, %v2572_v32  ;;  %2869 = vmatprep.mubr.bf16.mxu1 %v4985_v0 }
 0x7a1   : > { %v2654_v47 = vmul.f32 %v6115_v49, %v2634_v60  ;;  %v6176_v6 = vadd.f32 %v6120_v63, %v2653_v13 }
 0x7a2   : > { %4546 = vrsqrt.f32 %v2605_v20  ;;  %v2606_v52 = vadd.f32 1e-05, %v2590_v27 }
 0x7a3   : > { %v6179_v35 = vadd.f32 %v6120_v63, %v2654_v47 }
 0x7a4   : > { %v4543_v40 = vpop.eup %4542  ;;  %4548 = vrsqrt.f32 %v2606_v52 }
 0x7a5   : > { %v2574_v38 = vpop.xlane.xlu0 %2573  ;;  %v2685_v11 = vpack.c.bf16 %v6179_v35, %v6176_v6  ;;  %v2635_v58 = vmul.f32 %v4543_v40, %v6086_v17 }
 0x7a6   : > { %v4545_v26 = vpop.eup %4544  ;;  %v2591_v51 = vmul.f32 0.0078125, %v2574_v38 }
 0x7a7   : > { %2870 = vmatmul.mubr.bf16.gmra.mrb[112].mxu1 %v2685_v11  ;;  %v2576_v2 = vpop.xlane.xlu1 %2575  ;;  %v2636_v45 = vmul.f32 %v4545_v26, %v6089_v30  ;;  %v2655_v62 = vmul.f32 %v6115_v49, %v2635_v58 }
 0x7a8   : > { %v2607_v9 = vadd.f32 1e-05, %v2591_v51  ;;  %v2592_v3 = vmul.f32 0.0078125, %v2576_v2  ;;  %2879 = vmatprep.mubr.bf16.mxu1 %v4985_v0 }
 0x7a9   : > { %v2656_v33 = vmul.f32 %v6115_v49, %v2636_v45  ;;  %v6189_v14 = vadd.f32 %v6120_v63, %v2655_v62 }
 0x7aa   : > { %4550 = vrsqrt.f32 %v2607_v9  ;;  %v2608_v53 = vadd.f32 1e-05, %v2592_v3 }
 0x7ab   : > { %v6192_v17 = vadd.f32 %v6120_v63, %v2656_v33 }
 0x7ac   : > { %v4547_v31 = vpop.eup %4546  ;;  %4552 = vrsqrt.f32 %v2608_v53 }
 0x7ad   : > { %v2686_v30 = vpack.c.bf16 %v6192_v17, %v6189_v14  ;;  %v2637_v42 = vmul.f32 %v4547_v31, %v6096_v4 }
 0x7ae   : > { %v4549_v12 = vpop.eup %4548 }
 0x7af   : > { %2880 = vmatmul.mubr.bf16.gmra.mrb[116].mxu1 %v2686_v30  ;;  %v2638_v1 = vmul.f32 %v4549_v12, %v6099_v34  ;;  %v2657_v18 = vmul.f32 %v6115_v49, %v2637_v42 }
 0x7b0   : > { %2889 = vmatprep.mubr.bf16.mxu1 %v4985_v0 }
 0x7b1   : > { %v2658_v57 = vmul.f32 %v6115_v49, %v2638_v1  ;;  %v6202_v24 = vadd.f32 %v6120_v63, %v2657_v18 }
 0x7b3   : > { %v6205_v29 = vadd.f32 %v6120_v63, %v2658_v57 }
 0x7b4   : > { %v4551_v55 = vpop.eup %4550 }
 0x7b5   : > { %v2687_v4 = vpack.c.bf16 %v6205_v29, %v6202_v24  ;;  %v2639_v39 = vmul.f32 %v4551_v55, %v6106_v50  ;;  %v4392_v50 = vld [vmem:[#allocation17 + $0x78] sm:$0xff]  }
 0x7b6   : > { %v4553_v41 = vpop.eup %4552  ;;  %3932 = vmatprep.subr.bf16.mxu0 %v4392_v50 }
 0x7b7   : > { %2890 = vmatmul.mubr.bf16.gmra.mrb[120].mxu1 %v2687_v4  ;;  %v2640_v34 = vmul.f32 %v4553_v41, %v6109_v44  ;;  %v2659_v23 = vmul.f32 %v6115_v49, %v2639_v39  ;;  %3933 = vmatpush3.bf16.msra.mxu0 %v4393_v46  ;;  %v2707_v44 = vlaneseq }
 0x7b8   : > { %2899 = vmatprep.mubr.bf16.mxu1 %v4985_v0  ;;  %v2705_v0 = vld [vmem:[#allocation20] sm:$0x3] }
 0x7b9   : > { %v2660_v54 = vmul.f32 %v6115_v49, %v2640_v34  ;;  %v6215_v61 = vadd.f32 %v6120_v63, %v2659_v23  ;;  %v2708_v15 = vshrl.u32 %v2707_v44, 7 }
 0x7bb   : > { %v6218_v56 = vadd.f32 %v6120_v63, %v2660_v54  ;;  %v2709_v48 = vsub.s32 0, %v2708_v15  ;;  %v2713_v21 = vsub.s32 1, %v2708_v15 }
 0x7bd   : > { %v2688_v36 = vpack.c.bf16 %v6218_v56, %v6215_v61  ;;  %v6222_v49 = vrot.slane %v2705_v0, %v2709_v48  ;;  %v6224_v22 = vrot.slane %v2705_v0, %v2713_v21 }
 0x7bf   : > { %2900 = vmatmul.mubr.bf16.gmra.mrb[124].mxu1 %v2688_v36 }
 0x85a   : > { %v2831_v8 = vpop.f32.mrb[96].mxu1 }
 0x85b   : > { %v2832_v63 = vadd.f32 %v2831_v8, %v6222_v49  ;;  %v2833_v25 = vpop.f32.mrb[97].mxu1 }
 0x85c   : > { %v2834_v28 = vadd.f32 %v2833_v25, %v6224_v22  ;;  %v2835_v32 = vpop.f32.mrb[98].mxu1 }
 0x85d   : > { %v2836_v60 = vadd.f32 %v2835_v32, %v6222_v49  ;;  %v2837_v13 = vpop.f32.mrb[99].mxu1  ;;  %v2910_v27 = vmax.f32 %v2832_v63, 0.0 }
 0x85e   : > { %v2838_v20 = vadd.f32 %v2837_v13, %v6224_v22  ;;  %v2911_v52 = vmax.f32 %v2834_v28, 0.0 }
 0x85f   : > { %v2912_v47 = vmax.f32 %v2836_v60, 0.0 }
 0x860   : > { %v2913_v40 = vmax.f32 %v2838_v20, 0.0 }
 0x861   : > { %v2942_v38 = vpack.c.bf16 %v2912_v47, %v2910_v27 }
 0x862   : > { %v2943_v11 = vpack.c.bf16 %v2913_v40, %v2911_v52  ;;  %v2841_v58 = vpop.f32.mrb[100].mxu1 }
 0x863   : > { %v2842_v26 = vadd.f32 %v2841_v58, %v6222_v49  ;;  %v2843_v51 = vpop.f32.mrb[101].mxu1 }
 0x864   : > { %v2844_v2 = vadd.f32 %v2843_v51, %v6224_v22  ;;  %v2845_v45 = vpop.f32.mrb[102].mxu1  ;;  %3122 = vmatprep.mubr.bf16.mxu0 %v2943_v11 }
 0x865   : > { %v2846_v62 = vadd.f32 %v2845_v45, %v6222_v49  ;;  %v2847_v9 = vpop.f32.mrb[103].mxu1  ;;  %3123 = vmatmul.mubr.bf16.vlgmr.msra.gmra.mrb[96].mxu0 %v2942_v38  ;;  %v2914_v33 = vmax.f32 %v2842_v26, 0.0 }
 0x866   : > { %v2848_v3 = vadd.f32 %v2847_v9, %v6224_v22  ;;  %v2915_v31 = vmax.f32 %v2844_v2, 0.0 }
 0x867   : > { %v2916_v53 = vmax.f32 %v2846_v62, 0.0 }
 0x868   : > { %v2917_v30 = vmax.f32 %v2848_v3, 0.0 }
 0x869   : > { %v2944_v42 = vpack.c.bf16 %v2916_v53, %v2914_v33 }
 0x86a   : > { %v2945_v12 = vpack.c.bf16 %v2917_v30, %v2915_v31  ;;  %v2851_v1 = vpop.f32.mrb[104].mxu1 }
 0x86b   : > { %v2852_v18 = vadd.f32 %v2851_v1, %v6222_v49  ;;  %v2853_v57 = vpop.f32.mrb[105].mxu1 }
 0x86c   : > { %v2854_v55 = vadd.f32 %v2853_v57, %v6224_v22  ;;  %v2855_v4 = vpop.f32.mrb[106].mxu1  ;;  %3130 = vmatprep.mubr.bf16.mxu0 %v2945_v12 }
 0x86d   : > { %v2856_v39 = vadd.f32 %v2855_v4, %v6222_v49  ;;  %v2857_v41 = vpop.f32.mrb[107].mxu1  ;;  %3131 = vmatmul.mubr.bf16.gmra.mrb[100].mxu0 %v2944_v42  ;;  %v2918_v23 = vmax.f32 %v2852_v18, 0.0 }
 0x86e   : > { %v2858_v34 = vadd.f32 %v2857_v41, %v6224_v22  ;;  %v2919_v36 = vmax.f32 %v2854_v55, 0.0 }
 0x86f   : > { %v2920_v54 = vmax.f32 %v2856_v39, 0.0 }
 0x870   : > { %v2921_v50 = vmax.f32 %v2858_v34, 0.0 }
 0x871   : > { %v2946_v46 = vpack.c.bf16 %v2920_v54, %v2918_v23 }
 0x872   : > { %v2947_v44 = vpack.c.bf16 %v2921_v50, %v2919_v36  ;;  %v2861_v15 = vpop.f32.mrb[108].mxu1 }
 0x873   : > { %v2862_v48 = vadd.f32 %v2861_v15, %v6222_v49  ;;  %v2863_v0 = vpop.f32.mrb[109].mxu1 }
 0x874   : > { %v2864_v21 = vadd.f32 %v2863_v0, %v6224_v22  ;;  %v2865_v8 = vpop.f32.mrb[110].mxu1  ;;  %3138 = vmatprep.mubr.bf16.mxu0 %v2947_v44 }
 0x875   : > { %v2866_v63 = vadd.f32 %v2865_v8, %v6222_v49  ;;  %v2867_v25 = vpop.f32.mrb[111].mxu1  ;;  %3139 = vmatmul.mubr.bf16.gmra.mrb[104].mxu0 %v2946_v46  ;;  %v2922_v32 = vmax.f32 %v2862_v48, 0.0 }
 0x876   : > { %v2868_v28 = vadd.f32 %v2867_v25, %v6224_v22  ;;  %v2923_v13 = vmax.f32 %v2864_v21, 0.0 }
 0x877   : > { %v2924_v60 = vmax.f32 %v2866_v63, 0.0 }
 0x878   : > { %v2925_v20 = vmax.f32 %v2868_v28, 0.0 }
 0x879   : > { %v2948_v27 = vpack.c.bf16 %v2924_v60, %v2922_v32 }
 0x87a   : > { %v2949_v47 = vpack.c.bf16 %v2925_v20, %v2923_v13  ;;  %v2871_v52 = vpop.f32.mrb[112].mxu1 }
 0x87b   : > { %v2872_v40 = vadd.f32 %v2871_v52, %v6222_v49  ;;  %v2873_v38 = vpop.f32.mrb[113].mxu1 }
 0x87c   : > { %v2874_v11 = vadd.f32 %v2873_v38, %v6224_v22  ;;  %v2875_v58 = vpop.f32.mrb[114].mxu1  ;;  %3146 = vmatprep.mubr.bf16.mxu0 %v2949_v47 }
 0x87d   : > { %v2876_v26 = vadd.f32 %v2875_v58, %v6222_v49  ;;  %v2877_v51 = vpop.f32.mrb[115].mxu1  ;;  %3147 = vmatmul.mubr.bf16.gmra.mrb[108].mxu0 %v2948_v27  ;;  %v2926_v45 = vmax.f32 %v2872_v40, 0.0 }
 0x87e   : > { %v2878_v2 = vadd.f32 %v2877_v51, %v6224_v22  ;;  %v2927_v9 = vmax.f32 %v2874_v11, 0.0 }
 0x87f   : > { %v2928_v62 = vmax.f32 %v2876_v26, 0.0 }
 0x880   : > { %v2929_v3 = vmax.f32 %v2878_v2, 0.0 }
 0x881   : > { %v2950_v33 = vpack.c.bf16 %v2928_v62, %v2926_v45 }
 0x882   : > { %v2951_v53 = vpack.c.bf16 %v2929_v3, %v2927_v9  ;;  %v2881_v31 = vpop.f32.mrb[116].mxu1  ;;  %v6258_v3 = vld [vmem:[#allocation18 + $0x3] ss:$0 sm:$0xff] }
 0x883   : > { %v2882_v30 = vadd.f32 %v2881_v31, %v6222_v49  ;;  %v2883_v42 = vpop.f32.mrb[117].mxu1 }
 0x884   : > { %v2884_v12 = vadd.f32 %v2883_v42, %v6224_v22  ;;  %v2885_v1 = vpop.f32.mrb[118].mxu1  ;;  %3154 = vmatprep.mubr.bf16.mxu0 %v2951_v53 }
 0x885   : > { %v2886_v18 = vadd.f32 %v2885_v1, %v6222_v49  ;;  %v2887_v57 = vpop.f32.mrb[119].mxu1  ;;  %3155 = vmatmul.mubr.bf16.gmra.mrb[112].mxu0 %v2950_v33  ;;  %v2930_v4 = vmax.f32 %v2882_v30, 0.0 }
 0x886   : > { %v2888_v55 = vadd.f32 %v2887_v57, %v6224_v22  ;;  %v2931_v41 = vmax.f32 %v2884_v12, 0.0 }
 0x887   : > { %v2932_v39 = vmax.f32 %v2886_v18, 0.0 }
 0x888   : > { %v2933_v34 = vmax.f32 %v2888_v55, 0.0 }
 0x889   : > { %v2952_v23 = vpack.c.bf16 %v2932_v39, %v2930_v4 }
 0x88a   : > { %v2953_v54 = vpack.c.bf16 %v2933_v34, %v2931_v41  ;;  %v2891_v36 = vpop.f32.mrb[120].mxu1 }
 0x88b   : > { %v2892_v50 = vadd.f32 %v2891_v36, %v6222_v49  ;;  %v2893_v46 = vpop.f32.mrb[121].mxu1 }
 0x88c   : > { %v2894_v44 = vadd.f32 %v2893_v46, %v6224_v22  ;;  %v2895_v15 = vpop.f32.mrb[122].mxu1  ;;  %3162 = vmatprep.mubr.bf16.mxu0 %v2953_v54 }
 0x88d   : > { %v2896_v48 = vadd.f32 %v2895_v15, %v6222_v49  ;;  %v2897_v0 = vpop.f32.mrb[123].mxu1  ;;  %3163 = vmatmul.mubr.bf16.gmra.mrb[116].mxu0 %v2952_v23  ;;  %v2934_v8 = vmax.f32 %v2892_v50, 0.0 }
 0x88e   : > { %v2898_v21 = vadd.f32 %v2897_v0, %v6224_v22  ;;  %v2935_v25 = vmax.f32 %v2894_v44, 0.0 }
 0x88f   : > { %v2936_v63 = vmax.f32 %v2896_v48, 0.0 }
 0x890   : > { %v2937_v28 = vmax.f32 %v2898_v21, 0.0 }
 0x891   : > { %v2954_v32 = vpack.c.bf16 %v2936_v63, %v2934_v8 }
 0x892   : > { %v2955_v60 = vpack.c.bf16 %v2937_v28, %v2935_v25  ;;  %v2901_v13 = vpop.f32.mrb[124].mxu1 }
 0x893   : > { %v2902_v20 = vadd.f32 %v2901_v13, %v6222_v49  ;;  %v2903_v27 = vpop.f32.mrb[125].mxu1 }
 0x894   : > { %v2904_v47 = vadd.f32 %v2903_v27, %v6224_v22  ;;  %v2905_v52 = vpop.f32.mrb[126].mxu1  ;;  %3170 = vmatprep.mubr.bf16.mxu0 %v2955_v60 }
 0x895   : > { %v2906_v40 = vadd.f32 %v2905_v52, %v6222_v49  ;;  %v2907_v38 = vpop.f32.mrb[127].mxu1  ;;  %3171 = vmatmul.mubr.bf16.gmra.mrb[120].mxu0 %v2954_v32  ;;  %v2938_v58 = vmax.f32 %v2902_v20, 0.0 }
 0x896   : > { %v2908_v11 = vadd.f32 %v2907_v38, %v6224_v22  ;;  %v2939_v51 = vmax.f32 %v2904_v47, 0.0 }
 0x897   : > { %v2940_v26 = vmax.f32 %v2906_v40, 0.0 }
 0x898   : > { %v2941_v2 = vmax.f32 %v2908_v11, 0.0 }
 0x899   : > { %v2956_v45 = vpack.c.bf16 %v2940_v26, %v2938_v58 }
 0x89a   : > { %v2957_v62 = vpack.c.bf16 %v2941_v2, %v2939_v51 }
 0x89c   : > { %3178 = vmatprep.mubr.bf16.mxu0 %v2957_v62 }
 0x89d   : > { %3179 = vmatmul.mubr.bf16.gmra.mrb[124].mxu0 %v2956_v45 }
 0x938   : > { %v3934_v9 = vpop.f32.mrb[96].mxu0 }
 0x939   : > { %v3935_v33 = vpop.f32.mrb[97].mxu0 }
 0x93a   : > { %v3936_v53 = vadd.f32 %v3935_v33, %v3934_v9  ;;  %v3937_v31 = vpop.f32.mrb[98].mxu0 }
 0x93b   : > { %v3938_v30 = vpop.f32.mrb[99].mxu0 }
 0x93c   : > { %v3125_v49 = vadd.f32 %v3936_v53, %v6258_v3  ;;  %v3939_v42 = vadd.f32 %v3938_v30, %v3937_v31 }
 0x93e   : > { %v3128_v22 = vadd.f32 %v3939_v42, %v6258_v3  ;;  %v6263_v12 = vadd.f32 %v3125_v49, %v6124_v43 }
 0x940   : > { %3203 = vadd.xlane.f32.xlu0 %v6263_v12  ;;  %v3940_v1 = vpop.f32.mrb[100].mxu0  ;;  %v6267_v18 = vadd.f32 %v3128_v22, %v6127_v16 }
 0x941   : > { %v3941_v57 = vpop.f32.mrb[101].mxu0 }
 0x942   : > { %v3942_v55 = vadd.f32 %v3941_v57, %v3940_v1  ;;  %3205 = vadd.xlane.f32.xlu1 %v6267_v18  ;;  %v3943_v4 = vpop.f32.mrb[102].mxu0 }
 0x943   : > { %v3944_v39 = vpop.f32.mrb[103].mxu0 }
 0x944   : > { %v3133_v41 = vadd.f32 %v3942_v55, %v6258_v3  ;;  %v3945_v34 = vadd.f32 %v3944_v39, %v3943_v4 }
 0x946   : > { %v3136_v23 = vadd.f32 %v3945_v34, %v6258_v3  ;;  %v6273_v43 = vadd.f32 %v3133_v41, %v6137_v37 }
 0x948   : > { %3207 = vadd.xlane.f32.xlu0 %v6273_v43  ;;  %v3946_v54 = vpop.f32.mrb[104].mxu0  ;;  %v6277_v16 = vadd.f32 %v3136_v23, %v6140_v7 }
 0x949   : > { %v3947_v36 = vpop.f32.mrb[105].mxu0 }
 0x94a   : > { %v3948_v50 = vadd.f32 %v3947_v36, %v3946_v54  ;;  %3209 = vadd.xlane.f32.xlu1 %v6277_v16  ;;  %v3949_v46 = vpop.f32.mrb[106].mxu0 }
 0x94b   : > { %v3950_v44 = vpop.f32.mrb[107].mxu0 }
 0x94c   : > { %v3141_v15 = vadd.f32 %v3948_v50, %v6258_v3  ;;  %v3951_v48 = vadd.f32 %v3950_v44, %v3949_v46 }
 0x94e   : > { %v3144_v0 = vadd.f32 %v3951_v48, %v6258_v3  ;;  %v6283_v37 = vadd.f32 %v3141_v15, %v6150_v19 }
 0x950   : > { %3211 = vadd.xlane.f32.xlu0 %v6283_v37  ;;  %v3952_v21 = vpop.f32.mrb[108].mxu0  ;;  %v6287_v7 = vadd.f32 %v3144_v0, %v6153_v10 }
 0x951   : > { %v3953_v8 = vpop.f32.mrb[109].mxu0 }
 0x952   : > { %v3954_v63 = vadd.f32 %v3953_v8, %v3952_v21  ;;  %3213 = vadd.xlane.f32.xlu1 %v6287_v7  ;;  %v3955_v25 = vpop.f32.mrb[110].mxu0 }
 0x953   : > { %v3956_v28 = vpop.f32.mrb[111].mxu0 }
 0x954   : > { %v3149_v32 = vadd.f32 %v3954_v63, %v6258_v3  ;;  %v3957_v60 = vadd.f32 %v3956_v28, %v3955_v25 }
 0x956   : > { %v3152_v13 = vadd.f32 %v3957_v60, %v6258_v3  ;;  %v6293_v19 = vadd.f32 %v3149_v32, %v6163_v5 }
 0x958   : > { %3215 = vadd.xlane.f32.xlu0 %v6293_v19  ;;  %v3958_v20 = vpop.f32.mrb[112].mxu0  ;;  %v6297_v10 = vadd.f32 %v3152_v13, %v6166_v59 }
 0x959   : > { %v3959_v27 = vpop.f32.mrb[113].mxu0 }
 0x95a   : > { %v3960_v47 = vadd.f32 %v3959_v27, %v3958_v20  ;;  %3217 = vadd.xlane.f32.xlu1 %v6297_v10  ;;  %v3961_v52 = vpop.f32.mrb[114].mxu0 }
 0x95b   : > { %v3962_v40 = vpop.f32.mrb[115].mxu0 }
 0x95c   : > { %v3157_v38 = vadd.f32 %v3960_v47, %v6258_v3  ;;  %v3963_v11 = vadd.f32 %v3962_v40, %v3961_v52 }
 0x95e   : > { %v3160_v58 = vadd.f32 %v3963_v11, %v6258_v3  ;;  %v6303_v5 = vadd.f32 %v3157_v38, %v6176_v6 }
 0x960   : > { %3219 = vadd.xlane.f32.xlu0 %v6303_v5  ;;  %v3964_v26 = vpop.f32.mrb[116].mxu0  ;;  %v6307_v59 = vadd.f32 %v3160_v58, %v6179_v35 }
 0x961   : > { %v3965_v51 = vpop.f32.mrb[117].mxu0 }
 0x962   : > { %v3966_v2 = vadd.f32 %v3965_v51, %v3964_v26  ;;  %3221 = vadd.xlane.f32.xlu1 %v6307_v59  ;;  %v3967_v45 = vpop.f32.mrb[118].mxu0 }
 0x963   : > { %v3968_v62 = vpop.f32.mrb[119].mxu0 }
 0x964   : > { %v3165_v9 = vadd.f32 %v3966_v2, %v6258_v3  ;;  %v3969_v33 = vadd.f32 %v3968_v62, %v3967_v45 }
 0x966   : > { %v3168_v53 = vadd.f32 %v3969_v33, %v6258_v3  ;;  %v6313_v6 = vadd.f32 %v3165_v9, %v6189_v14 }
 0x968   : > { %3223 = vadd.xlane.f32.xlu0 %v6313_v6  ;;  %v3970_v31 = vpop.f32.mrb[120].mxu0  ;;  %v6317_v35 = vadd.f32 %v3168_v53, %v6192_v17 }
 0x969   : > { %v3971_v30 = vpop.f32.mrb[121].mxu0 }
 0x96a   : > { %v3972_v49 = vadd.f32 %v3971_v30, %v3970_v31  ;;  %3225 = vadd.xlane.f32.xlu1 %v6317_v35  ;;  %v3973_v42 = vpop.f32.mrb[122].mxu0 }
 0x96b   : > { %v3974_v22 = vpop.f32.mrb[123].mxu0 }
 0x96c   : > { %v3173_v1 = vadd.f32 %v3972_v49, %v6258_v3  ;;  %v3975_v57 = vadd.f32 %v3974_v22, %v3973_v42 }
 0x96e   : > { %v3176_v55 = vadd.f32 %v3975_v57, %v6258_v3  ;;  %v6323_v14 = vadd.f32 %v3173_v1, %v6202_v24 }
 0x970   : > { %3227 = vadd.xlane.f32.xlu0 %v6323_v14  ;;  %v3976_v4 = vpop.f32.mrb[124].mxu0  ;;  %v6327_v17 = vadd.f32 %v3176_v55, %v6205_v29 }
 0x971   : > { %v3977_v39 = vpop.f32.mrb[125].mxu0 }
 0x972   : > { %v3978_v41 = vadd.f32 %v3977_v39, %v3976_v4  ;;  %3229 = vadd.xlane.f32.xlu1 %v6327_v17  ;;  %v3979_v34 = vpop.f32.mrb[126].mxu0 }
 0x973   : > { %v3980_v23 = vpop.f32.mrb[127].mxu0 }
 0x974   : > { %v3181_v54 = vadd.f32 %v3978_v41, %v6258_v3  ;;  %v3981_v36 = vadd.f32 %v3980_v23, %v3979_v34 }
 0x976   : > { %v3184_v50 = vadd.f32 %v3981_v36, %v6258_v3  ;;  %v6333_v24 = vadd.f32 %v3181_v54, %v6215_v61 }
 0x978   : > { %3231 = vadd.xlane.f32.xlu0 %v6333_v24  ;;  %v6337_v46 = vadd.f32 %v3184_v50, %v6218_v56 }
 0x97a   : > { %3233 = vadd.xlane.f32.xlu1 %v6337_v46 }
 0x9cd   : > { %v3204_v29 = vpop.xlane.xlu0 %3203 }
 0x9ce   : > { %v3235_v44 = vmul.f32 0.0078125, %v3204_v29 }
 0x9cf   : > { %v3206_v15 = vpop.xlane.xlu1 %3205 }
 0x9d0   : > { %v6341_v48 = vsub.f32 %v6263_v12, %v3235_v44  ;;  %v3236_v0 = vmul.f32 0.0078125, %v3206_v15 }
 0x9d2   : > { %v6344_v21 = vsub.f32 %v6267_v18, %v3236_v0  ;;  %v3267_v61 = vmul.f32 %v6341_v48, %v6341_v48 }
 0x9d4   : > { %3283 = vadd.xlane.f32.xlu0 %v3267_v61  ;;  %v3268_v56 = vmul.f32 %v6344_v21, %v6344_v21 }
 0x9d5   : > { %v3208_v3 = vpop.xlane.xlu0 %3207 }
 0x9d6   : > { %v3237_v8 = vmul.f32 0.0078125, %v3208_v3  ;;  %3285 = vadd.xlane.f32.xlu1 %v3268_v56 }
 0x9d7   : > { %v3210_v63 = vpop.xlane.xlu1 %3209 }
 0x9d8   : > { %v6351_v25 = vsub.f32 %v6273_v43, %v3237_v8  ;;  %v3238_v12 = vmul.f32 0.0078125, %v3210_v63 }
 0x9da   : > { %v6354_v28 = vsub.f32 %v6277_v16, %v3238_v12  ;;  %v3269_v18 = vmul.f32 %v6351_v25, %v6351_v25 }
 0x9dc   : > { %3287 = vadd.xlane.f32.xlu0 %v3269_v18  ;;  %v3270_v32 = vmul.f32 %v6354_v28, %v6354_v28 }
 0x9dd   : > { %v3212_v60 = vpop.xlane.xlu0 %3211 }
 0x9de   : > { %v3239_v13 = vmul.f32 0.0078125, %v3212_v60  ;;  %3289 = vadd.xlane.f32.xlu1 %v3270_v32 }
 0x9df   : > { %v3214_v20 = vpop.xlane.xlu1 %3213 }
 0x9e0   : > { %v6361_v27 = vsub.f32 %v6283_v37, %v3239_v13  ;;  %v3240_v43 = vmul.f32 0.0078125, %v3214_v20 }
 0x9e2   : > { %v6364_v47 = vsub.f32 %v6287_v7, %v3240_v43  ;;  %v3271_v16 = vmul.f32 %v6361_v27, %v6361_v27 }
 0x9e4   : > { %3291 = vadd.xlane.f32.xlu0 %v3271_v16  ;;  %v3272_v52 = vmul.f32 %v6364_v47, %v6364_v47 }
 0x9e5   : > { %v3216_v40 = vpop.xlane.xlu0 %3215 }
 0x9e6   : > { %v3241_v38 = vmul.f32 0.0078125, %v3216_v40  ;;  %3293 = vadd.xlane.f32.xlu1 %v3272_v52 }
 0x9e7   : > { %v3218_v11 = vpop.xlane.xlu1 %3217 }
 0x9e8   : > { %v6371_v58 = vsub.f32 %v6293_v19, %v3241_v38  ;;  %v3242_v37 = vmul.f32 0.0078125, %v3218_v11 }
 0x9ea   : > { %v6374_v26 = vsub.f32 %v6297_v10, %v3242_v37  ;;  %v3273_v7 = vmul.f32 %v6371_v58, %v6371_v58 }
 0x9ec   : > { %3295 = vadd.xlane.f32.xlu0 %v3273_v7  ;;  %v3274_v51 = vmul.f32 %v6374_v26, %v6374_v26 }
 0x9ed   : > { %v3220_v2 = vpop.xlane.xlu0 %3219 }
 0x9ee   : > { %v3243_v45 = vmul.f32 0.0078125, %v3220_v2  ;;  %3297 = vadd.xlane.f32.xlu1 %v3274_v51 }
 0x9ef   : > { %v3222_v62 = vpop.xlane.xlu1 %3221 }
 0x9f0   : > { %v6381_v9 = vsub.f32 %v6303_v5, %v3243_v45  ;;  %v3244_v19 = vmul.f32 0.0078125, %v3222_v62 }
 0x9f2   : > { %v6384_v33 = vsub.f32 %v6307_v59, %v3244_v19  ;;  %v3275_v10 = vmul.f32 %v6381_v9, %v6381_v9 }
 0x9f4   : > { %3299 = vadd.xlane.f32.xlu0 %v3275_v10  ;;  %v3276_v53 = vmul.f32 %v6384_v33, %v6384_v33 }
 0x9f5   : > { %v3224_v31 = vpop.xlane.xlu0 %3223 }
 0x9f6   : > { %v3245_v30 = vmul.f32 0.0078125, %v3224_v31  ;;  %3301 = vadd.xlane.f32.xlu1 %v3276_v53 }
 0x9f7   : > { %v3226_v49 = vpop.xlane.xlu1 %3225 }
 0x9f8   : > { %v6391_v42 = vsub.f32 %v6313_v6, %v3245_v30  ;;  %v3246_v5 = vmul.f32 0.0078125, %v3226_v49 }
 0x9fa   : > { %v6394_v22 = vsub.f32 %v6317_v35, %v3246_v5  ;;  %v3277_v59 = vmul.f32 %v6391_v42, %v6391_v42 }
 0x9fc   : > { %3303 = vadd.xlane.f32.xlu0 %v3277_v59  ;;  %v3278_v1 = vmul.f32 %v6394_v22, %v6394_v22 }
 0x9fd   : > { %v3228_v57 = vpop.xlane.xlu0 %3227 }
 0x9fe   : > { %v3247_v55 = vmul.f32 0.0078125, %v3228_v57  ;;  %3305 = vadd.xlane.f32.xlu1 %v3278_v1 }
 0x9ff   : > { %v3230_v4 = vpop.xlane.xlu1 %3229 }
 0xa00   : > { %v6401_v39 = vsub.f32 %v6323_v14, %v3247_v55  ;;  %v3248_v6 = vmul.f32 0.0078125, %v3230_v4 }
 0xa02   : > { %v6404_v41 = vsub.f32 %v6327_v17, %v3248_v6  ;;  %v3279_v35 = vmul.f32 %v6401_v39, %v6401_v39 }
 0xa04   : > { %3307 = vadd.xlane.f32.xlu0 %v3279_v35  ;;  %v3280_v34 = vmul.f32 %v6404_v41, %v6404_v41 }
 0xa05   : > { %v3232_v23 = vpop.xlane.xlu0 %3231 }
 0xa06   : > { %v3249_v54 = vmul.f32 0.0078125, %v3232_v23  ;;  %3309 = vadd.xlane.f32.xlu1 %v3280_v34 }
 0xa07   : > { %v3234_v14 = vpop.xlane.xlu1 %3233 }
 0xa08   : > { %v6411_v36 = vsub.f32 %v6333_v24, %v3249_v54  ;;  %v3250_v17 = vmul.f32 0.0078125, %v3234_v14 }
 0xa0a   : > { %v6414_v50 = vsub.f32 %v6337_v46, %v3250_v17  ;;  %v3281_v29 = vmul.f32 %v6411_v36, %v6411_v36 }
 0xa0c   : > { %3311 = vadd.xlane.f32.xlu0 %v3281_v29  ;;  %v3282_v44 = vmul.f32 %v6414_v50, %v6414_v50 }
 0xa0e   : > { %3313 = vadd.xlane.f32.xlu1 %v3282_v44 }
 0xa0f   : > { %4869 = shalt.err (!%p4866_p10)
}
 0xa10   : > { %s4870_s20 = scalar_lea.hbm %s6426_s24, 2048  ;;  %s4874_s10 = scalar_lea.hbm %s6626_s23, 4096 }
 0xa11   : > { %p4871_p11 = scmp.ne.s32.totalorder %s6426_s24, %s4870_s20  ;;  %p4875_p7 = scmp.lt.u32.totalorder %s6426_s24, %s6626_s23 }
 0xa12   : > { %p4876_p6 = scmp.lt.u32.totalorder %s4874_s10, %s4870_s20  ;;  %p4878_p12 = scmp.lt.u32.totalorder %s4870_s20, %s6426_s24 }
 0xa13   : > { %p4872_p0 = pnand %p4871_p11, %p6627_p13 }
 0xa14   : > { %p4877_p9 = por %p4876_p6, %p4875_p7 }
 0xa15   : > { %p4873_p5 = pneg %p4872_p0 }
 0xa16   : > { %p4879_p1 = por %p4878_p12, %p4877_p9 }
 0xa18   : > { %p4880_p3 = pnand %p4879_p1, %p4873_p5 }
 0xa1a   : > { %4883 = shalt.err (!%p4880_p3)
}
 0xa1b   : > { %s6602_s18 = smov 128   ;;  %s4988_s17 = smov 8   ;;  %v6458_v13 = vld [vmem:[#allocation18 + $0x4] ss:$0 sm:$0xff]  ;;  %v6461_v52 = vld [vmem:[#allocation18 + $0x5] ss:$0 sm:$0xff] }
 0xa1c   : > { %4161 = dma.vmem_to_hbm [thread:$0]  (%p6627_p13), %s6429_s29, 2048, %s6426_s24, %s3441_s25, %s6602_s18, %s6602_s18, %s4988_s17  }
 0xa1d   : > { %s6468_s26 = scalar_lea.vmem [#allocation21], %s5361_s28  ;;  %s6628_s24 = sshll.u32 %s5066_s19, 11 }
 0xa1e   : > { %s3454_s28 = sshll.u32 %s6468_s26, 4  ;;  %s6629_s20 = sld [smem:[#allocation32_spill]]  ;;  %s6536_s28 = int_to_ptr.vmem [resolvable:$true] %s3454_s28 }
 0xa1f   : > { %s3436_s27 = scalar_lea.sflag [#allocation8], %s5358_s30  ;;  %s4884_s10 = scalar_lea.vmem %s6536_s28, 2048 }
 0xa20   : > { %p4885_p2 = scmp.ne.s32.totalorder %s6536_s28, %s4884_s10  ;;  %s4989_s9 = smov [#allocation21]  }
 0xa21   : > { %s4888_s18 = sshll.u32 %s4989_s9, 4  ;;  %s4889_s18 = int_to_ptr.vmem [resolvable:$false] %s4888_s18 }
 0xa22   : > { %p4886_p8 = pnand %p4885_p2, %p6627_p13  ;;  %s4890_s19 = scalar_lea.vmem %s4889_s18, 4096 }
 0xa23   : > { %p4891_p10 = scmp.lt.s32.totalorder %s6536_s28, %s4889_s18  ;;  %p4892_p11 = scmp.lt.s32.totalorder %s4890_s19, %s4884_s10 }
 0xa24   : > { %s6534_s12 = scalar_lea.hbm %s6629_s20, %s6628_s24  ;;  %p4887_p4 = pneg %p4886_p8 }
 0xa25   : > { %p4893_p0 = por %p4892_p11, %p4891_p10 }
 0xa27   : > { %p4894_p5 = pnand %p4893_p0, %p4887_p4 }
 0xa61   : > { %v3284_v24 = vpop.xlane.xlu0 %3283 }
 0xa62   : > { %v3315_v46 = vmul.f32 0.0078125, %v3284_v24 }
 0xa63   : > { %v3286_v15 = vpop.xlane.xlu1 %3285 }
 0xa64   : > { %v3331_v0 = vadd.f32 1e-05, %v3315_v46  ;;  %v3316_v61 = vmul.f32 0.0078125, %v3286_v15 }
 0xa66   : > { %4554 = vrsqrt.f32 %v3331_v0  ;;  %v3332_v56 = vadd.f32 1e-05, %v3316_v61 }
 0xa68   : > { %4556 = vrsqrt.f32 %v3332_v56 }
 0xa69   : > { %v3288_v3 = vpop.xlane.xlu0 %3287 }
 0xa6a   : > { %v3317_v8 = vmul.f32 0.0078125, %v3288_v3 }
 0xa6b   : > { %v3290_v63 = vpop.xlane.xlu1 %3289 }
 0xa6c   : > { %v3333_v12 = vadd.f32 1e-05, %v3317_v8  ;;  %v3318_v18 = vmul.f32 0.0078125, %v3290_v63 }
 0xa6e   : > { %4558 = vrsqrt.f32 %v3333_v12  ;;  %v3334_v32 = vadd.f32 1e-05, %v3318_v18 }
 0xa70   : > { %v4555_v60 = vpop.eup %4554  ;;  %4560 = vrsqrt.f32 %v3334_v32 }
 0xa71   : > { %v3363_v20 = vmul.f32 %v4555_v60, %v6341_v48  ;;  %v3292_v43 = vpop.xlane.xlu0 %3291 }
 0xa72   : > { %v4557_v16 = vpop.eup %4556  ;;  %v3319_v40 = vmul.f32 0.0078125, %v3292_v43 }
 0xa73   : > { %v3383_v38 = vmul.f32 %v6458_v13, %v3363_v20  ;;  %v3364_v11 = vmul.f32 %v4557_v16, %v6344_v21  ;;  %v3294_v37 = vpop.xlane.xlu1 %3293 }
 0xa74   : > { %v3335_v7 = vadd.f32 1e-05, %v3319_v40  ;;  %v3320_v51 = vmul.f32 0.0078125, %v3294_v37 }
 0xa75   : > { %v3403_v2 = vadd.f32 %v6461_v52, %v3383_v38  ;;  %v3384_v45 = vmul.f32 %v6458_v13, %v3364_v11 }
 0xa76   : > { %4562 = vrsqrt.f32 %v3335_v7  ;;  %v3336_v62 = vadd.f32 1e-05, %v3320_v51 }
 0xa77   : > { %3419 = vst [vmem:[%s6468_s26] sm:$0xff] %v3403_v2  ;;  %v3404_v48 = vadd.f32 %v6461_v52, %v3384_v45 }
 0xa78   : > { %v4559_v19 = vpop.eup %4558  ;;  %4564 = vrsqrt.f32 %v3336_v62 }
 0xa79   : > { %3420 = vst [vmem:[%s6468_s26 + $0x8] sm:$0xff] %v3404_v48  ;;  %v3365_v21 = vmul.f32 %v4559_v19, %v6351_v25  ;;  %v3296_v10 = vpop.xlane.xlu0 %3295 }
 0xa7a   : > { %v4561_v53 = vpop.eup %4560  ;;  %v3321_v31 = vmul.f32 0.0078125, %v3296_v10 }
 0xa7b   : > { %v3385_v30 = vmul.f32 %v6458_v13, %v3365_v21  ;;  %v3366_v49 = vmul.f32 %v4561_v53, %v6354_v28  ;;  %v3298_v5 = vpop.xlane.xlu1 %3297 }
 0xa7c   : > { %v3337_v59 = vadd.f32 1e-05, %v3321_v31  ;;  %v3322_v1 = vmul.f32 0.0078125, %v3298_v5 }
 0xa7d   : > { %v3405_v57 = vadd.f32 %v6461_v52, %v3385_v30  ;;  %v3386_v55 = vmul.f32 %v6458_v13, %v3366_v49 }
 0xa7e   : > { %4566 = vrsqrt.f32 %v3337_v59  ;;  %v3338_v4 = vadd.f32 1e-05, %v3322_v1 }
 0xa7f   : > { %3421 = vst [vmem:[%s6468_s26 + $0x10] sm:$0xff] %v3405_v57  ;;  %v3406_v25 = vadd.f32 %v6461_v52, %v3386_v55 }
 0xa80   : > { %v4563_v6 = vpop.eup %4562  ;;  %4568 = vrsqrt.f32 %v3338_v4 }
 0xa81   : > { %3422 = vst [vmem:[%s6468_s26 + $0x18] sm:$0xff] %v3406_v25  ;;  %v3367_v35 = vmul.f32 %v4563_v6, %v6361_v27  ;;  %v3300_v34 = vpop.xlane.xlu0 %3299 }
 0xa82   : > { %v4565_v28 = vpop.eup %4564  ;;  %v3323_v23 = vmul.f32 0.0078125, %v3300_v34 }
 0xa83   : > { %v3387_v54 = vmul.f32 %v6458_v13, %v3367_v35  ;;  %v3368_v14 = vmul.f32 %v4565_v28, %v6364_v47  ;;  %v3302_v17 = vpop.xlane.xlu1 %3301 }
 0xa84   : > { %v3339_v29 = vadd.f32 1e-05, %v3323_v23  ;;  %v3324_v44 = vmul.f32 0.0078125, %v3302_v17 }
 0xa85   : > { %v3407_v24 = vadd.f32 %v6461_v52, %v3387_v54  ;;  %v3388_v46 = vmul.f32 %v6458_v13, %v3368_v14 }
 0xa86   : > { %4570 = vrsqrt.f32 %v3339_v29  ;;  %v3340_v15 = vadd.f32 1e-05, %v3324_v44 }
 0xa87   : > { %3423 = vst [vmem:[%s6468_s26 + $0x20] sm:$0xff] %v3407_v24  ;;  %v3408_v27 = vadd.f32 %v6461_v52, %v3388_v46 }
 0xa88   : > { %v4567_v0 = vpop.eup %4566  ;;  %4572 = vrsqrt.f32 %v3340_v15 }
 0xa89   : > { %3424 = vst [vmem:[%s6468_s26 + $0x28] sm:$0xff] %v3408_v27  ;;  %v3369_v61 = vmul.f32 %v4567_v0, %v6371_v58  ;;  %v3304_v56 = vpop.xlane.xlu0 %3303 }
 0xa8a   : > { %v4569_v47 = vpop.eup %4568  ;;  %v3325_v3 = vmul.f32 0.0078125, %v3304_v56 }
 0xa8b   : > { %v3389_v8 = vmul.f32 %v6458_v13, %v3369_v61  ;;  %v3370_v63 = vmul.f32 %v4569_v47, %v6374_v26  ;;  %v3306_v12 = vpop.xlane.xlu1 %3305 }
 0xa8c   : > { %v3341_v18 = vadd.f32 1e-05, %v3325_v3  ;;  %v3326_v32 = vmul.f32 0.0078125, %v3306_v12 }
 0xa8d   : > { %v3409_v60 = vadd.f32 %v6461_v52, %v3389_v8  ;;  %v3390_v20 = vmul.f32 %v6458_v13, %v3370_v63 }
 0xa8e   : > { %4574 = vrsqrt.f32 %v3341_v18  ;;  %v3342_v43 = vadd.f32 1e-05, %v3326_v32 }
 0xa8f   : > { %3425 = vst [vmem:[%s6468_s26 + $0x30] sm:$0xff] %v3409_v60  ;;  %v3410_v58 = vadd.f32 %v6461_v52, %v3390_v20 }
 0xa90   : > { %v4571_v16 = vpop.eup %4570  ;;  %4576 = vrsqrt.f32 %v3342_v43 }
 0xa91   : > { %3426 = vst [vmem:[%s6468_s26 + $0x38] sm:$0xff] %v3410_v58  ;;  %v3371_v40 = vmul.f32 %v4571_v16, %v6381_v9  ;;  %v3308_v38 = vpop.xlane.xlu0 %3307 }
 0xa92   : > { %v4573_v26 = vpop.eup %4572  ;;  %v3327_v11 = vmul.f32 0.0078125, %v3308_v38 }
 0xa93   : > { %v3391_v37 = vmul.f32 %v6458_v13, %v3371_v40  ;;  %v3372_v7 = vmul.f32 %v4573_v26, %v6384_v33  ;;  %v3310_v51 = vpop.xlane.xlu1 %3309 }
 0xa94   : > { %v3343_v2 = vadd.f32 1e-05, %v3327_v11  ;;  %v3328_v45 = vmul.f32 0.0078125, %v3310_v51 }
 0xa95   : > { %v3411_v62 = vadd.f32 %v6461_v52, %v3391_v37  ;;  %v3392_v48 = vmul.f32 %v6458_v13, %v3372_v7 }
 0xa96   : > { %4578 = vrsqrt.f32 %v3343_v2  ;;  %v3344_v19 = vadd.f32 1e-05, %v3328_v45 }
 0xa97   : > { %3427 = vst [vmem:[%s6468_s26 + $0x40] sm:$0xff] %v3411_v62  ;;  %v3412_v9 = vadd.f32 %v6461_v52, %v3392_v48 }
 0xa98   : > { %v4575_v21 = vpop.eup %4574  ;;  %4580 = vrsqrt.f32 %v3344_v19 }
 0xa99   : > { %3428 = vst [vmem:[%s6468_s26 + $0x48] sm:$0xff] %v3412_v9  ;;  %v3373_v10 = vmul.f32 %v4575_v21, %v6391_v42  ;;  %v3312_v53 = vpop.xlane.xlu0 %3311 }
 0xa9a   : > { %v4577_v33 = vpop.eup %4576  ;;  %v3329_v31 = vmul.f32 0.0078125, %v3312_v53 }
 0xa9b   : > { %v3393_v30 = vmul.f32 %v6458_v13, %v3373_v10  ;;  %v3374_v49 = vmul.f32 %v4577_v33, %v6394_v22  ;;  %v3314_v5 = vpop.xlane.xlu1 %3313 }
 0xa9c   : > { %v3345_v59 = vadd.f32 1e-05, %v3329_v31  ;;  %v3330_v1 = vmul.f32 0.0078125, %v3314_v5 }
 0xa9d   : > { %v3413_v57 = vadd.f32 %v6461_v52, %v3393_v30  ;;  %v3394_v55 = vmul.f32 %v6458_v13, %v3374_v49 }
 0xa9e   : > { %4582 = vrsqrt.f32 %v3345_v59  ;;  %v3346_v4 = vadd.f32 1e-05, %v3330_v1 }
 0xa9f   : > { %3429 = vst [vmem:[%s6468_s26 + $0x50] sm:$0xff] %v3413_v57  ;;  %v3414_v42 = vadd.f32 %v6461_v52, %v3394_v55 }
 0xaa0   : > { %v4579_v25 = vpop.eup %4578  ;;  %4584 = vrsqrt.f32 %v3346_v4 }
 0xaa1   : > { %3430 = vst [vmem:[%s6468_s26 + $0x58] sm:$0xff] %v3414_v42  ;;  %v3375_v22 = vmul.f32 %v4579_v25, %v6401_v39 }
 0xaa2   : > { %v4581_v6 = vpop.eup %4580 }
 0xaa3   : > { %v3395_v35 = vmul.f32 %v6458_v13, %v3375_v22  ;;  %v3376_v34 = vmul.f32 %v4581_v6, %v6404_v41 }
 0xaa5   : > { %v3415_v28 = vadd.f32 %v6461_v52, %v3395_v35  ;;  %v3396_v23 = vmul.f32 %v6458_v13, %v3376_v34 }
 0xaa7   : > { %3431 = vst [vmem:[%s6468_s26 + $0x60] sm:$0xff] %v3415_v28  ;;  %v3416_v54 = vadd.f32 %v6461_v52, %v3396_v23 }
 0xaa8   : > { %v4583_v14 = vpop.eup %4582 }
 0xaa9   : > { %3432 = vst [vmem:[%s6468_s26 + $0x68] sm:$0xff] %v3416_v54  ;;  %v3377_v39 = vmul.f32 %v4583_v14, %v6411_v36 }
 0xaaa   : > { %v4585_v17 = vpop.eup %4584 }
 0xaab   : > { %v3397_v29 = vmul.f32 %v6458_v13, %v3377_v39  ;;  %v3378_v41 = vmul.f32 %v4585_v17, %v6414_v50 }
 0xaad   : > { %v3417_v44 = vadd.f32 %v6461_v52, %v3397_v29  ;;  %v3398_v24 = vmul.f32 %v6458_v13, %v3378_v41 }
 0xaaf   : > { %3433 = vst [vmem:[%s6468_s26 + $0x70] sm:$0xff] %v3417_v44  ;;  %v3418_v46 = vadd.f32 %v6461_v52, %v3398_v24 }
 0xab1   : > { %3434 = vst [vmem:[%s6468_s26 + $0x78] sm:$0xff] %v3418_v46 }
 0xab2   : > { %4897 = shalt.err (!%p4894_p5)
}
 0xab3   : > { %s4898_s26 = scalar_lea.hbm %s6534_s12, 2048  ;;  %s4902_s25 = scalar_lea.hbm %s6629_s20, 4096 }
 0xab4   : > { %p4899_p7 = scmp.ne.s32.totalorder %s6534_s12, %s4898_s26  ;;  %p4903_p12 = scmp.lt.u32.totalorder %s6534_s12, %s6629_s20 }
 0xab5   : > { %p4904_p1 = scmp.lt.u32.totalorder %s4902_s25, %s4898_s26  ;;  %p4906_p2 = scmp.lt.u32.totalorder %s4898_s26, %s6534_s12 }
 0xab6   : > { %p4900_p6 = pnand %p4899_p7, %p6627_p13 }
 0xab7   : > { %p4905_p3 = por %p4904_p1, %p4903_p12 }
 0xab8   : > { %p4901_p9 = pneg %p4900_p6 }
 0xab9   : > { %p4907_p8 = por %p4906_p2, %p4905_p3 }
 0xabb   : > { %p4908_p4 = pnand %p4907_p8, %p4901_p9 }
 0xabd   : > { %4911 = shalt.err (!%p4908_p4)
}
 0xabe   : > { %s6630_s10 = smov 128  }
 0xabf   : > { %4160 = dma.vmem_to_hbm [thread:$0]  (%p6627_p13), %s6536_s28, 2048, %s6534_s12, %s3436_s27, %s6630_s10, %s6630_s10, %s4988_s17  }
 0xac0 PF: > { %s3485_s19 = sand.u32 1, %s4958_s13   ;;  %p6631_p10 = scmp.ne.s32.totalorder %s6614_s22, 0 }
 0xac1   : > { %p6632_p11 = scmp.ge.s32.totalorder %s4970_s16, 2  ;;  %s3486_s26 = scalar_lea.sflag [#allocation8], %s3485_s19 }
 0xac3   : > { %p4194_p0 = pnand %p6632_p11, %p6631_p10 }
 0xac5   : > { %4949 = dma.done.wait (!%p4194_p0), %s3486_s26, 2048  }
 0xac6   : > { %4951 = vsyncadd (!%p4194_p0), %s3486_s26, 4294965248  ;;  %s3495_s21 = scalar_lea.sflag [#allocation23], %s3485_s19 }
 0xac7   : > { %4953 = dma.done.wait (!%p4194_p0), %s3495_s21, 2048  }
 0xac8   : > { %4955 = vsyncadd (!%p4194_p0), %s3495_s21, 4294965248  ;;  %p31_p13 = scmp.ge.s32.totalorder %s5276_s11, 4   ;;  %s6633_s13 = smov %s4962_s14 }
 0xac9   : > { %s6634_s14 = smov %s4966_s15  ;;  %s6635_s15 = smov %s5287_s1 }
 0xaca   : > { %s6636_s16 = smov %s5276_s11  ;;  %33 = sbr.rel (!%p31_p13) target bundleno = 15 (0xf), region = 150 }
 0xad1   :  { %3500 = vsyncpa [#allocation7], 1 }
 0xad2   :  { %3502 = vsyncpa [#allocation7 + $0x1], 1 }
 0xad3   :  { %3503 = vsyncpa [#allocation10], 1 }
 0xad4   :  { %3504 = vsyncpa [#allocation13], 1 }
 0xad5   :  { %3505 = vsyncpa [#allocation16], 1 }
 0xad6   :  { %3506 = vsyncpa [#allocation19], 1 }
 0xad7   :  { %3507 = vsyncpa [#allocation8], 1 }
 0xad8   :  { %3509 = vsyncpa [#allocation8 + $0x1], 1 }
 0xad9   :  { %3510 = vsyncpa [#allocation23], 1 }
 0xada   :  { %3512 = vsyncpa [#allocation23 + $0x1], 1 }

</bundles_post_ra>
